<compile_context>
chip_gen: v7x
topology: tpu7x:2x2x1
jax: 0.10.0
libtpu: 0.0.40
codegen_flags: <defaults>
</compile_context>

<pallas_src>
import math
import jax
import jax.numpy as jnp
from jax.experimental import pallas as pl
from jax.experimental.pallas import tpu as pltpu

N_EMBD = 256
N_HEAD = 8
HEAD_DIM = N_EMBD // N_HEAD
LN_EPS = 1e-5


def _layernorm(x, g, b):
    mu = jnp.mean(x, axis=-1, keepdims=True)
    xc = x - mu
    var = jnp.mean(xc * xc, axis=-1, keepdims=True)
    return xc * jax.lax.rsqrt(var + LN_EPS) * g + b


def block_kernel(x_ref,
                 ln1_g, ln1_b, ln2_g, ln2_b,
                 wqkv, bqkv, wp, bp, w1, b1, w2, b2,
                 o_ref):
    bb, T, C = x_ref.shape
    M = bb * T
    x = x_ref[...].reshape(M, C)                      # (M, C) f32; leading-dim collapse only

    # ---------------- attention branch: x = x + proj(attn(ln1(x))) ----------------
    h = _layernorm(x, ln1_g[...], ln1_b[...])

    # fused QKV: single MXU weight stream instead of three separate GEMMs
    qkv = jnp.dot(h, wqkv[...], preferred_element_type=jnp.float32) + bqkv[...]
    scale = 1.0 / math.sqrt(HEAD_DIM)
    q = qkv[:, :C] * scale                            # scale hoisted onto q once
    k = qkv[:, C:2 * C]
    v = qkv[:, 2 * C:]

    # Per-batch-element attention; the 8 heads are batched into one 3-D einsum pair
    # (contraction handled by dot_general dims -> no explicit kh.T materialization).
    # TODO(synk): for large T convert these static loops to lax.fori_loop / a T-tiling
    # grid axis to bound live ranges (unnecessary at T=16).
    y_rows = []
    for bi in range(bb):
        rows = slice(bi * T, (bi + 1) * T)
        qb, kb, vb = q[rows], k[rows], v[rows]        # (T, C) each
        q3 = jnp.stack([qb[:, hh * HEAD_DIM:(hh + 1) * HEAD_DIM] for hh in range(N_HEAD)], axis=0)
        k3 = jnp.stack([kb[:, hh * HEAD_DIM:(hh + 1) * HEAD_DIM] for hh in range(N_HEAD)], axis=0)
        v3 = jnp.stack([vb[:, hh * HEAD_DIM:(hh + 1) * HEAD_DIM] for hh in range(N_HEAD)], axis=0)
        # scores: (H, T, T); reference applies NO causal mask (buffer registered but unused)
        s = jnp.einsum('htd,hsd->hts', q3, k3, preferred_element_type=jnp.float32)
        s = s - jnp.max(s, axis=-1, keepdims=True)
        e = jnp.exp(s)
        denom = jnp.sum(e, axis=-1, keepdims=True)    # (H, T, 1)
        o3 = jnp.einsum('hts,hsd->htd', e, v3, preferred_element_type=jnp.float32)
        o3 = o3 * pl.reciprocal(denom, approx=True)   # fold softmax denom into (T,d) output
        y_rows.append(jnp.concatenate([o3[hh] for hh in range(N_HEAD)], axis=-1))  # (T, C)
    y = y_rows[0] if bb == 1 else jnp.concatenate(y_rows, axis=0)                  # (M, C)

    y = jnp.dot(y, wp[...], preferred_element_type=jnp.float32) + bp[...]
    x = x + y

    # ---------------- MLP branch: x = x + W2(GELU2(W1(ln2(x)))) ----------------
    h2 = _layernorm(x, ln2_g[...], ln2_b[...])
    m = jnp.dot(h2, w1[...], preferred_element_type=jnp.float32) + b1[...]
    m = m * jax.nn.sigmoid(1.702 * m)                 # GELU2
    m = jnp.dot(m, w2[...], preferred_element_type=jnp.float32) + b2[...]

    o_ref[...] = (x + m).reshape(bb, T, C).astype(o_ref.dtype)


def init_params(key):
    """Deterministic PyTorch-like init. Linear weights stored as (in, out)."""
    ks = jax.random.split(key, 12)

    def linear(k, fan_in, fan_out):
        kw, kb = jax.random.split(k)
        bound = 1.0 / math.sqrt(fan_in)
        w = jax.random.uniform(kw, (fan_in, fan_out), jnp.float32, -bound, bound)
        b = jax.random.uniform(kb, (1, fan_out), jnp.float32, -bound, bound)
        return w, b

    C = N_EMBD
    ln1_g = jnp.ones((1, C), jnp.float32)
    ln1_b = jnp.zeros((1, C), jnp.float32)
    ln2_g = jnp.ones((1, C), jnp.float32)
    ln2_b = jnp.zeros((1, C), jnp.float32)
    wq, bq = linear(ks[0], C, C)
    wk, bk = linear(ks[1], C, C)
    wv, bv = linear(ks[2], C, C)
    wp, bp = linear(ks[3], C, C)
    w1, b1 = linear(ks[4], C, 4 * C)
    w2, b2 = linear(ks[5], 4 * C, C)
    return (ln1_g, ln1_b, ln2_g, ln2_b,
            wq, bq, wk, bk, wv, bv,
            wp, bp, w1, b1, w2, b2)


def _choose_block_batch(batch, T):
    # aim for Bb*T >= ~128 rows per grid step, but keep >=2 grid steps when the
    # batch allows so megacore / dimension_semantics=("parallel",) has work to split
    bb = max(1, min(-(-128 // T), batch))
    if batch >= 2:
        bb = min(bb, max(1, -(-batch // 2)))
    return bb


def my_block_2(x_nchw, params):
    b, c, h, w = x_nchw.shape
    assert c == N_EMBD, "channel dim must equal n_embd (256)"
    T = h * w
    # NCHW -> (B, T, C)
    x = jnp.transpose(x_nchw, (0, 2, 3, 1)).reshape(b, T, c)

    (ln1_g, ln1_b, ln2_g, ln2_b,
     wq, bq, wk, bk, wv, bv,
     wp, bp, w1, b1, w2, b2) = params
    # pack QKV weights/biases in the wrapper (one fused projection in-kernel)
    wqkv = jnp.concatenate([wq, wk, wv], axis=1)      # (C, 3C)
    bqkv = jnp.concatenate([bq, bk, bv], axis=1)      # (1, 3C)
    packed = (ln1_g, ln1_b, ln2_g, ln2_b, wqkv, bqkv, wp, bp, w1, b1, w2, b2)

    bb = _choose_block_batch(b, T)
    b_pad = -(-b // bb) * bb
    if b_pad != b:
        x = jnp.pad(x, ((0, b_pad - b), (0, 0), (0, 0)))

    in_specs = [pl.BlockSpec((bb, T, c), lambda i: (i, 0, 0))]
    for p in packed:
        # weights/biases: full-array blocks with constant index (all are 2-D).
        # NOTE: constant index -> on v7x one could single-buffer these
        # (pipeline_mode=pl.Buffered(1)) for extra VMEM headroom.
        in_specs.append(pl.BlockSpec(p.shape, lambda i: (0, 0)))

    out = pl.pallas_call(
        block_kernel,
        out_shape=jax.ShapeDtypeStruct((b_pad, T, c), jnp.float32),
        grid_spec=pltpu.PrefetchScalarGridSpec(
            num_scalar_prefetch=0,
            grid=(b_pad // bb,),
            in_specs=in_specs,
            out_specs=pl.BlockSpec((bb, T, c), lambda i: (i, 0, 0)),
        ),
        compiler_params=pltpu.CompilerParams(
            dimension_semantics=("parallel",),
            vmem_limit_bytes=32 << 20,   # actual footprint ~6 MiB; leave v7x (64 MiB) headroom
        ),
    )(x, *packed)

    out = out[:b]
    # (B, T, C) -> NCHW
    return jnp.transpose(out.reshape(b, h, w, c), (0, 3, 1, 2))


def _reference(x_nchw, params):
    """Plain-JAX mirror of the PyTorch forward (f32, exact softmax)."""
    (ln1_g, ln1_b, ln2_g, ln2_b,
     wq, bq, wk, bk, wv, bv,
     wp, bp, w1, b1, w2, b2) = params
    b, c, h, w = x_nchw.shape
    T = h * w
    x = jnp.transpose(x_nchw, (0, 2, 3, 1)).reshape(b, T, c)

    def ln(z, g, bt):
        mu = jnp.mean(z, -1, keepdims=True)
        var = jnp.mean((z - mu) ** 2, -1, keepdims=True)
        return (z - mu) * jax.lax.rsqrt(var + LN_EPS) * g + bt

    hl = ln(x, ln1_g, ln1_b)
    q = (hl @ wq + bq).reshape(b, T, N_HEAD, HEAD_DIM).transpose(0, 2, 1, 3)
    k = (hl @ wk + bk).reshape(b, T, N_HEAD, HEAD_DIM).transpose(0, 2, 1, 3)
    v = (hl @ wv + bv).reshape(b, T, N_HEAD, HEAD_DIM).transpose(0, 2, 1, 3)
    att = (q @ jnp.swapaxes(k, -1, -2)) * (1.0 / math.sqrt(HEAD_DIM))
    att = jax.nn.softmax(att, axis=-1)
    y = (att @ v).transpose(0, 2, 1, 3).reshape(b, T, c)
    x = x + (y @ wp + bp)
    h2 = ln(x, ln2_g, ln2_b)
    m = h2 @ w1 + b1
    m = m * jax.nn.sigmoid(1.702 * m)
    x = x + (m @ w2 + b2)
    return jnp.transpose(x.reshape(b, h, w, c), (0, 3, 1, 2))


if __name__ == "__main__":
    key = jax.random.PRNGKey(0)
    kx, kp = jax.random.split(key)

    # small shapes consistent with the module: B=2, C=n_embd=256, H=W=4 (T=16)
    x = jax.random.normal(kx, (2, N_EMBD, 4, 4), dtype=jnp.float32)
    params = init_params(kp)

    out = my_block_2(x, params)
    out = jax.block_until_ready(out)

    assert out.shape == x.shape, out.shape
    assert bool(jnp.all(jnp.isfinite(out)))

    ref = _reference(x, params)
    assert bool(jnp.allclose(out, ref, rtol=2e-2, atol=2e-3)), float(jnp.max(jnp.abs(out - ref)))

    print("KERNEL_OK")
</pallas_src>

<mosaic_0001>
module attributes {stable_mosaic.version = 11 : i64} {
  func.func @block_kernel(%arg0: i32, %arg1: memref<1x16x256xf32, #tpu.memory_space<vmem>>, %arg2: memref<1x256xf32, #tpu.memory_space<vmem>>, %arg3: memref<1x256xf32, #tpu.memory_space<vmem>>, %arg4: memref<1x256xf32, #tpu.memory_space<vmem>>, %arg5: memref<1x256xf32, #tpu.memory_space<vmem>>, %arg6: memref<256x768xf32, #tpu.memory_space<vmem>>, %arg7: memref<1x768xf32, #tpu.memory_space<vmem>>, %arg8: memref<256x256xf32, #tpu.memory_space<vmem>>, %arg9: memref<1x256xf32, #tpu.memory_space<vmem>>, %arg10: memref<256x1024xf32, #tpu.memory_space<vmem>>, %arg11: memref<1x1024xf32, #tpu.memory_space<vmem>>, %arg12: memref<1024x256xf32, #tpu.memory_space<vmem>>, %arg13: memref<1x256xf32, #tpu.memory_space<vmem>>, %arg14: memref<1x16x256xf32, #tpu.memory_space<vmem>>) attributes {dimension_semantics = [#tpu.dimension_semantics<parallel>], iteration_bounds = array<i64: 2>, scalar_prefetch = 0 : i64, scratch_operands = 0 : i64, tpu.core_type = #tpu.core_type<tc>, window_params = [{transform_indices = @transform_0, window_bounds = array<i64: 1, 16, 256>}, {pipeline_mode = #tpu.pipeline_mode<synchronous>, transform_indices = @transform_1, window_bounds = array<i64: 1, 256>}, {pipeline_mode = #tpu.pipeline_mode<synchronous>, transform_indices = @transform_2, window_bounds = array<i64: 1, 256>}, {pipeline_mode = #tpu.pipeline_mode<synchronous>, transform_indices = @transform_3, window_bounds = array<i64: 1, 256>}, {pipeline_mode = #tpu.pipeline_mode<synchronous>, transform_indices = @transform_4, window_bounds = array<i64: 1, 256>}, {pipeline_mode = #tpu.pipeline_mode<synchronous>, transform_indices = @transform_5, window_bounds = array<i64: 256, 768>}, {pipeline_mode = #tpu.pipeline_mode<synchronous>, transform_indices = @transform_6, window_bounds = array<i64: 1, 768>}, {pipeline_mode = #tpu.pipeline_mode<synchronous>, transform_indices = @transform_7, window_bounds = array<i64: 256, 256>}, {pipeline_mode = #tpu.pipeline_mode<synchronous>, transform_indices = @transform_8, window_bounds = array<i64: 1, 256>}, {pipeline_mode = #tpu.pipeline_mode<synchronous>, transform_indices = @transform_9, window_bounds = array<i64: 256, 1024>}, {pipeline_mode = #tpu.pipeline_mode<synchronous>, transform_indices = @transform_10, window_bounds = array<i64: 1, 1024>}, {pipeline_mode = #tpu.pipeline_mode<synchronous>, transform_indices = @transform_11, window_bounds = array<i64: 1024, 256>}, {pipeline_mode = #tpu.pipeline_mode<synchronous>, transform_indices = @transform_12, window_bounds = array<i64: 1, 256>}, {transform_indices = @transform_13, window_bounds = array<i64: 1, 16, 256>}]} {
    %c0 = arith.constant 0 : index
    %c0_0 = arith.constant 0 : index
    %c0_1 = arith.constant 0 : index
    %0 = vector.load %arg1[%c0, %c0_0, %c0_1] : memref<1x16x256xf32, #tpu.memory_space<vmem>>, vector<1x16x256xf32>
    %1 = vector.shape_cast %0 : vector<1x16x256xf32> to vector<16x256xf32>
    %c0_2 = arith.constant 0 : index
    %c0_3 = arith.constant 0 : index
    %2 = vector.load %arg2[%c0_2, %c0_3] : memref<1x256xf32, #tpu.memory_space<vmem>>, vector<1x256xf32>
    %c0_4 = arith.constant 0 : index
    %c0_5 = arith.constant 0 : index
    %3 = vector.load %arg3[%c0_4, %c0_5] : memref<1x256xf32, #tpu.memory_space<vmem>>, vector<1x256xf32>
    %cst = arith.constant dense<0.000000e+00> : vector<16xf32>
    %4 = vector.multi_reduction <add>, %1, %cst [1] : vector<16x256xf32> to vector<16xf32>
    %5 = vector.shape_cast %4 : vector<16xf32> to vector<16x1xf32>
    %cst_6 = arith.constant 2.560000e+02 : f32
    %6 = vector.broadcast %cst_6 : f32 to vector<16x1xf32>
    %7 = arith.divf %5, %6 : vector<16x1xf32>
    %8 = vector.broadcast %7 : vector<16x1xf32> to vector<16x256xf32>
    %9 = arith.subf %1, %8 : vector<16x256xf32>
    %10 = arith.mulf %9, %9 : vector<16x256xf32>
    %cst_7 = arith.constant dense<0.000000e+00> : vector<16xf32>
    %11 = vector.multi_reduction <add>, %10, %cst_7 [1] : vector<16x256xf32> to vector<16xf32>
    %12 = vector.shape_cast %11 : vector<16xf32> to vector<16x1xf32>
    %cst_8 = arith.constant 2.560000e+02 : f32
    %13 = vector.broadcast %cst_8 : f32 to vector<16x1xf32>
    %14 = arith.divf %12, %13 : vector<16x1xf32>
    %cst_9 = arith.constant 9.99999974E-6 : f32
    %15 = vector.broadcast %cst_9 : f32 to vector<16x1xf32>
    %16 = arith.addf %14, %15 : vector<16x1xf32>
    %17 = math.rsqrt %16 : vector<16x1xf32>
    %18 = vector.broadcast %17 : vector<16x1xf32> to vector<16x256xf32>
    %19 = arith.mulf %9, %18 : vector<16x256xf32>
    %20 = vector.broadcast %2 : vector<1x256xf32> to vector<16x256xf32>
    %21 = arith.mulf %19, %20 : vector<16x256xf32>
    %22 = vector.broadcast %3 : vector<1x256xf32> to vector<16x256xf32>
    %23 = arith.addf %21, %22 : vector<16x256xf32>
    %c0_10 = arith.constant 0 : index
    %c0_11 = arith.constant 0 : index
    %24 = vector.load %arg6[%c0_10, %c0_11] : memref<256x768xf32, #tpu.memory_space<vmem>>, vector<256x768xf32>
    %cst_12 = arith.constant dense<0.000000e+00> : vector<16x768xf32>
    %25 = tpu.matmul %23, %24, %cst_12 {dimension_numbers = #tpu.dot_dimension_numbers<[1], [0], [0], [1], [0, 0, 1, 1], [], []>} : vector<16x256xf32>, vector<256x768xf32>, vector<16x768xf32> -> vector<16x768xf32>
    %c0_13 = arith.constant 0 : index
    %c0_14 = arith.constant 0 : index
    %26 = vector.load %arg7[%c0_13, %c0_14] : memref<1x768xf32, #tpu.memory_space<vmem>>, vector<1x768xf32>
    %27 = vector.broadcast %26 : vector<1x768xf32> to vector<16x768xf32>
    %28 = arith.addf %25, %27 : vector<16x768xf32>
    %29 = vector.extract_strided_slice %28 {offsets = [0, 0], sizes = [16, 256], strides = [1, 1]} : vector<16x768xf32> to vector<16x256xf32>
    %cst_15 = arith.constant 0.176776692 : f32
    %30 = vector.broadcast %cst_15 : f32 to vector<16x256xf32>
    %31 = arith.mulf %29, %30 : vector<16x256xf32>
    %32 = vector.extract_strided_slice %28 {offsets = [0, 256], sizes = [16, 256], strides = [1, 1]} : vector<16x768xf32> to vector<16x256xf32>
    %33 = vector.extract_strided_slice %28 {offsets = [0, 512], sizes = [16, 256], strides = [1, 1]} : vector<16x768xf32> to vector<16x256xf32>
    %34 = vector.extract_strided_slice %31 {offsets = [0, 0], sizes = [16, 32], strides = [1, 1]} : vector<16x256xf32> to vector<16x32xf32>
    %35 = vector.extract_strided_slice %31 {offsets = [0, 32], sizes = [16, 32], strides = [1, 1]} : vector<16x256xf32> to vector<16x32xf32>
    %36 = vector.extract_strided_slice %31 {offsets = [0, 64], sizes = [16, 32], strides = [1, 1]} : vector<16x256xf32> to vector<16x32xf32>
    %37 = vector.extract_strided_slice %31 {offsets = [0, 96], sizes = [16, 32], strides = [1, 1]} : vector<16x256xf32> to vector<16x32xf32>
    %38 = vector.extract_strided_slice %31 {offsets = [0, 128], sizes = [16, 32], strides = [1, 1]} : vector<16x256xf32> to vector<16x32xf32>
    %39 = vector.extract_strided_slice %31 {offsets = [0, 160], sizes = [16, 32], strides = [1, 1]} : vector<16x256xf32> to vector<16x32xf32>
    %40 = vector.extract_strided_slice %31 {offsets = [0, 192], sizes = [16, 32], strides = [1, 1]} : vector<16x256xf32> to vector<16x32xf32>
    %41 = vector.extract_strided_slice %31 {offsets = [0, 224], sizes = [16, 32], strides = [1, 1]} : vector<16x256xf32> to vector<16x32xf32>
    %42 = vector.shape_cast %34 : vector<16x32xf32> to vector<1x16x32xf32>
    %43 = vector.shape_cast %35 : vector<16x32xf32> to vector<1x16x32xf32>
    %44 = vector.shape_cast %36 : vector<16x32xf32> to vector<1x16x32xf32>
    %45 = vector.shape_cast %37 : vector<16x32xf32> to vector<1x16x32xf32>
    %46 = vector.shape_cast %38 : vector<16x32xf32> to vector<1x16x32xf32>
    %47 = vector.shape_cast %39 : vector<16x32xf32> to vector<1x16x32xf32>
    %48 = vector.shape_cast %40 : vector<16x32xf32> to vector<1x16x32xf32>
    %49 = vector.shape_cast %41 : vector<16x32xf32> to vector<1x16x32xf32>
    %50 = tpu.concatenate %42, %43, %44, %45, %46, %47, %48, %49 in 0 : vector<1x16x32xf32>, vector<1x16x32xf32>, vector<1x16x32xf32>, vector<1x16x32xf32>, vector<1x16x32xf32>, vector<1x16x32xf32>, vector<1x16x32xf32>, vector<1x16x32xf32> -> vector<8x16x32xf32>
    %51 = vector.extract_strided_slice %32 {offsets = [0, 0], sizes = [16, 32], strides = [1, 1]} : vector<16x256xf32> to vector<16x32xf32>
    %52 = vector.extract_strided_slice %32 {offsets = [0, 32], sizes = [16, 32], strides = [1, 1]} : vector<16x256xf32> to vector<16x32xf32>
    %53 = vector.extract_strided_slice %32 {offsets = [0, 64], sizes = [16, 32], strides = [1, 1]} : vector<16x256xf32> to vector<16x32xf32>
    %54 = vector.extract_strided_slice %32 {offsets = [0, 96], sizes = [16, 32], strides = [1, 1]} : vector<16x256xf32> to vector<16x32xf32>
    %55 = vector.extract_strided_slice %32 {offsets = [0, 128], sizes = [16, 32], strides = [1, 1]} : vector<16x256xf32> to vector<16x32xf32>
    %56 = vector.extract_strided_slice %32 {offsets = [0, 160], sizes = [16, 32], strides = [1, 1]} : vector<16x256xf32> to vector<16x32xf32>
    %57 = vector.extract_strided_slice %32 {offsets = [0, 192], sizes = [16, 32], strides = [1, 1]} : vector<16x256xf32> to vector<16x32xf32>
    %58 = vector.extract_strided_slice %32 {offsets = [0, 224], sizes = [16, 32], strides = [1, 1]} : vector<16x256xf32> to vector<16x32xf32>
    %59 = vector.shape_cast %51 : vector<16x32xf32> to vector<1x16x32xf32>
    %60 = vector.shape_cast %52 : vector<16x32xf32> to vector<1x16x32xf32>
    %61 = vector.shape_cast %53 : vector<16x32xf32> to vector<1x16x32xf32>
    %62 = vector.shape_cast %54 : vector<16x32xf32> to vector<1x16x32xf32>
    %63 = vector.shape_cast %55 : vector<16x32xf32> to vector<1x16x32xf32>
    %64 = vector.shape_cast %56 : vector<16x32xf32> to vector<1x16x32xf32>
    %65 = vector.shape_cast %57 : vector<16x32xf32> to vector<1x16x32xf32>
    %66 = vector.shape_cast %58 : vector<16x32xf32> to vector<1x16x32xf32>
    %67 = tpu.concatenate %59, %60, %61, %62, %63, %64, %65, %66 in 0 : vector<1x16x32xf32>, vector<1x16x32xf32>, vector<1x16x32xf32>, vector<1x16x32xf32>, vector<1x16x32xf32>, vector<1x16x32xf32>, vector<1x16x32xf32>, vector<1x16x32xf32> -> vector<8x16x32xf32>
    %68 = vector.extract_strided_slice %33 {offsets = [0, 0], sizes = [16, 32], strides = [1, 1]} : vector<16x256xf32> to vector<16x32xf32>
    %69 = vector.extract_strided_slice %33 {offsets = [0, 32], sizes = [16, 32], strides = [1, 1]} : vector<16x256xf32> to vector<16x32xf32>
    %70 = vector.extract_strided_slice %33 {offsets = [0, 64], sizes = [16, 32], strides = [1, 1]} : vector<16x256xf32> to vector<16x32xf32>
    %71 = vector.extract_strided_slice %33 {offsets = [0, 96], sizes = [16, 32], strides = [1, 1]} : vector<16x256xf32> to vector<16x32xf32>
    %72 = vector.extract_strided_slice %33 {offsets = [0, 128], sizes = [16, 32], strides = [1, 1]} : vector<16x256xf32> to vector<16x32xf32>
    %73 = vector.extract_strided_slice %33 {offsets = [0, 160], sizes = [16, 32], strides = [1, 1]} : vector<16x256xf32> to vector<16x32xf32>
    %74 = vector.extract_strided_slice %33 {offsets = [0, 192], sizes = [16, 32], strides = [1, 1]} : vector<16x256xf32> to vector<16x32xf32>
    %75 = vector.extract_strided_slice %33 {offsets = [0, 224], sizes = [16, 32], strides = [1, 1]} : vector<16x256xf32> to vector<16x32xf32>
    %76 = vector.shape_cast %68 : vector<16x32xf32> to vector<1x16x32xf32>
    %77 = vector.shape_cast %69 : vector<16x32xf32> to vector<1x16x32xf32>
    %78 = vector.shape_cast %70 : vector<16x32xf32> to vector<1x16x32xf32>
    %79 = vector.shape_cast %71 : vector<16x32xf32> to vector<1x16x32xf32>
    %80 = vector.shape_cast %72 : vector<16x32xf32> to vector<1x16x32xf32>
    %81 = vector.shape_cast %73 : vector<16x32xf32> to vector<1x16x32xf32>
    %82 = vector.shape_cast %74 : vector<16x32xf32> to vector<1x16x32xf32>
    %83 = vector.shape_cast %75 : vector<16x32xf32> to vector<1x16x32xf32>
    %84 = tpu.concatenate %76, %77, %78, %79, %80, %81, %82, %83 in 0 : vector<1x16x32xf32>, vector<1x16x32xf32>, vector<1x16x32xf32>, vector<1x16x32xf32>, vector<1x16x32xf32>, vector<1x16x32xf32>, vector<1x16x32xf32>, vector<1x16x32xf32> -> vector<8x16x32xf32>
    "tpu.trace_start"() <{level = 10 : i32, message = "htd,hsd->hts"}> : () -> ()
    %cst_16 = arith.constant dense<0.000000e+00> : vector<8x16x16xf32>
    %85 = tpu.matmul %50, %67, %cst_16 {dimension_numbers = #tpu.dot_dimension_numbers<[2], [2], [1], [1], [0, 0, 0, 1, 1, 1], [0], [0]>} : vector<8x16x32xf32>, vector<8x16x32xf32>, vector<8x16x16xf32> -> vector<8x16x16xf32>
    "tpu.trace_stop"() : () -> ()
    %cst_17 = arith.constant dense<0xFF800000> : vector<8x16xf32>
    %86 = vector.multi_reduction <maximumf>, %85, %cst_17 [2] : vector<8x16x16xf32> to vector<8x16xf32>
    %87 = vector.shape_cast %86 : vector<8x16xf32> to vector<8x16x1xf32>
    %88 = vector.broadcast %87 : vector<8x16x1xf32> to vector<8x16x16xf32>
    %89 = arith.subf %85, %88 : vector<8x16x16xf32>
    %90 = math.exp %89 : vector<8x16x16xf32>
    %cst_18 = arith.constant dense<0.000000e+00> : vector<8x16xf32>
    %91 = vector.multi_reduction <add>, %90, %cst_18 [2] : vector<8x16x16xf32> to vector<8x16xf32>
    %92 = vector.shape_cast %91 : vector<8x16xf32> to vector<8x16x1xf32>
    "tpu.trace_start"() <{level = 10 : i32, message = "hts,hsd->htd"}> : () -> ()
    %cst_19 = arith.constant dense<0.000000e+00> : vector<8x16x32xf32>
    %93 = tpu.matmul %90, %84, %cst_19 {dimension_numbers = #tpu.dot_dimension_numbers<[2], [1], [1], [2], [0, 0, 0, 1, 1, 2], [0], [0]>} : vector<8x16x16xf32>, vector<8x16x32xf32>, vector<8x16x32xf32> -> vector<8x16x32xf32>
    "tpu.trace_stop"() : () -> ()
    %94 = tpu.reciprocal %92 {approx = true} : vector<8x16x1xf32> -> vector<8x16x1xf32>
    %95 = vector.broadcast %94 : vector<8x16x1xf32> to vector<8x16x32xf32>
    %96 = arith.mulf %93, %95 : vector<8x16x32xf32>
    %97 = vector.extract_strided_slice %96 {offsets = [0, 0, 0], sizes = [1, 16, 32], strides = [1, 1, 1]} : vector<8x16x32xf32> to vector<1x16x32xf32>
    %98 = vector.shape_cast %97 : vector<1x16x32xf32> to vector<16x32xf32>
    %99 = vector.extract_strided_slice %96 {offsets = [1, 0, 0], sizes = [1, 16, 32], strides = [1, 1, 1]} : vector<8x16x32xf32> to vector<1x16x32xf32>
    %100 = vector.shape_cast %99 : vector<1x16x32xf32> to vector<16x32xf32>
    %101 = vector.extract_strided_slice %96 {offsets = [2, 0, 0], sizes = [1, 16, 32], strides = [1, 1, 1]} : vector<8x16x32xf32> to vector<1x16x32xf32>
    %102 = vector.shape_cast %101 : vector<1x16x32xf32> to vector<16x32xf32>
    %103 = vector.extract_strided_slice %96 {offsets = [3, 0, 0], sizes = [1, 16, 32], strides = [1, 1, 1]} : vector<8x16x32xf32> to vector<1x16x32xf32>
    %104 = vector.shape_cast %103 : vector<1x16x32xf32> to vector<16x32xf32>
    %105 = vector.extract_strided_slice %96 {offsets = [4, 0, 0], sizes = [1, 16, 32], strides = [1, 1, 1]} : vector<8x16x32xf32> to vector<1x16x32xf32>
    %106 = vector.shape_cast %105 : vector<1x16x32xf32> to vector<16x32xf32>
    %107 = vector.extract_strided_slice %96 {offsets = [5, 0, 0], sizes = [1, 16, 32], strides = [1, 1, 1]} : vector<8x16x32xf32> to vector<1x16x32xf32>
    %108 = vector.shape_cast %107 : vector<1x16x32xf32> to vector<16x32xf32>
    %109 = vector.extract_strided_slice %96 {offsets = [6, 0, 0], sizes = [1, 16, 32], strides = [1, 1, 1]} : vector<8x16x32xf32> to vector<1x16x32xf32>
    %110 = vector.shape_cast %109 : vector<1x16x32xf32> to vector<16x32xf32>
    %111 = vector.extract_strided_slice %96 {offsets = [7, 0, 0], sizes = [1, 16, 32], strides = [1, 1, 1]} : vector<8x16x32xf32> to vector<1x16x32xf32>
    %112 = vector.shape_cast %111 : vector<1x16x32xf32> to vector<16x32xf32>
    %113 = tpu.concatenate %98, %100, %102, %104, %106, %108, %110, %112 in 1 : vector<16x32xf32>, vector<16x32xf32>, vector<16x32xf32>, vector<16x32xf32>, vector<16x32xf32>, vector<16x32xf32>, vector<16x32xf32>, vector<16x32xf32> -> vector<16x256xf32>
    %c0_20 = arith.constant 0 : index
    %c0_21 = arith.constant 0 : index
    %114 = vector.load %arg8[%c0_20, %c0_21] : memref<256x256xf32, #tpu.memory_space<vmem>>, vector<256x256xf32>
    %cst_22 = arith.constant dense<0.000000e+00> : vector<16x256xf32>
    %115 = tpu.matmul %113, %114, %cst_22 {dimension_numbers = #tpu.dot_dimension_numbers<[1], [0], [0], [1], [0, 0, 1, 1], [], []>} : vector<16x256xf32>, vector<256x256xf32>, vector<16x256xf32> -> vector<16x256xf32>
    %c0_23 = arith.constant 0 : index
    %c0_24 = arith.constant 0 : index
    %116 = vector.load %arg9[%c0_23, %c0_24] : memref<1x256xf32, #tpu.memory_space<vmem>>, vector<1x256xf32>
    %117 = vector.broadcast %116 : vector<1x256xf32> to vector<16x256xf32>
    %118 = arith.addf %115, %117 : vector<16x256xf32>
    %119 = arith.addf %1, %118 : vector<16x256xf32>
    %c0_25 = arith.constant 0 : index
    %c0_26 = arith.constant 0 : index
    %120 = vector.load %arg4[%c0_25, %c0_26] : memref<1x256xf32, #tpu.memory_space<vmem>>, vector<1x256xf32>
    %c0_27 = arith.constant 0 : index
    %c0_28 = arith.constant 0 : index
    %121 = vector.load %arg5[%c0_27, %c0_28] : memref<1x256xf32, #tpu.memory_space<vmem>>, vector<1x256xf32>
    %cst_29 = arith.constant dense<0.000000e+00> : vector<16xf32>
    %122 = vector.multi_reduction <add>, %119, %cst_29 [1] : vector<16x256xf32> to vector<16xf32>
    %123 = vector.shape_cast %122 : vector<16xf32> to vector<16x1xf32>
    %cst_30 = arith.constant 2.560000e+02 : f32
    %124 = vector.broadcast %cst_30 : f32 to vector<16x1xf32>
    %125 = arith.divf %123, %124 : vector<16x1xf32>
    %126 = vector.broadcast %125 : vector<16x1xf32> to vector<16x256xf32>
    %127 = arith.subf %119, %126 : vector<16x256xf32>
    %128 = arith.mulf %127, %127 : vector<16x256xf32>
    %cst_31 = arith.constant dense<0.000000e+00> : vector<16xf32>
    %129 = vector.multi_reduction <add>, %128, %cst_31 [1] : vector<16x256xf32> to vector<16xf32>
    %130 = vector.shape_cast %129 : vector<16xf32> to vector<16x1xf32>
    %cst_32 = arith.constant 2.560000e+02 : f32
    %131 = vector.broadcast %cst_32 : f32 to vector<16x1xf32>
    %132 = arith.divf %130, %131 : vector<16x1xf32>
    %cst_33 = arith.constant 9.99999974E-6 : f32
    %133 = vector.broadcast %cst_33 : f32 to vector<16x1xf32>
    %134 = arith.addf %132, %133 : vector<16x1xf32>
    %135 = math.rsqrt %134 : vector<16x1xf32>
    %136 = vector.broadcast %135 : vector<16x1xf32> to vector<16x256xf32>
    %137 = arith.mulf %127, %136 : vector<16x256xf32>
    %138 = vector.broadcast %120 : vector<1x256xf32> to vector<16x256xf32>
    %139 = arith.mulf %137, %138 : vector<16x256xf32>
    %140 = vector.broadcast %121 : vector<1x256xf32> to vector<16x256xf32>
    %141 = arith.addf %139, %140 : vector<16x256xf32>
    %c0_34 = arith.constant 0 : index
    %c0_35 = arith.constant 0 : index
    %142 = vector.load %arg10[%c0_34, %c0_35] : memref<256x1024xf32, #tpu.memory_space<vmem>>, vector<256x1024xf32>
    %cst_36 = arith.constant dense<0.000000e+00> : vector<16x1024xf32>
    %143 = tpu.matmul %141, %142, %cst_36 {dimension_numbers = #tpu.dot_dimension_numbers<[1], [0], [0], [1], [0, 0, 1, 1], [], []>} : vector<16x256xf32>, vector<256x1024xf32>, vector<16x1024xf32> -> vector<16x1024xf32>
    %c0_37 = arith.constant 0 : index
    %c0_38 = arith.constant 0 : index
    %144 = vector.load %arg11[%c0_37, %c0_38] : memref<1x1024xf32, #tpu.memory_space<vmem>>, vector<1x1024xf32>
    %145 = vector.broadcast %144 : vector<1x1024xf32> to vector<16x1024xf32>
    %146 = arith.addf %143, %145 : vector<16x1024xf32>
    %cst_39 = arith.constant 1.702000e+00 : f32
    %147 = vector.broadcast %cst_39 : f32 to vector<16x1024xf32>
    %148 = arith.mulf %147, %146 : vector<16x1024xf32>
    %149 = arith.negf %148 : vector<16x1024xf32>
    %150 = math.exp %149 : vector<16x1024xf32>
    %cst_40 = arith.constant 1.000000e+00 : f32
    %151 = vector.broadcast %cst_40 : f32 to vector<16x1024xf32>
    %152 = arith.addf %151, %150 : vector<16x1024xf32>
    %153 = arith.divf %151, %152 : vector<16x1024xf32>
    %154 = arith.mulf %146, %153 : vector<16x1024xf32>
    %c0_41 = arith.constant 0 : index
    %c0_42 = arith.constant 0 : index
    %155 = vector.load %arg12[%c0_41, %c0_42] : memref<1024x256xf32, #tpu.memory_space<vmem>>, vector<1024x256xf32>
    %cst_43 = arith.constant dense<0.000000e+00> : vector<16x256xf32>
    %156 = tpu.matmul %154, %155, %cst_43 {dimension_numbers = #tpu.dot_dimension_numbers<[1], [0], [0], [1], [0, 0, 1, 1], [], []>} : vector<16x1024xf32>, vector<1024x256xf32>, vector<16x256xf32> -> vector<16x256xf32>
    %c0_44 = arith.constant 0 : index
    %c0_45 = arith.constant 0 : index
    %157 = vector.load %arg13[%c0_44, %c0_45] : memref<1x256xf32, #tpu.memory_space<vmem>>, vector<1x256xf32>
    %158 = vector.broadcast %157 : vector<1x256xf32> to vector<16x256xf32>
    %159 = arith.addf %156, %158 : vector<16x256xf32>
    %160 = arith.addf %119, %159 : vector<16x256xf32>
    %161 = vector.shape_cast %160 : vector<16x256xf32> to vector<1x16x256xf32>
    %c0_46 = arith.constant 0 : index
    %c0_47 = arith.constant 0 : index
    %c0_48 = arith.constant 0 : index
    %162 = vector.load %arg14[%c0_46, %c0_47, %c0_48] : memref<1x16x256xf32, #tpu.memory_space<vmem>>, vector<1x16x256xf32>
    tpu.vector_store %arg14[%c0_46, %c0_47, %c0_48], %161 {strides = array<i32>} : memref<1x16x256xf32, #tpu.memory_space<vmem>>, vector<1x16x256xf32>,
    return
  }
  func.func @transform_0(%arg0: i32) -> (i32, i32, i32) {
    %c0_i32 = arith.constant 0 : i32
    %c0_i32_0 = arith.constant 0 : i32
    %c0_i32_1 = arith.constant 0 : i32
    return %arg0, %c0_i32, %c0_i32_0 : i32, i32, i32
  }
  func.func @transform_1(%arg0: i32) -> (i32, i32) {
    %c0_i32 = arith.constant 0 : i32
    %c0_i32_0 = arith.constant 0 : i32
    %c0_i32_1 = arith.constant 0 : i32
    return %c0_i32, %c0_i32_0 : i32, i32
  }
  func.func @transform_2(%arg0: i32) -> (i32, i32) {
    %c0_i32 = arith.constant 0 : i32
    %c0_i32_0 = arith.constant 0 : i32
    %c0_i32_1 = arith.constant 0 : i32
    return %c0_i32, %c0_i32_0 : i32, i32
  }
  func.func @transform_3(%arg0: i32) -> (i32, i32) {
    %c0_i32 = arith.constant 0 : i32
    %c0_i32_0 = arith.constant 0 : i32
    %c0_i32_1 = arith.constant 0 : i32
    return %c0_i32, %c0_i32_0 : i32, i32
  }
  func.func @transform_4(%arg0: i32) -> (i32, i32) {
    %c0_i32 = arith.constant 0 : i32
    %c0_i32_0 = arith.constant 0 : i32
    %c0_i32_1 = arith.constant 0 : i32
    return %c0_i32, %c0_i32_0 : i32, i32
  }
  func.func @transform_5(%arg0: i32) -> (i32, i32) {
    %c0_i32 = arith.constant 0 : i32
    %c0_i32_0 = arith.constant 0 : i32
    %c0_i32_1 = arith.constant 0 : i32
    return %c0_i32, %c0_i32_0 : i32, i32
  }
  func.func @transform_6(%arg0: i32) -> (i32, i32) {
    %c0_i32 = arith.constant 0 : i32
    %c0_i32_0 = arith.constant 0 : i32
    %c0_i32_1 = arith.constant 0 : i32
    return %c0_i32, %c0_i32_0 : i32, i32
  }
  func.func @transform_7(%arg0: i32) -> (i32, i32) {
    %c0_i32 = arith.constant 0 : i32
    %c0_i32_0 = arith.constant 0 : i32
    %c0_i32_1 = arith.constant 0 : i32
    return %c0_i32, %c0_i32_0 : i32, i32
  }
  func.func @transform_8(%arg0: i32) -> (i32, i32) {
    %c0_i32 = arith.constant 0 : i32
    %c0_i32_0 = arith.constant 0 : i32
    %c0_i32_1 = arith.constant 0 : i32
    return %c0_i32, %c0_i32_0 : i32, i32
  }
  func.func @transform_9(%arg0: i32) -> (i32, i32) {
    %c0_i32 = arith.constant 0 : i32
    %c0_i32_0 = arith.constant 0 : i32
    %c0_i32_1 = arith.constant 0 : i32
    return %c0_i32, %c0_i32_0 : i32, i32
  }
  func.func @transform_10(%arg0: i32) -> (i32, i32) {
    %c0_i32 = arith.constant 0 : i32
    %c0_i32_0 = arith.constant 0 : i32
    %c0_i32_1 = arith.constant 0 : i32
    return %c0_i32, %c0_i32_0 : i32, i32
  }
  func.func @transform_11(%arg0: i32) -> (i32, i32) {
    %c0_i32 = arith.constant 0 : i32
    %c0_i32_0 = arith.constant 0 : i32
    %c0_i32_1 = arith.constant 0 : i32
    return %c0_i32, %c0_i32_0 : i32, i32
  }
  func.func @transform_12(%arg0: i32) -> (i32, i32) {
    %c0_i32 = arith.constant 0 : i32
    %c0_i32_0 = arith.constant 0 : i32
    %c0_i32_1 = arith.constant 0 : i32
    return %c0_i32, %c0_i32_0 : i32, i32
  }
  func.func @transform_13(%arg0: i32) -> (i32, i32, i32) {
    %c0_i32 = arith.constant 0 : i32
    %c0_i32_0 = arith.constant 0 : i32
    %c0_i32_1 = arith.constant 0 : i32
    return %arg0, %c0_i32, %c0_i32_0 : i32, i32, i32
  }
}

</mosaic_0001>

<bundles_post_ra>
// kernel: tpu_custom_call.1
= control target key start
LH: loop header
LB: loop body
LE: loop exit
PB: predicated region body
PF: predicated region fallthrough
CT: control target
= control target key end

     0   :  { %s7331_s0 = inlined_call_operand.hbm [shape: f32[2,16,256], index: 0, kind: input, shape index: {}]   ;;  %s7332_s1 = inlined_call_operand.hbm [shape: f32[1,256], index: 1, kind: input, shape index: {}]   ;;  %s7333_s2 = inlined_call_operand.hbm [shape: f32[1,256], index: 2, kind: input, shape index: {}]   ;;  %s7334_s3 = inlined_call_operand.hbm [shape: f32[1,256], index: 3, kind: input, shape index: {}]   ;;  %s7335_s4 = inlined_call_operand.hbm [shape: f32[1,256], index: 4, kind: input, shape index: {}]   ;;  %s7336_s5 = inlined_call_operand.hbm [shape: f32[256,768], index: 5, kind: input, shape index: {}]   ;;  %s7337_s6 = inlined_call_operand.vmem [shape: f32[1,768], index: 6, kind: input, shape index: {}]   ;;  %s7338_s7 = inlined_call_operand.hbm [shape: f32[256,256], index: 7, kind: input, shape index: {}]   ;;  %s7339_s8 = inlined_call_operand.vmem [shape: f32[1,256], index: 8, kind: input, shape index: {}]   ;;  %s7340_s9 = inlined_call_operand.hbm [shape: f32[256,1024], index: 9, kind: input, shape index: {}]   ;;  %s7341_s10 = inlined_call_operand.vmem [shape: f32[1,1024], index: 10, kind: input, shape index: {}]   ;;  %s7342_s11 = inlined_call_operand.hbm [shape: f32[1024,256], index: 11, kind: input, shape index: {}]   ;;  %s7343_s12 = inlined_call_operand.vmem [shape: f32[1,256], index: 12, kind: input, shape index: {}]   ;;  %s7344_s13 = inlined_call_operand.hbm [shape: f32[2,16,256], index: 13, kind: output, shape index: {}]  }
   0x1   :  { %7351 = sst [smem:[#allocation24_spill]] %s7332_s1 }
   0x2   :  { %7352 = sst [smem:[#allocation25_spill]] %s7334_s3 }
   0x3   :  { %7353 = sst [smem:[#allocation26_spill]] %s7341_s10 }
   0x4   :  { %7354 = sst [smem:[#allocation27_spill]] %s7343_s12 }
   0x5   :  { %7355 = sst [smem:[#allocation28_spill]] %s7344_s13 }
   0x6   :  { %18 = vsyncpa [#allocation3], 0 }
   0x7   :  { %20 = vsyncpa [#allocation3 + $0x1], 0 }
   0x8   :  { %21 = vsyncpa [#allocation6], 0 }
   0x9   :  { %22 = vsyncpa [#allocation9], 0 }
   0xa   :  { %23 = vsyncpa [#allocation12], 0 }
   0xb   :  { %24 = vsyncpa [#allocation15], 0 }
   0xc   :  { %25 = vsyncpa [#allocation4], 0 }
   0xd   :  { %27 = vsyncpa [#allocation4 + $0x1], 0  ;;  %s6378_s25 = smov 0   ;;  %s6380_s26 = smov 0  }
   0xe   :  { %s6382_s27 = smov 0   ;;  %s6384_s28 = smov 0  }
   0xf LB: > { %s6287_s29 = smov [#allocation5]   ;;  %s6399_s14 = sadd.s32 4294967295, %s6285_s28   ;;  %s6285_s28 = sphi %s6384_s28, %s7389_s28   ;;  %s6281_s27 = sphi %s6382_s27, %s7388_s27   ;;  %s6277_s26 = sphi %s6380_s26, %s7387_s26   ;;  %s6273_s25 = sphi %s6378_s25, %s7386_s25  }
  0x10   : > { %s355_s30 = sshll.u32 %s6287_s29, 4  ;;  %p4446_p0 = scmp.ge.s32.totalorder %s6285_s28, 1  ;;  %s356_s30 = int_to_ptr.vmem [resolvable:$true] %s355_s30 }
  0x11   : > { %p7346_p1 = scmp.eq.s32.totalorder %s6399_s14, 0  ;;  %p342_p2 = scmp.lt.s32.totalorder %s6285_s28, 3 }
  0x12   : > { %s6288_s16 = smov [#allocation8]   ;;  %s6289_s18 = smov [#allocation11]  }
  0x13   : > { %p6404_p3 = pnand %p4446_p0, %p342_p2  ;;  %s377_s17 = sshll.u32 %s6288_s16, 4  ;;  %s6411_s17 = int_to_ptr.vmem [resolvable:$true] %s377_s17 }
  0x14   : > { %s398_s19 = sshll.u32 %s6289_s18, 4  ;;  %s7358_s1 = sld [smem:[#allocation24_spill]]  ;;  %s6419_s19 = int_to_ptr.vmem [resolvable:$true] %s398_s19 }
  0x15   : > { %s7356_s15 = scalar_select %p6404_p3, 1, 0 }
  0x16   : > { %p5617_p5 = pneg %p6404_p3 }
  0x18   : > { %p6415_p6 = pnand %p5617_p5, %p7346_p1 }
  0x1a   : > { %s5949_s23 = scalar_lea.hbm %s7358_s1, 32  ;;  %p6429_p8 = pneg %p6415_p6 }
  0x1b   : > { %p5950_p7 = scmp.ne.s32.totalorder %s7358_s1, %s5949_s23  ;;  %p5956_p11 = scmp.lt.u32.totalorder %s5949_s23, %s7358_s1 }
  0x1d   : > { %p5952_p9 = pnand %p6429_p8, %p5950_p7 }
  0x1f   : > { %p5953_p10 = pneg %p5952_p9 }
  0x21   : > { %p5958_p12 = pnand %p5956_p11, %p5953_p10 }
  0x23   : > { %5961 = shalt.err (!%p5958_p12)
}
  0x24   : > { %s5962_s21 = scalar_lea.vmem %s356_s30, 32  ;;  %p5970_p5 = scmp.lt.s32.totalorder %s356_s30, %s356_s30 }
  0x25   : > { %p5963_p13 = scmp.ne.s32.totalorder %s356_s30, %s5962_s21  ;;  %p5971_p4 = scmp.lt.s32.totalorder %s5962_s21, %s5962_s21 }
  0x27   : > { %p5965_p0 = pnand %p5963_p13, %p6429_p8  ;;  %p5972_p1 = por %p5971_p4, %p5970_p5 }
  0x29   : > { %p5966_p2 = pneg %p5965_p0 }
  0x2b   : > { %p5973_p3 = pnand %p5972_p1, %p5966_p2 }
  0x2d   : > { %5976 = shalt.err (!%p5973_p3)
}
  0x2e   : > { %5620 = dma.hbm_to_vmem [thread:$0]  (!%p6415_p6), %s7358_s1, 32, %s356_s30, [#allocation6]  }
  0x2f   : > { %s7360_s3 = sld [smem:[#allocation25_spill]] }
  0x35   : > { %s5977_s29 = scalar_lea.hbm %s7360_s3, 32 }
  0x36   : > { %p5978_p7 = scmp.ne.s32.totalorder %s7360_s3, %s5977_s29  ;;  %p5984_p1 = scmp.lt.u32.totalorder %s5977_s29, %s7360_s3 }
  0x38   : > { %p5980_p9 = pnand %p5978_p7, %p6429_p8 }
  0x3a   : > { %p5981_p4 = pneg %p5980_p9 }
  0x3c   : > { %p5986_p3 = pnand %p5984_p1, %p5981_p4 }
  0x3e   : > { %5989 = shalt.err (!%p5986_p3)
}
  0x3f   : > { %s5990_s30 = scalar_lea.vmem %s6411_s17, 32  ;;  %p5998_p13 = scmp.lt.s32.totalorder %s6411_s17, %s6411_s17 }
  0x40   : > { %p5991_p10 = scmp.ne.s32.totalorder %s6411_s17, %s5990_s30  ;;  %p5999_p0 = scmp.lt.s32.totalorder %s5990_s30, %s5990_s30 }
  0x42   : > { %p5993_p11 = pnand %p5991_p10, %p6429_p8  ;;  %p6000_p2 = por %p5999_p0, %p5998_p13 }
  0x44   : > { %p5994_p12 = pneg %p5993_p11 }
  0x46   : > { %p6001_p5 = pnand %p6000_p2, %p5994_p12 }
  0x48   : > { %6004 = shalt.err (!%p6001_p5)
}
  0x49   : > { %5626 = dma.hbm_to_vmem [thread:$0]  (!%p6415_p6), %s7360_s3, 32, %s6411_s17, [#allocation9]  }
  0x4a   : > { %s6005_s13 = scalar_lea.hbm %s7336_s5, 24576 }
  0x4b   : > { %p6006_p7 = scmp.ne.s32.totalorder %s7336_s5, %s6005_s13  ;;  %p6012_p1 = scmp.lt.u32.totalorder %s6005_s13, %s7336_s5 }
  0x4d   : > { %p6008_p9 = pnand %p6006_p7, %p6429_p8 }
  0x4f   : > { %p6009_p4 = pneg %p6008_p9 }
  0x51   : > { %p6014_p3 = pnand %p6012_p1, %p6009_p4 }
  0x53   : > { %6017 = shalt.err (!%p6014_p3)
}
  0x54   : > { %s6018_s17 = scalar_lea.vmem %s6419_s19, 24576  ;;  %p6026_p13 = scmp.lt.s32.totalorder %s6419_s19, %s6419_s19 }
  0x55   : > { %p6019_p10 = scmp.ne.s32.totalorder %s6419_s19, %s6018_s17  ;;  %p6027_p0 = scmp.lt.s32.totalorder %s6018_s17, %s6018_s17 }
  0x57   : > { %p6021_p11 = pnand %p6019_p10, %p6429_p8  ;;  %p6028_p2 = por %p6027_p0, %p6026_p13 }
  0x59   : > { %p6022_p12 = pneg %p6021_p11 }
  0x5b   : > { %p6029_p5 = pnand %p6028_p2, %p6022_p12 }
  0x5d   : > { %6032 = shalt.err (!%p6029_p5)
}
  0x5e   : > { %s6290_s30 = smov 768   ;;  %s6291_s10 = smov 48  }
  0x5f   : > { %5632 = dma.hbm_to_vmem [thread:$0]  (!%p6415_p6), %s7336_s5, 24576, %s6419_s19, [#allocation12], %s6290_s30, %s6290_s30, %s6291_s10  }
  0x60   : > { %s6292_s24 = smov [#allocation14]   ;;  %s6033_s18 = scalar_lea.hbm %s7340_s9, 32768 }
  0x61   : > { %s430_s13 = sshll.u32 %s6292_s24, 4  ;;  %p6034_p7 = scmp.ne.s32.totalorder %s7340_s9, %s6033_s18  ;;  %s431_s13 = int_to_ptr.vmem [resolvable:$true] %s430_s13 }
  0x62   : > { %p6040_p1 = scmp.lt.u32.totalorder %s6033_s18, %s7340_s9 }
  0x63   : > { %p6036_p9 = pnand %p6034_p7, %p6429_p8 }
  0x65   : > { %p6037_p4 = pneg %p6036_p9 }
  0x67   : > { %p6042_p3 = pnand %p6040_p1, %p6037_p4 }
  0x69   : > { %6045 = shalt.err (!%p6042_p3)
}
  0x6a   : > { %s6046_s19 = scalar_lea.vmem %s431_s13, 32768  ;;  %p6054_p13 = scmp.lt.s32.totalorder %s431_s13, %s431_s13 }
  0x6b   : > { %p6047_p10 = scmp.ne.s32.totalorder %s431_s13, %s6046_s19  ;;  %p6055_p0 = scmp.lt.s32.totalorder %s6046_s19, %s6046_s19 }
  0x6d   : > { %p6049_p11 = pnand %p6047_p10, %p6429_p8  ;;  %p6056_p2 = por %p6055_p0, %p6054_p13 }
  0x6f   : > { %p6050_p12 = pneg %p6049_p11 }
  0x71   : > { %p6057_p5 = pnand %p6056_p2, %p6050_p12 }
  0x73   : > { %6060 = shalt.err (!%p6057_p5)
}
  0x74   : > { %s6293_s30 = smov 1024   ;;  %s6294_s10 = smov 64  }
  0x75   : > { %5638 = dma.hbm_to_vmem [thread:$0]  (!%p6415_p6), %s7340_s9, 32768, %s431_s13, [#allocation15], %s6293_s30, %s6293_s30, %s6294_s10  }
  0x76   : > { %s6295_s12 = smov [#allocation7]   ;;  %s6296_s24 = smov [#allocation10]  }
  0x77   : > { %s366_s22 = sshll.u32 %s6295_s12, 4  ;;  %s388_s23 = sshll.u32 %s6296_s24, 4  ;;  %s367_s22 = int_to_ptr.vmem [resolvable:$true] %s366_s22  ;;  %s6509_s23 = int_to_ptr.vmem [resolvable:$true] %s388_s23 }
  0x78   : > { %s6061_s21 = scalar_lea.hbm %s7333_s2, 32 }
  0x79   : > { %p6062_p7 = scmp.ne.s32.totalorder %s7333_s2, %s6061_s21  ;;  %p6068_p1 = scmp.lt.u32.totalorder %s6061_s21, %s7333_s2 }
  0x7b   : > { %p6064_p9 = pnand %p6062_p7, %p6429_p8 }
  0x7d   : > { %p6065_p4 = pneg %p6064_p9 }
  0x7f   : > { %p6070_p3 = pnand %p6068_p1, %p6065_p4 }
  0x81   : > { %6073 = shalt.err (!%p6070_p3)
}
  0x82   : > { %s6074_s30 = scalar_lea.vmem %s367_s22, 32  ;;  %p6082_p13 = scmp.lt.s32.totalorder %s367_s22, %s367_s22 }
  0x83   : > { %p6075_p10 = scmp.ne.s32.totalorder %s367_s22, %s6074_s30  ;;  %p6083_p0 = scmp.lt.s32.totalorder %s6074_s30, %s6074_s30 }
  0x85   : > { %p6077_p11 = pnand %p6075_p10, %p6429_p8  ;;  %p6084_p2 = por %p6083_p0, %p6082_p13 }
  0x87   : > { %p6078_p12 = pneg %p6077_p11 }
  0x89   : > { %p6085_p5 = pnand %p6084_p2, %p6078_p12 }
  0x8b   : > { %6088 = shalt.err (!%p6085_p5)
}
  0x8c   : > { %5623 = dma.hbm_to_vmem [thread:$0]  (!%p6415_p6), %s7333_s2, 32, %s367_s22, [#allocation6]  }
  0x8d   : > { %s6089_s29 = scalar_lea.hbm %s7335_s4, 32 }
  0x8e   : > { %p6090_p7 = scmp.ne.s32.totalorder %s7335_s4, %s6089_s29  ;;  %p6096_p1 = scmp.lt.u32.totalorder %s6089_s29, %s7335_s4 }
  0x90   : > { %p6092_p9 = pnand %p6090_p7, %p6429_p8 }
  0x92   : > { %p6093_p4 = pneg %p6092_p9 }
  0x94   : > { %p6098_p3 = pnand %p6096_p1, %p6093_p4 }
  0x96   : > { %6101 = shalt.err (!%p6098_p3)
}
  0x97   : > { %s6102_s22 = scalar_lea.vmem %s6509_s23, 32  ;;  %p6110_p13 = scmp.lt.s32.totalorder %s6509_s23, %s6509_s23 }
  0x98   : > { %p6103_p10 = scmp.ne.s32.totalorder %s6509_s23, %s6102_s22  ;;  %p6111_p0 = scmp.lt.s32.totalorder %s6102_s22, %s6102_s22 }
  0x9a   : > { %p6105_p11 = pnand %p6103_p10, %p6429_p8  ;;  %p6112_p2 = por %p6111_p0, %p6110_p13 }
  0x9c   : > { %p6106_p12 = pneg %p6105_p11 }
  0x9e   : > { %p6113_p5 = pnand %p6112_p2, %p6106_p12 }
  0xa0   : > { %6116 = shalt.err (!%p6113_p5)
}
  0xa1   : > { %5629 = dma.hbm_to_vmem [thread:$0]  (!%p6415_p6), %s7335_s4, 32, %s6509_s23, [#allocation9]  }
  0xa2   : > { %s6297_s30 = smov [#allocation13]   ;;  %s6117_s24 = scalar_lea.hbm %s7338_s7, 8192 }
  0xa3   : > { %s414_s10 = sshll.u32 %s6297_s30, 4  ;;  %p6118_p7 = scmp.ne.s32.totalorder %s7338_s7, %s6117_s24  ;;  %s415_s10 = int_to_ptr.vmem [resolvable:$true] %s414_s10 }
  0xa4   : > { %p6124_p1 = scmp.lt.u32.totalorder %s6117_s24, %s7338_s7 }
  0xa5   : > { %p6120_p9 = pnand %p6118_p7, %p6429_p8 }
  0xa7   : > { %p6121_p4 = pneg %p6120_p9 }
  0xa9   : > { %p6126_p3 = pnand %p6124_p1, %p6121_p4 }
  0xab   : > { %6129 = shalt.err (!%p6126_p3)
}
  0xac   : > { %s6130_s23 = scalar_lea.vmem %s415_s10, 8192  ;;  %p6138_p13 = scmp.lt.s32.totalorder %s415_s10, %s415_s10 }
  0xad   : > { %p6131_p10 = scmp.ne.s32.totalorder %s415_s10, %s6130_s23  ;;  %p6139_p0 = scmp.lt.s32.totalorder %s6130_s23, %s6130_s23 }
  0xaf   : > { %p6133_p11 = pnand %p6131_p10, %p6429_p8  ;;  %p6140_p2 = por %p6139_p0, %p6138_p13 }
  0xb1   : > { %p6134_p12 = pneg %p6133_p11 }
  0xb3   : > { %p6141_p5 = pnand %p6140_p2, %p6134_p12 }
  0xb5   : > { %6144 = shalt.err (!%p6141_p5)
}
  0xb6   : > { %s7348_s19 = smov 256   ;;  %s7349_s22 = smov 16  }
  0xb7   : > { %5635 = dma.hbm_to_vmem [thread:$0]  (!%p6415_p6), %s7338_s7, 8192, %s415_s10, [#allocation12], %s7348_s19, %s7348_s19, %s7349_s22  }
  0xb8   : > { %s6300_s30 = smov [#allocation16]   ;;  %s6145_s29 = scalar_lea.hbm %s7342_s11, 32768 }
  0xb9   : > { %s446_s3 = sshll.u32 %s6300_s30, 4  ;;  %p6146_p7 = scmp.ne.s32.totalorder %s7342_s11, %s6145_s29  ;;  %s447_s3 = int_to_ptr.vmem [resolvable:$true] %s446_s3 }
  0xba   : > { %p6152_p1 = scmp.lt.u32.totalorder %s6145_s29, %s7342_s11 }
  0xbb   : > { %p6148_p9 = pnand %p6146_p7, %p6429_p8 }
  0xbd   : > { %p6149_p4 = pneg %p6148_p9 }
  0xbf   : > { %p6154_p3 = pnand %p6152_p1, %p6149_p4 }
  0xc1   : > { %6157 = shalt.err (!%p6154_p3)
}
  0xc2   : > { %s6158_s10 = scalar_lea.vmem %s447_s3, 32768  ;;  %p6166_p13 = scmp.lt.s32.totalorder %s447_s3, %s447_s3 }
  0xc3   : > { %p6159_p10 = scmp.ne.s32.totalorder %s447_s3, %s6158_s10  ;;  %p6167_p0 = scmp.lt.s32.totalorder %s6158_s10, %s6158_s10 }
  0xc5   : > { %p6161_p11 = pnand %p6159_p10, %p6429_p8  ;;  %p6168_p2 = por %p6167_p0, %p6166_p13 }
  0xc7   : > { %p6162_p12 = pneg %p6161_p11 }
  0xc9   : > { %p6169_p5 = pnand %p6168_p2, %p6162_p12 }
  0xcb   : > { %6172 = shalt.err (!%p6169_p5)
}
  0xcc   : > { %5641 = dma.hbm_to_vmem [thread:$0]  (!%p6415_p6), %s7342_s11, 32768, %s447_s3, [#allocation15], %s7348_s19, %s7348_s19, %s7349_s22  }
  0xcd   : > { %s4445_s20 = sadd.s32 4294967294, %s6285_s28   ;;  %s6596_s16 = sadd.s32 1, %s6285_s28  }
  0xce   : > { %s37_s30 = ssub.s32 %s6285_s28, %s6596_s16  ;;  %s40_s12 = sadd.s32 1, %s6281_s27 }
  0xcf   : > { %p38_p8 = scmp.eq.s32.totalorder %s37_s30, 0  ;;  %p47_p7 = scmp.ne.s32.totalorder %s6281_s27, %s6277_s26 }
  0xd0   : > { %p48_p9 = scmp.eq.s32.totalorder %s6285_s28, 0  ;;  %p53_p4 = scmp.ne.s32.totalorder %s6277_s26, %s6273_s25 }
  0xd1   : > { %s6607_s24 = scalar_select %p38_p8, %s6281_s27, %s40_s12  }
  0xd2   : > { %p6609_p1 = por %p48_p9, %p47_p7  ;;  %p7362_p3 = scmp.eq.s32.totalorder %s6399_s14, 0 }
  0xd3   : > { %p329_p10 = scmp.eq.s32.totalorder %s6399_s14, 1  ;;  %p335_p11 = scmp.eq.s32.totalorder %s4445_s20, 1 }
  0xd4   : > { %p6615_p6 = por %p7362_p3, %p53_p4  ;;  %p5658_p12 = scmp.lt.s32.totalorder %s6285_s28, 2 }
  0xd5   : > { %s463_s18 = sand.u32 1, %s6281_s27   ;;  %p6622_p13 = por %p329_p10, %p47_p7 }
  0xd6   : > { %p6626_p0 = por %p335_p11, %p53_p4  ;;  %s4456_s23 = sshll.u32 %s463_s18, 5 }
  0xd7   : > { %s7364_s21 = scalar_select %p6622_p13, 1, 0 }
  0xd8   : > { %s7365_s17 = scalar_select %p6626_p0, 1, 0 }
  0xd9   : > { %s4539_s10 = sshll.u32 %s6285_s28, 9  ;;  %s467_s20 = scalar_lea.vmem [#allocation2], %s4456_s23 }
  0xda   : > { %s6634_s30 = scalar_lea.hbm %s7331_s0, %s4539_s10  ;;  %s474_s12 = sshll.u32 %s467_s20, 4  ;;  %s6636_s12 = int_to_ptr.vmem [resolvable:$true] %s474_s12 }
  0xdb   : > { %p6640_p2 = pnand %p5658_p12, %p6609_p1  ;;  %s6644_s22 = scalar_lea.sflag [#allocation3], %s463_s18 }
  0xdc   : > { %s6173_s1 = scalar_lea.hbm %s6634_s30, 512  ;;  %s6178_s29 = scalar_lea.hbm %s7331_s0, 1024 }
  0xdd   : > { %p6174_p5 = scmp.ne.s32.totalorder %s6634_s30, %s6173_s1  ;;  %p6175_p8 = pneg %p6640_p2 }
  0xde   : > { %p6179_p4 = scmp.lt.u32.totalorder %s6634_s30, %s7331_s0  ;;  %p6180_p1 = scmp.lt.u32.totalorder %s6178_s29, %s6173_s1 }
  0xdf   : > { %p6176_p7 = pnand %p6175_p8, %p6174_p5  ;;  %p6182_p10 = scmp.lt.u32.totalorder %s6173_s1, %s6634_s30 }
  0xe0   : > { %p6181_p3 = por %p6180_p1, %p6179_p4 }
  0xe1   : > { %p6177_p9 = pneg %p6176_p7 }
  0xe2   : > { %p6183_p11 = por %p6182_p10, %p6181_p3 }
  0xe4   : > { %p6184_p12 = pnand %p6183_p11, %p6177_p9 }
  0xe6   : > { %6187 = shalt.err (!%p6184_p12)
}
  0xe7   : > { %s6188_s18 = scalar_lea.vmem %s6636_s12, 512  ;;  %s6301_s23 = smov [#allocation2]  }
  0xe8   : > { %p6189_p5 = scmp.ne.s32.totalorder %s6636_s12, %s6188_s18  ;;  %s6193_s10 = sshll.u32 %s6301_s23, 4  ;;  %s6194_s10 = int_to_ptr.vmem [resolvable:$false] %s6193_s10 }
  0xe9   : > { %s6195_s13 = scalar_lea.vmem %s6194_s10, 1024  ;;  %p6196_p13 = scmp.lt.s32.totalorder %s6636_s12, %s6194_s10 }
  0xea   : > { %p6191_p7 = pnand %p6189_p5, %p6175_p8  ;;  %p6197_p4 = scmp.lt.s32.totalorder %s6195_s13, %s6188_s18 }
  0xec   : > { %p6192_p0 = pneg %p6191_p7  ;;  %p6198_p1 = por %p6197_p4, %p6196_p13 }
  0xee   : > { %p6199_p3 = pnand %p6198_p1, %p6192_p0 }
  0xf0   : > { %6202 = shalt.err (!%p6199_p3)
}
  0xf1   : > { %s7367_s1 = smov 16   ;;  %s7368_s29 = smov 256  }
  0xf2   : > { %5645 = dma.hbm_to_vmem [thread:$0]  (!%p6640_p2), %s6634_s30, 512, %s6636_s12, %s6644_s22, %s7368_s29, %s7368_s29, %s7367_s1  }
  0xf3   : > { %p7369_p8 = scmp.ne.s32.totalorder %s7356_s15, 0 }
  0xf4   : > { %s6678_s20 = sand.u32 (!%p7369_p8), 1, %s6277_s26  }
  0xf5   : > { %486 = sbr.rel (%p7369_p8) target bundleno = 2955 (0xb8b), region = 72  ;;  %s4460_s18 = sshll.u32 (!%p7369_p8), %s6678_s20, 5 }
  0xf6   : > { %s489_s23 = scalar_lea.sflag (!%p7369_p8), [#allocation3], %s6678_s20  ;;  %s6684_s19 = scalar_lea.vmem (!%p7369_p8), [#allocation2], %s4460_s18 }
  0xfc   : > { %6248 = dma.done.wait (%p6615_p6), %s489_s23, 512  }
  0xfd   : > { %6250 = vsyncadd (%p6615_p6), %s489_s23, 4294966784  ;;  %p7370_p13 = scmp.eq.s32.totalorder %s6399_s14, 0 }
  0xff   : > { %6252 = dma.done.wait (%p7370_p13), [#allocation6], 64   ;;  %p7371_p0 = pmov %p7370_p13 }
 0x101   : > { %6254 = vsyncadd (%p7371_p0), [#allocation6], 4294967232  ;;  %p7372_p2 = pmov %p7371_p0 }
 0x102   : > { %p7373_p9 = pmov %p7371_p0 }
 0x103   : > { %6256 = dma.done.wait (%p7372_p2), [#allocation9], 64  }
 0x104   : > { %6258 = vsyncadd (%p7373_p9), [#allocation9], 4294967232  ;;  %p7374_p10 = pmov %p7371_p0 }
 0x105   : > { %p7375_p11 = pmov %p7371_p0 }
 0x106   : > { %6260 = dma.done.wait (%p7374_p10), [#allocation12], 32768  }
 0x107   : > { %6262 = vsyncadd (%p7375_p11), [#allocation12], 4294934528  ;;  %p7376_p6 = pmov %p7371_p0 }
 0x108   : > { %p7377_p12 = pmov %p7371_p0 }
 0x109   : > { %6264 = dma.done.wait (%p7376_p6), [#allocation15], 65536  }
 0x10a   : > { %6266 = vsyncadd (%p7377_p12), [#allocation15], 4294901760  ;;  %v6707_v0 = vld [vmem:[%s6684_s19] sm:$0xff]  ;;  %v6710_v1 = vld [vmem:[%s6684_s19 + $0x8] sm:$0xff]  ;;  %vm1191_vm0 = vcmask 261120   ;;  %s6302_s3 = smov 96  }
 0x10b   : > { %v6713_v2 = vld [vmem:[%s6684_s19 + $0x10] sm:$0xff]  ;;  %v573_v3 = vadd.f32 %v6710_v1, %v6707_v0  ;;  %v6718_v4 = vld [vmem:[%s6684_s19 + $0x18] sm:$0xff]  ;;  %v643_v7 = vld [vmem:[#allocation11 + $0x38] sm:$0xff]  ;;  %s6303_s30 = smov 64   ;;  %s6304_s12 = smov 32   ;;  %vm1856_vm2 = vcmask 130048  }
 0x10c   : > { %v576_v5 = vadd.f32 %v6718_v4, %v6713_v2  ;;  %v637_v6 = vld [vmem:[#allocation11 + $0x8] sm:$0xff]  ;;  %v636_v8 = vld [vmem:[#allocation11] sm:$0xff]  ;;  %v642_v10 = vld [vmem:[#allocation11 + $0x30] sm:$0xff]  ;;  %vm2731_vm3 = vcmask 523264   ;;  %vm2734_vm4 = vcmask 785408   ;;  %s7380_s23 = sld [smem:[#allocation26_spill]] }
 0x10d   : > { %574 = vadd.xlane.f32.xlu0 %v573_v3  ;;  %v4717_v9 = vpack.c.bf16 %v643_v7, %v637_v6  ;;  %v649_v11 = vld [vmem:[#allocation11 + $0x68] sm:$0xff]  ;;  %v655_v12 = vld [vmem:[#allocation11 + $0x98] sm:$0xff]  ;;  %v4719_v13 = vpack.c.bf16 %v642_v10, %v636_v8  ;;  %v648_v15 = vld [vmem:[#allocation11 + $0x60] sm:$0xff]  ;;  %s7381_s22 = sld [smem:[#allocation27_spill]]  ;;  %s7382_s13 = sld [smem:[#allocation28_spill]] }
 0x10e   : > { %v4721_v14 = vpack.c.bf16 %v655_v12, %v649_v11  ;;  %v654_v16 = vld [vmem:[#allocation11 + $0x90] sm:$0xff]  ;;  %v661_v17 = vld [vmem:[#allocation11 + $0xc8] sm:$0xff]  ;;  %v667_v18 = vld [vmem:[#allocation11 + $0xf8] sm:$0xff]  ;;  %p7383_p7 = scmp.ne.s32.totalorder %s7364_s21, 0 }
 0x10f   : > { %4718 = vmatprep.subr.bf16.mxu1 %v4717_v9  ;;  %v4723_v19 = vpack.c.bf16 %v654_v16, %v648_v15  ;;  %v4725_v20 = vpack.c.bf16 %v667_v18, %v661_v17  ;;  %v660_v21 = vld [vmem:[#allocation11 + $0xc0] sm:$0xff]  ;;  %v666_v22 = vld [vmem:[#allocation11 + $0xf0] sm:$0xff]  ;;  %v673_v23 = vld [vmem:[#allocation11 + $0x128] sm:$0xff] }
 0x110   : > { %4720 = vmatpush1.bf16.msra.mxu1 %v4719_v13  ;;  %v679_v24 = vld [vmem:[#allocation11 + $0x158] sm:$0xff]  ;;  %v4727_v25 = vpack.c.bf16 %v666_v22, %v660_v21  ;;  %v672_v27 = vld [vmem:[#allocation11 + $0x120] sm:$0xff]  ;;  %v678_v28 = vld [vmem:[#allocation11 + $0x150] sm:$0xff] }
 0x111   : > { %577 = vadd.xlane.f32.xlu0 %v576_v5  ;;  %4722 = vmatprep.subr.bf16.mxu1 %v4721_v14  ;;  %v4729_v26 = vpack.c.bf16 %v679_v24, %v673_v23  ;;  %v685_v29 = vld [vmem:[#allocation11 + $0x188] sm:$0xff]  ;;  %v691_v30 = vld [vmem:[#allocation11 + $0x1b8] sm:$0xff]  ;;  %v4731_v31 = vpack.c.bf16 %v678_v28, %v672_v27  ;;  %v684_v33 = vld [vmem:[#allocation11 + $0x180] sm:$0xff] }
 0x112   : > { %v4733_v32 = vpack.c.bf16 %v691_v30, %v685_v29  ;;  %v690_v34 = vld [vmem:[#allocation11 + $0x1b0] sm:$0xff]  ;;  %v697_v35 = vld [vmem:[#allocation11 + $0x1e8] sm:$0xff]  ;;  %v703_v36 = vld [vmem:[#allocation11 + $0x218] sm:$0xff] }
 0x113   : > { %v4735_v37 = vpack.c.bf16 %v690_v34, %v684_v33  ;;  %v4737_v38 = vpack.c.bf16 %v703_v36, %v697_v35  ;;  %v696_v39 = vld [vmem:[#allocation11 + $0x1e0] sm:$0xff]  ;;  %v702_v40 = vld [vmem:[#allocation11 + $0x210] sm:$0xff]  ;;  %v709_v41 = vld [vmem:[#allocation11 + $0x248] sm:$0xff] }
 0x114   : > { %4724 = vmatpush1.bf16.msra.mxu1 %v4723_v19  ;;  %v715_v42 = vld [vmem:[#allocation11 + $0x278] sm:$0xff]  ;;  %v4739_v43 = vpack.c.bf16 %v702_v40, %v696_v39  ;;  %v708_v45 = vld [vmem:[#allocation11 + $0x240] sm:$0xff]  ;;  %v714_v46 = vld [vmem:[#allocation11 + $0x270] sm:$0xff] }
 0x115   : > { %4726 = vmatprep.subr.bf16.mxu1 %v4725_v20  ;;  %v4741_v44 = vpack.c.bf16 %v715_v42, %v709_v41  ;;  %v721_v47 = vld [vmem:[#allocation11 + $0x2a8] sm:$0xff]  ;;  %v727_v48 = vld [vmem:[#allocation11 + $0x2d8] sm:$0xff]  ;;  %v4743_v49 = vpack.c.bf16 %v714_v46, %v708_v45  ;;  %v720_v51 = vld [vmem:[#allocation11 + $0x2a0] sm:$0xff] }
 0x116   : > { %v4745_v50 = vpack.c.bf16 %v727_v48, %v721_v47  ;;  %v726_v52 = vld [vmem:[#allocation11 + $0x2d0] sm:$0xff]  ;;  %v733_v53 = vld [vmem:[#allocation11 + $0x308] sm:$0xff]  ;;  %v739_v54 = vld [vmem:[#allocation11 + $0x338] sm:$0xff] }
 0x117   : > { %v4747_v55 = vpack.c.bf16 %v726_v52, %v720_v51  ;;  %v4749_v56 = vpack.c.bf16 %v739_v54, %v733_v53  ;;  %v732_v57 = vld [vmem:[#allocation11 + $0x300] sm:$0xff]  ;;  %v738_v58 = vld [vmem:[#allocation11 + $0x330] sm:$0xff]  ;;  %v745_v59 = vld [vmem:[#allocation11 + $0x368] sm:$0xff] }
 0x118   : > { %4728 = vmatpush1.bf16.msra.mxu1 %v4727_v25  ;;  %v751_v60 = vld [vmem:[#allocation11 + $0x398] sm:$0xff]  ;;  %v4751_v61 = vpack.c.bf16 %v738_v58, %v732_v57  ;;  %v744_v63 = vld [vmem:[#allocation11 + $0x360] sm:$0xff]  ;;  %v750_v3 = vld [vmem:[#allocation11 + $0x390] sm:$0xff]  ;;  %v607_v57 = vlaneseq }
 0x119   : > { %4730 = vmatprep.subr.bf16.mxu1 %v4729_v26  ;;  %v4753_v62 = vpack.c.bf16 %v751_v60, %v745_v59  ;;  %v757_v5 = vld [vmem:[#allocation11 + $0x3c8] sm:$0xff]  ;;  %v763_v6 = vld [vmem:[#allocation11 + $0x3f8] sm:$0xff]  ;;  %v4755_v7 = vpack.c.bf16 %v750_v3, %v744_v63  ;;  %v756_v9 = vld [vmem:[#allocation11 + $0x3c0] sm:$0xff] }
 0x11a   : > { %v4757_v8 = vpack.c.bf16 %v763_v6, %v757_v5  ;;  %v762_v10 = vld [vmem:[#allocation11 + $0x3f0] sm:$0xff]  ;;  %v769_v24 = vld [vmem:[#allocation11 + $0x428] sm:$0xff]  ;;  %v775_v25 = vld [vmem:[#allocation11 + $0x458] sm:$0xff] }
 0x11b   : > { %v4759_v11 = vpack.c.bf16 %v762_v10, %v756_v9  ;;  %v4761_v26 = vpack.c.bf16 %v775_v25, %v769_v24  ;;  %v768_v27 = vld [vmem:[#allocation11 + $0x420] sm:$0xff]  ;;  %v774_v28 = vld [vmem:[#allocation11 + $0x450] sm:$0xff]  ;;  %v787_v29 = vld [vmem:[#allocation11 + $0x4b8] sm:$0xff] }
 0x11c   : > { %4732 = vmatpush1.bf16.msra.mxu1 %v4731_v31  ;;  %v780_v31 = vld [vmem:[#allocation11 + $0x480] sm:$0xff]  ;;  %v793_v34 = vld [vmem:[#allocation11 + $0x4e8] sm:$0xff]  ;;  %v799_v35 = vld [vmem:[#allocation11 + $0x518] sm:$0xff] }
 0x11d   : > { %4734 = vmatprep.subr.bf16.mxu1 %v4733_v32  ;;  %v786_v32 = vld [vmem:[#allocation11 + $0x4b0] sm:$0xff]  ;;  %v4769_v36 = vpack.c.bf16 %v799_v35, %v793_v34  ;;  %v805_v40 = vld [vmem:[#allocation11 + $0x548] sm:$0xff]  ;;  %v811_v41 = vld [vmem:[#allocation11 + $0x578] sm:$0xff] }
 0x11e   : > { %v4767_v33 = vpack.c.bf16 %v786_v32, %v780_v31  ;;  %v804_v42 = vld [vmem:[#allocation11 + $0x540] sm:$0xff]  ;;  %v817_v45 = vld [vmem:[#allocation11 + $0x5a8] sm:$0xff]  ;;  %v823_v46 = vld [vmem:[#allocation11 + $0x5d8] sm:$0xff] }
 0x11f   : > { %v4777_v48 = vpack.c.bf16 %v823_v46, %v817_v45  ;;  %v639_v52 = vld [vmem:[#allocation11 + $0x18] sm:$0xff]  ;;  %v645_v53 = vld [vmem:[#allocation11 + $0x48] sm:$0xff]  ;;  %v668_v34 = vld [vmem:[#allocation11 + $0x100] sm:$0xff] }
 0x120   : > { %4736 = vmatpush1.bf16.msra.mxu1 %v4735_v37  ;;  %v792_v37 = vld [vmem:[#allocation11 + $0x4e0] sm:$0xff]  ;;  %v4781_v54 = vpack.c.bf16 %v645_v53, %v639_v52  ;;  %v571_v5 = vld [vmem:[#allocation5] sm:$0x3]  ;;  %v572_v6 = vld [vmem:[#allocation7] sm:$0x3] }
 0x121   : > { %4738 = vmatprep.subr.bf16.mxu1 %v4737_v38  ;;  %v798_v38 = vld [vmem:[#allocation11 + $0x510] sm:$0xff]  ;;  %v675_v35 = vld [vmem:[#allocation11 + $0x138] sm:$0xff]  ;;  %v692_v46 = vld [vmem:[#allocation11 + $0x1c0] sm:$0xff] }
 0x122   : > { %v4771_v39 = vpack.c.bf16 %v798_v38, %v792_v37  ;;  %v686_v45 = vld [vmem:[#allocation11 + $0x190] sm:$0xff]  ;;  %v704_v52 = vld [vmem:[#allocation11 + $0x220] sm:$0xff]  ;;  %v711_v53 = vld [vmem:[#allocation11 + $0x258] sm:$0xff] }
 0x123   : > { %vm6800_vm1 = vmpackc.low %vm1191_vm0, %vm1191_vm0 }
 0x124   : > { %4740 = vmatpush1.bf16.msra.mxu1 %v4739_v43  ;;  %v4773_v43 = vpack.c.bf16 %v811_v41, %v805_v40  ;;  %v680_v40 = vld [vmem:[#allocation11 + $0x160] sm:$0xff]  ;;  %v687_v41 = vld [vmem:[#allocation11 + $0x198] sm:$0xff] }
 0x125   : > { %4742 = vmatprep.subr.bf16.mxu1 %v4741_v44  ;;  %v810_v44 = vld [vmem:[#allocation11 + $0x570] sm:$0xff] }
 0x126   : > { %v4775_v47 = vpack.c.bf16 %v810_v44, %v804_v42  ;;  %v693_v42 = vld [vmem:[#allocation11 + $0x1c8] sm:$0xff] }
 0x127   : > { %v4797_v44 = vpack.c.bf16 %v693_v42, %v687_v41  ;;  %v794_v42 = vld [vmem:[#allocation11 + $0x4f0] sm:$0xff] }
 0x128   : > { %4744 = vmatpush1.bf16.msra.mxu1 %v4743_v49  ;;  %v816_v49 = vld [vmem:[#allocation11 + $0x5a0] sm:$0xff] }
 0x129   : > { %4746 = vmatprep.subr.bf16.mxu1 %v4745_v50  ;;  %v822_v50 = vld [vmem:[#allocation11 + $0x5d0] sm:$0xff] }
 0x12a   : > { %v4779_v51 = vpack.c.bf16 %v822_v50, %v816_v49  ;;  %v4799_v49 = vpack.c.bf16 %v692_v46, %v686_v45  ;;  %v813_v45 = vld [vmem:[#allocation11 + $0x588] sm:$0xff] }
 0x12c   : > { %4748 = vmatpush1.bf16.msra.mxu1 %v4747_v55 }
 0x12d   : > { %4750 = vmatprep.subr.bf16.mxu1 %v4749_v56 }
 0x130   : > { %4752 = vmatpush1.bf16.msra.mxu1 %v4751_v61  ;;  %v6742_v61 = vshrl.u32 %v607_v57, 7  ;;  %v710_v57 = vld [vmem:[#allocation11 + $0x250] sm:$0xff] }
 0x131   : > { %4754 = vmatprep.subr.bf16.mxu1 %v4753_v62 }
 0x132   : > { %v6745_v63 = vsub.s32 1, %v6742_v61  ;;  %v6748_v3 = vsub.s32 0, %v6742_v61 }
 0x134   : > { %4756 = vmatpush1.bf16.msra.mxu1 %v4755_v7  ;;  %v614_v7 = vrot.slane %v571_v5, %v6745_v63 }
 0x135   : > { %4758 = vmatprep.subr.bf16.mxu1 %v4757_v8  ;;  %v610_v8 = vrot.slane %v571_v5, %v6748_v3 }
 0x138   : > { %4760 = vmatpush1.bf16.msra.mxu1 %v4759_v11  ;;  %v629_v11 = vrot.slane %v572_v6, %v6745_v63 }
 0x139   : > { %4762 = vmatprep.subr.bf16.mxu1 %v4761_v26 }
 0x19a   : > { %v575_v12 = vpop.xlane.xlu0 %574 }
 0x19b   : > { %v580_v13 = vmul.f32 0.00390625, %v575_v12 }
 0x19d   : > { %v6723_v14 = vsub.f32 %v6707_v0, %v580_v13  ;;  %v6726_v15 = vsub.f32 %v6710_v1, %v580_v13  ;;  %v625_v13 = vrot.slane %v572_v6, %v6748_v3  ;;  %v722_v6 = vld [vmem:[#allocation11 + $0x2b0] sm:$0xff] }
 0x19e   : > { %v578_v16 = vpop.xlane.xlu0 %577 }
 0x19f   : > { %v581_v17 = vmul.f32 0.00390625, %v578_v16  ;;  %v586_v18 = vmul.f32 %v6723_v14, %v6723_v14  ;;  %v587_v19 = vmul.f32 %v6726_v15, %v6726_v15  ;;  %v638_v16 = vld [vmem:[#allocation11 + $0x10] sm:$0xff] }
 0x1a1   : > { %v6733_v20 = vsub.f32 %v6713_v2, %v581_v17  ;;  %v6736_v21 = vsub.f32 %v6718_v4, %v581_v17  ;;  %v590_v22 = vadd.f32 %v587_v19, %v586_v18  ;;  %v4763_v2 = vpack.c.bf16 %v774_v28, %v768_v27  ;;  %v781_v4 = vld [vmem:[#allocation11 + $0x488] sm:$0xff]  ;;  %v644_v17 = vld [vmem:[#allocation11 + $0x40] sm:$0xff] }
 0x1a2   : > { %v4765_v30 = vpack.c.bf16 %v787_v29, %v781_v4  ;;  %v656_v28 = vld [vmem:[#allocation11 + $0xa0] sm:$0xff]  ;;  %v663_v29 = vld [vmem:[#allocation11 + $0xd8] sm:$0xff] }
 0x1a3   : > { %591 = vadd.xlane.f32.xlu1 %v590_v22  ;;  %v588_v0 = vmul.f32 %v6733_v20, %v6733_v20  ;;  %v589_v1 = vmul.f32 %v6736_v21, %v6736_v21  ;;  %4764 = vmatpush1.bf16.msra.mxu1 %v4763_v2  ;;  %v651_v22 = vld [vmem:[#allocation11 + $0x78] sm:$0xff] }
 0x1a4   : > { %4766 = vmatprep.subr.bf16.mxu1 %v4765_v30  ;;  %v669_v30 = vld [vmem:[#allocation11 + $0x108] sm:$0xff] }
 0x1a5   : > { %v593_v23 = vadd.f32 %v589_v1, %v588_v0  ;;  %v657_v0 = vld [vmem:[#allocation11 + $0xa8] sm:$0xff] }
 0x1a6   : > { %v4785_v27 = vpack.c.bf16 %v657_v0, %v651_v22  ;;  %v746_v22 = vld [vmem:[#allocation11 + $0x370] sm:$0xff]  ;;  %v752_v0 = vld [vmem:[#allocation11 + $0x3a0] sm:$0xff] }
 0x1a7   : > { %594 = vadd.xlane.f32.xlu1 %v593_v23  ;;  %4768 = vmatpush1.bf16.msra.mxu1 %v4767_v33  ;;  %v4783_v23 = vpack.c.bf16 %v644_v17, %v638_v16  ;;  %v747_v16 = vld [vmem:[#allocation11 + $0x378] sm:$0xff]  ;;  %v753_v17 = vld [vmem:[#allocation11 + $0x3a8] sm:$0xff] }
 0x1a8   : > { %4770 = vmatprep.subr.bf16.mxu1 %v4769_v36  ;;  %v681_v36 = vld [vmem:[#allocation11 + $0x168] sm:$0xff] }
 0x1a9   : > { %v4793_v38 = vpack.c.bf16 %v681_v36, %v675_v35  ;;  %v782_v36 = vld [vmem:[#allocation11 + $0x490] sm:$0xff] }
 0x1ab   : > { %4772 = vmatpush1.bf16.msra.mxu1 %v4771_v39  ;;  %v674_v39 = vld [vmem:[#allocation11 + $0x130] sm:$0xff] }
 0x1ac   : > { %4774 = vmatprep.subr.bf16.mxu1 %v4773_v43  ;;  %v4795_v43 = vpack.c.bf16 %v680_v40, %v674_v39  ;;  %v801_v39 = vld [vmem:[#allocation11 + $0x528] sm:$0xff] }
 0x1af   : > { %4776 = vmatpush1.bf16.msra.mxu1 %v4775_v47  ;;  %v699_v47 = vld [vmem:[#allocation11 + $0x1f8] sm:$0xff] }
 0x1b0   : > { %4778 = vmatprep.subr.bf16.mxu1 %v4777_v48  ;;  %v705_v48 = vld [vmem:[#allocation11 + $0x228] sm:$0xff] }
 0x1b1   : > { %v4801_v50 = vpack.c.bf16 %v705_v48, %v699_v47  ;;  %v806_v48 = vld [vmem:[#allocation11 + $0x550] sm:$0xff] }
 0x1b3   : > { %4780 = vmatpush1.bf16.msra.mxu1 %v4779_v51  ;;  %v698_v51 = vld [vmem:[#allocation11 + $0x1f0] sm:$0xff] }
 0x1b4   : > { %4782 = vmatprep.subr.bf16.mxu1 %v4781_v54  ;;  %v717_v54 = vld [vmem:[#allocation11 + $0x288] sm:$0xff] }
 0x230   : > { %v592_v55 = vpop.xlane.xlu1 %591 }
 0x231   : > { %v596_v56 = vmul.f32 0.00390625, %v592_v55  ;;  %v4803_v55 = vpack.c.bf16 %v704_v52, %v698_v51  ;;  %v825_v51 = vld [vmem:[#allocation11 + $0x5e8] sm:$0xff] }
 0x233   : > { %v598_v58 = vadd.f32 1e-05, %v596_v56  ;;  %v4805_v56 = vpack.c.bf16 %v717_v54, %v711_v53  ;;  %v818_v54 = vld [vmem:[#allocation11 + $0x5b0] sm:$0xff] }
 0x234   : > { %v595_v59 = vpop.xlane.xlu1 %594 }
 0x235   : > { %5809 = vrsqrt.f32 %v598_v58  ;;  %v597_v60 = vmul.f32 0.00390625, %v595_v59  ;;  %v716_v58 = vld [vmem:[#allocation11 + $0x280] sm:$0xff]  ;;  %v723_v59 = vld [vmem:[#allocation11 + $0x2b8] sm:$0xff] }
 0x237   : > { %v599_v62 = vadd.f32 1e-05, %v597_v60  ;;  %v729_v60 = vld [vmem:[#allocation11 + $0x2e8] sm:$0xff] }
 0x238   : > { %v4809_v5 = vpack.c.bf16 %v729_v60, %v723_v59  ;;  %v640_v60 = vld [vmem:[#allocation11 + $0x20] sm:$0xff] }
 0x239   : > { %5811 = vrsqrt.f32 %v599_v62  ;;  %v4807_v62 = vpack.c.bf16 %v716_v58, %v710_v57  ;;  %v647_v57 = vld [vmem:[#allocation11 + $0x58] sm:$0xff] }
 0x23f   : > { %v5810_v9 = vpop.eup %5809 }
 0x240   : > { %v603_v10 = vmul.f32 %v5810_v9, %v6726_v15  ;;  %v602_v12 = vmul.f32 %v5810_v9, %v6723_v14  ;;  %v650_v14 = vld [vmem:[#allocation11 + $0x70] sm:$0xff]  ;;  %v741_v9 = vld [vmem:[#allocation11 + $0x348] sm:$0xff] }
 0x241   : > { %v4787_v33 = vpack.c.bf16 %v656_v28, %v650_v14  ;;  %v764_v14 = vld [vmem:[#allocation11 + $0x400] sm:$0xff]  ;;  %v771_v28 = vld [vmem:[#allocation11 + $0x438] sm:$0xff] }
 0x242   : > { %v618_v18 = vmul.f32 %v614_v7, %v603_v10  ;;  %v617_v19 = vmul.f32 %v610_v8, %v602_v12  ;;  %v734_v12 = vld [vmem:[#allocation11 + $0x310] sm:$0xff] }
 0x243   : > { %v5812_v1 = vpop.eup %5811 }
 0x244   : > { %v6756_v24 = vadd.f32 %v629_v11, %v618_v18  ;;  %v6758_v25 = vadd.f32 %v625_v13, %v617_v19  ;;  %v605_v15 = vmul.f32 %v5812_v1, %v6736_v21  ;;  %v604_v26 = vmul.f32 %v5812_v1, %v6733_v20  ;;  %v662_v20 = vld [vmem:[#allocation11 + $0xd0] sm:$0xff]  ;;  %v759_v1 = vld [vmem:[#allocation11 + $0x3d8] sm:$0xff] }
 0x245   : > { %v4789_v21 = vpack.c.bf16 %v669_v30, %v663_v29  ;;  %v4791_v37 = vpack.c.bf16 %v668_v34, %v662_v20  ;;  %v4817_v19 = vpack.c.bf16 %v753_v17, %v747_v16  ;;  %v770_v30 = vld [vmem:[#allocation11 + $0x430] sm:$0xff]  ;;  %v789_v20 = vld [vmem:[#allocation11 + $0x4c8] sm:$0xff]  ;;  %v664_v17 = vld [vmem:[#allocation11 + $0xe0] sm:$0xff] }
 0x246   : > { %924 = vmatprep.mubr.f32.mxu1 %v6756_v24  ;;  %v620_v2 = vmul.f32 %v614_v7, %v605_v15  ;;  %v619_v4 = vmul.f32 %v610_v8, %v604_v26  ;;  %v728_v7 = vld [vmem:[#allocation11 + $0x2e0] sm:$0xff]  ;;  %v735_v8 = vld [vmem:[#allocation11 + $0x318] sm:$0xff]  ;;  %v4819_v15 = vpack.c.bf16 %v752_v0, %v746_v22 }
 0x247   : > { %925 = vmatmul.mubr.f32.vlgmr.msra.gmra.mrb[0].mxu1 %v6758_v25  ;;  %v4811_v10 = vpack.c.bf16 %v728_v7, %v722_v6  ;;  %v659_v6 = vld [vmem:[#allocation11 + $0xb8] sm:$0xff] }
 0x248   : > { %4784 = vmatpush1.bf16.msra.mxu1 %v4783_v23  ;;  %v6764_v31 = vadd.f32 %v629_v11, %v620_v2  ;;  %v6766_v32 = vadd.f32 %v625_v13, %v619_v4  ;;  %v4813_v11 = vpack.c.bf16 %v741_v9, %v735_v8  ;;  %v740_v13 = vld [vmem:[#allocation11 + $0x340] sm:$0xff]  ;;  %v765_v23 = vld [vmem:[#allocation11 + $0x408] sm:$0xff]  ;;  %v683_v22 = vld [vmem:[#allocation11 + $0x178] sm:$0xff] }
 0x249   : > { %4786 = vmatprep.subr.bf16.mxu1 %v4785_v27  ;;  %v4815_v18 = vpack.c.bf16 %v740_v13, %v734_v12  ;;  %v4821_v26 = vpack.c.bf16 %v765_v23, %v759_v1  ;;  %v758_v27 = vld [vmem:[#allocation11 + $0x3d0] sm:$0xff]  ;;  %v777_v2 = vld [vmem:[#allocation11 + $0x468] sm:$0xff]  ;;  %v652_v9 = vld [vmem:[#allocation11 + $0x80] sm:$0xff] }
 0x24a   : > { %930 = vmatprep.mubr.f32.mxu1 %v6764_v31  ;;  %v4823_v4 = vpack.c.bf16 %v764_v14, %v758_v27  ;;  %v4825_v29 = vpack.c.bf16 %v777_v2, %v771_v28  ;;  %v671_v12 = vld [vmem:[#allocation11 + $0x118] sm:$0xff]  ;;  %v676_v23 = vld [vmem:[#allocation11 + $0x140] sm:$0xff] }
 0x24b   : > { %931 = vmatmul.mubr.f32.gmra.mrb[2].mxu1 %v6766_v32  ;;  %v695_v27 = vld [vmem:[#allocation11 + $0x1d8] sm:$0xff]  ;;  %v688_v2 = vld [vmem:[#allocation11 + $0x1a0] sm:$0xff] }
 0x24c   : > { %4788 = vmatpush1.bf16.msra.mxu1 %v4787_v33  ;;  %1001 = vmatprep.mubr.f32.mxu1 %v6756_v24  ;;  %v776_v33 = vld [vmem:[#allocation11 + $0x460] sm:$0xff] }
 0x24d   : > { %4790 = vmatprep.subr.bf16.mxu1 %v4789_v21  ;;  %v783_v21 = vld [vmem:[#allocation11 + $0x498] sm:$0xff]  ;;  %v4827_v34 = vpack.c.bf16 %v776_v33, %v770_v30 }
 0x24e   : > { %v4829_v35 = vpack.c.bf16 %v789_v20, %v783_v21  ;;  %v707_v30 = vld [vmem:[#allocation11 + $0x238] sm:$0xff]  ;;  %v706_v20 = vld [vmem:[#allocation11 + $0x230] sm:$0xff] }
 0x250   : > { %4792 = vmatpush1.bf16.msra.mxu1 %v4791_v37  ;;  %v788_v37 = vld [vmem:[#allocation11 + $0x4c0] sm:$0xff] }
 0x251   : > { %4794 = vmatprep.subr.bf16.mxu1 %v4793_v38  ;;  %v795_v38 = vld [vmem:[#allocation11 + $0x4f8] sm:$0xff]  ;;  %v4831_v40 = vpack.c.bf16 %v788_v37, %v782_v36 }
 0x252   : > { %v4833_v41 = vpack.c.bf16 %v801_v39, %v795_v38  ;;  %v712_v38 = vld [vmem:[#allocation11 + $0x260] sm:$0xff]  ;;  %v718_v39 = vld [vmem:[#allocation11 + $0x290] sm:$0xff] }
 0x254   : > { %4796 = vmatpush1.bf16.msra.mxu1 %v4795_v43  ;;  %v800_v43 = vld [vmem:[#allocation11 + $0x520] sm:$0xff] }
 0x255   : > { %4798 = vmatprep.subr.bf16.mxu1 %v4797_v44  ;;  %v807_v44 = vld [vmem:[#allocation11 + $0x558] sm:$0xff]  ;;  %v4835_v46 = vpack.c.bf16 %v800_v43, %v794_v42  ;;  %v4871_v42 = vpack.c.bf16 %v718_v39, %v712_v38 }
 0x256   : > { %v4837_v47 = vpack.c.bf16 %v813_v45, %v807_v44  ;;  %v724_v44 = vld [vmem:[#allocation11 + $0x2c0] sm:$0xff]  ;;  %v730_v45 = vld [vmem:[#allocation11 + $0x2f0] sm:$0xff] }
 0x258   : > { %4800 = vmatpush1.bf16.msra.mxu1 %v4799_v49  ;;  %v812_v49 = vld [vmem:[#allocation11 + $0x580] sm:$0xff] }
 0x259   : > { %4802 = vmatprep.subr.bf16.mxu1 %v4801_v50  ;;  %v819_v50 = vld [vmem:[#allocation11 + $0x5b8] sm:$0xff]  ;;  %v4839_v52 = vpack.c.bf16 %v812_v49, %v806_v48  ;;  %v4875_v48 = vpack.c.bf16 %v730_v45, %v724_v44 }
 0x25a   : > { %v4841_v53 = vpack.c.bf16 %v825_v51, %v819_v50  ;;  %v736_v50 = vld [vmem:[#allocation11 + $0x320] sm:$0xff]  ;;  %v742_v51 = vld [vmem:[#allocation11 + $0x350] sm:$0xff] }
 0x25c   : > { %4804 = vmatpush1.bf16.msra.mxu1 %v4803_v55  ;;  %v824_v55 = vld [vmem:[#allocation11 + $0x5e0] sm:$0xff] }
 0x25d   : > { %4806 = vmatprep.subr.bf16.mxu1 %v4805_v56  ;;  %v641_v56 = vld [vmem:[#allocation11 + $0x28] sm:$0xff]  ;;  %v4843_v58 = vpack.c.bf16 %v824_v55, %v818_v54  ;;  %v4879_v54 = vpack.c.bf16 %v742_v51, %v736_v50 }
 0x25e   : > { %v4845_v59 = vpack.c.bf16 %v647_v57, %v641_v56  ;;  %v748_v56 = vld [vmem:[#allocation11 + $0x380] sm:$0xff]  ;;  %v754_v57 = vld [vmem:[#allocation11 + $0x3b0] sm:$0xff] }
 0x260   : > { %4808 = vmatpush1.bf16.msra.mxu1 %v4807_v62  ;;  %v646_v62 = vld [vmem:[#allocation11 + $0x50] sm:$0xff] }
 0x261   : > { %4810 = vmatprep.subr.bf16.mxu1 %v4809_v5  ;;  %v653_v5 = vld [vmem:[#allocation11 + $0x88] sm:$0xff]  ;;  %v4847_v7 = vpack.c.bf16 %v646_v62, %v640_v60  ;;  %v4883_v60 = vpack.c.bf16 %v754_v57, %v748_v56 }
 0x262   : > { %v4849_v8 = vpack.c.bf16 %v659_v6, %v653_v5  ;;  %v760_v5 = vld [vmem:[#allocation11 + $0x3e0] sm:$0xff]  ;;  %v766_v6 = vld [vmem:[#allocation11 + $0x410] sm:$0xff] }
 0x264   : > { %4812 = vmatpush1.bf16.msra.mxu1 %v4811_v10  ;;  %v658_v10 = vld [vmem:[#allocation11 + $0xb0] sm:$0xff] }
 0x265   : > { %4814 = vmatprep.subr.bf16.mxu1 %v4813_v11  ;;  %v665_v11 = vld [vmem:[#allocation11 + $0xe8] sm:$0xff]  ;;  %v4851_v13 = vpack.c.bf16 %v658_v10, %v652_v9  ;;  %v4887_v9 = vpack.c.bf16 %v766_v6, %v760_v5 }
 0x266   : > { %v4853_v16 = vpack.c.bf16 %v671_v12, %v665_v11  ;;  %v772_v11 = vld [vmem:[#allocation11 + $0x440] sm:$0xff]  ;;  %v778_v12 = vld [vmem:[#allocation11 + $0x470] sm:$0xff] }
 0x268   : > { %4816 = vmatpush1.bf16.msra.mxu1 %v4815_v18  ;;  %v670_v18 = vld [vmem:[#allocation11 + $0x110] sm:$0xff] }
 0x269   : > { %4818 = vmatprep.subr.bf16.mxu1 %v4817_v19  ;;  %v677_v19 = vld [vmem:[#allocation11 + $0x148] sm:$0xff]  ;;  %v4855_v0 = vpack.c.bf16 %v670_v18, %v664_v17  ;;  %v4891_v17 = vpack.c.bf16 %v778_v12, %v772_v11  ;;  %v852_v11 = vsub.s32 5, %v6742_v61 }
 0x26a   : > { %v4857_v1 = vpack.c.bf16 %v683_v22, %v677_v19  ;;  %v784_v19 = vld [vmem:[#allocation11 + $0x4a0] sm:$0xff]  ;;  %v790_v22 = vld [vmem:[#allocation11 + $0x4d0] sm:$0xff] }
 0x26c   : > { %4820 = vmatpush1.bf16.msra.mxu1 %v4819_v15  ;;  %v682_v15 = vld [vmem:[#allocation11 + $0x170] sm:$0xff] }
 0x26d   : > { %4822 = vmatprep.subr.bf16.mxu1 %v4821_v26  ;;  %v689_v26 = vld [vmem:[#allocation11 + $0x1a8] sm:$0xff]  ;;  %v4859_v14 = vpack.c.bf16 %v682_v15, %v676_v23  ;;  %v4895_v23 = vpack.c.bf16 %v790_v22, %v784_v19 }
 0x26e   : > { %v4861_v28 = vpack.c.bf16 %v695_v27, %v689_v26  ;;  %v796_v26 = vld [vmem:[#allocation11 + $0x500] sm:$0xff]  ;;  %v802_v27 = vld [vmem:[#allocation11 + $0x530] sm:$0xff] }
 0x270   : > { %4824 = vmatpush1.bf16.msra.mxu1 %v4823_v4  ;;  %v694_v4 = vld [vmem:[#allocation11 + $0x1d0] sm:$0xff] }
 0x271   : > { %4826 = vmatprep.subr.bf16.mxu1 %v4825_v29  ;;  %v701_v29 = vld [vmem:[#allocation11 + $0x208] sm:$0xff]  ;;  %v4863_v33 = vpack.c.bf16 %v694_v4, %v688_v2  ;;  %v4899_v2 = vpack.c.bf16 %v802_v27, %v796_v26 }
 0x272   : > { %v4865_v21 = vpack.c.bf16 %v707_v30, %v701_v29  ;;  %v808_v29 = vld [vmem:[#allocation11 + $0x560] sm:$0xff]  ;;  %v814_v30 = vld [vmem:[#allocation11 + $0x590] sm:$0xff] }
 0x274   : > { %4828 = vmatpush1.bf16.msra.mxu1 %v4827_v34  ;;  %v713_v34 = vld [vmem:[#allocation11 + $0x268] sm:$0xff] }
 0x275   : > { %4830 = vmatprep.subr.bf16.mxu1 %v4829_v35  ;;  %v719_v35 = vld [vmem:[#allocation11 + $0x298] sm:$0xff] }
 0x276   : > { %v4869_v37 = vpack.c.bf16 %v719_v35, %v713_v34  ;;  %v820_v34 = vld [vmem:[#allocation11 + $0x5c0] sm:$0xff]  ;;  %v826_v35 = vld [vmem:[#allocation11 + $0x5f0] sm:$0xff] }
 0x278   : > { %4832 = vmatpush1.bf16.msra.mxu1 %v4831_v40  ;;  %v725_v40 = vld [vmem:[#allocation11 + $0x2c8] sm:$0xff] }
 0x279   : > { %4834 = vmatprep.subr.bf16.mxu1 %v4833_v41  ;;  %v731_v41 = vld [vmem:[#allocation11 + $0x2f8] sm:$0xff] }
 0x27a   : > { %v4873_v43 = vpack.c.bf16 %v731_v41, %v725_v40 }
 0x27c   : > { %4836 = vmatpush1.bf16.msra.mxu1 %v4835_v46  ;;  %v737_v46 = vld [vmem:[#allocation11 + $0x328] sm:$0xff] }
 0x27d   : > { %4838 = vmatprep.subr.bf16.mxu1 %v4837_v47  ;;  %v743_v47 = vld [vmem:[#allocation11 + $0x358] sm:$0xff] }
 0x27e   : > { %v4877_v49 = vpack.c.bf16 %v743_v47, %v737_v46  ;;  %v840_v47 = vsub.s32 2, %v6742_v61 }
 0x280   : > { %4840 = vmatpush1.bf16.msra.mxu1 %v4839_v52  ;;  %v749_v52 = vld [vmem:[#allocation11 + $0x388] sm:$0xff] }
 0x281   : > { %4842 = vmatprep.subr.bf16.mxu1 %v4841_v53  ;;  %v755_v53 = vld [vmem:[#allocation11 + $0x3b8] sm:$0xff] }
 0x282   : > { %v4881_v55 = vpack.c.bf16 %v755_v53, %v749_v52 }
 0x284   : > { %4844 = vmatpush1.bf16.msra.mxu1 %v4843_v58  ;;  %v761_v58 = vld [vmem:[#allocation11 + $0x3e8] sm:$0xff] }
 0x285   : > { %4846 = vmatprep.subr.bf16.mxu1 %v4845_v59  ;;  %v767_v59 = vld [vmem:[#allocation11 + $0x418] sm:$0xff] }
 0x286   : > { %v4885_v62 = vpack.c.bf16 %v767_v59, %v761_v58 }
 0x287   : > { %1002 = vmatmul.mubr.f32.vlgmr.msra.gmra.mrb[4].mxu1 %v6758_v25 }
 0x288   : > { %1007 = vmatprep.mubr.f32.mxu1 %v6764_v31  ;;  %4848 = vmatpush1.bf16.msra.mxu1 %v4847_v7  ;;  %v773_v7 = vld [vmem:[#allocation11 + $0x448] sm:$0xff] }
 0x289   : > { %4850 = vmatprep.subr.bf16.mxu1 %v4849_v8  ;;  %v779_v8 = vld [vmem:[#allocation11 + $0x478] sm:$0xff] }
 0x28a   : > { %v4889_v10 = vpack.c.bf16 %v779_v8, %v773_v7 }
 0x28b   : > { %1008 = vmatmul.mubr.f32.gmra.mrb[6].mxu1 %v6766_v32 }
 0x28c   : > { %4852 = vmatpush1.bf16.msra.mxu1 %v4851_v13  ;;  %1078 = vmatprep.mubr.f32.mxu1 %v6756_v24  ;;  %v700_v24 = vld [vmem:[#allocation11 + $0x200] sm:$0xff]  ;;  %v785_v13 = vld [vmem:[#allocation11 + $0x4a8] sm:$0xff] }
 0x28d   : > { %4854 = vmatprep.subr.bf16.mxu1 %v4853_v16  ;;  %v4867_v36 = vpack.c.bf16 %v706_v20, %v700_v24  ;;  %v791_v16 = vld [vmem:[#allocation11 + $0x4d8] sm:$0xff]  ;;  %v4903_v24 = vpack.c.bf16 %v814_v30, %v808_v29 }
 0x28e   : > { %v4893_v18 = vpack.c.bf16 %v791_v16, %v785_v13 }
 0x290   : > { %4856 = vmatpush1.bf16.msra.mxu1 %v4855_v0  ;;  %v797_v0 = vld [vmem:[#allocation11 + $0x508] sm:$0xff] }
 0x291   : > { %4858 = vmatprep.subr.bf16.mxu1 %v4857_v1  ;;  %v803_v1 = vld [vmem:[#allocation11 + $0x538] sm:$0xff] }
 0x292   : > { %v4897_v15 = vpack.c.bf16 %v803_v1, %v797_v0 }
 0x294   : > { %4860 = vmatpush1.bf16.msra.mxu1 %v4859_v14  ;;  %v809_v14 = vld [vmem:[#allocation11 + $0x568] sm:$0xff] }
 0x295   : > { %4862 = vmatprep.subr.bf16.mxu1 %v4861_v28  ;;  %v815_v28 = vld [vmem:[#allocation11 + $0x598] sm:$0xff] }
 0x296   : > { %v4901_v4 = vpack.c.bf16 %v815_v28, %v809_v14 }
 0x298   : > { %4864 = vmatpush1.bf16.msra.mxu1 %v4863_v33  ;;  %v821_v33 = vld [vmem:[#allocation11 + $0x5c8] sm:$0xff] }
 0x299   : > { %4866 = vmatprep.subr.bf16.mxu1 %v4865_v21  ;;  %v827_v21 = vld [vmem:[#allocation11 + $0x5f8] sm:$0xff] }
 0x29a   : > { %v4905_v20 = vpack.c.bf16 %v827_v21, %v821_v33 }
 0x29c   : > { %4868 = vmatpush1.bf16.msra.mxu1 %v4867_v36  ;;  %v4907_v36 = vpack.c.bf16 %v826_v35, %v820_v34 }
 0x29d   : > { %4870 = vmatprep.subr.bf16.mxu1 %v4869_v37  ;;  %v6781_v37 = vld [vmem:[%s7337_s6] sm:$0x3f] }
 0x29e   : > { %v833_v38 = vrot.slane %v6781_v37, %v6748_v3  ;;  %v837_v39 = vrot.slane %v6781_v37, %v6745_v63  ;;  %v841_v50 = vrot.slane %v6781_v37, %v840_v47 }
 0x2a0   : > { %4872 = vmatpush1.bf16.msra.mxu1 %v4871_v42 }
 0x2a1   : > { %4874 = vmatprep.subr.bf16.mxu1 %v4873_v43 }
 0x2a4   : > { %4876 = vmatpush1.bf16.msra.mxu1 %v4875_v48  ;;  %v844_v48 = vsub.s32 3, %v6742_v61 }
 0x2a5   : > { %4878 = vmatprep.subr.bf16.mxu1 %v4877_v49 }
 0x2a6   : > { %v845_v52 = vrot.slane %v6781_v37, %v844_v48 }
 0x2a8   : > { %4880 = vmatpush1.bf16.msra.mxu1 %v4879_v54 }
 0x2a9   : > { %4882 = vmatprep.subr.bf16.mxu1 %v4881_v55 }
 0x2ac   : > { %4884 = vmatpush1.bf16.msra.mxu1 %v4883_v60 }
 0x2ad   : > { %4886 = vmatprep.subr.bf16.mxu1 %v4885_v62 }
 0x2b0   : > { %4888 = vmatpush1.bf16.msra.mxu1 %v4887_v9 }
 0x2b1   : > { %4890 = vmatprep.subr.bf16.mxu1 %v4889_v10  ;;  %v848_v10 = vsub.s32 4, %v6742_v61 }
 0x2b3   : > { %v849_v13 = vrot.slane %v6781_v37, %v848_v10 }
 0x2b4   : > { %4892 = vmatpush1.bf16.msra.mxu1 %v4891_v17  ;;  %v853_v17 = vrot.slane %v6781_v37, %v852_v11 }
 0x2b5   : > { %4894 = vmatprep.subr.bf16.mxu1 %v4893_v18 }
 0x2b8   : > { %4896 = vmatpush1.bf16.msra.mxu1 %v4895_v23 }
 0x2b9   : > { %4898 = vmatprep.subr.bf16.mxu1 %v4897_v15 }
 0x2bc   : > { %4900 = vmatpush1.bf16.msra.mxu1 %v4899_v2 }
 0x2bd   : > { %4902 = vmatprep.subr.bf16.mxu1 %v4901_v4 }
 0x2c0   : > { %4904 = vmatpush1.bf16.msra.mxu1 %v4903_v24 }
 0x2c1   : > { %4906 = vmatprep.subr.bf16.mxu1 %v4905_v20 }
 0x2c4   : > { %4908 = vmatpush1.bf16.msra.mxu1 %v4907_v36 }
 0x2c7   : > { %1079 = vmatmul.mubr.f32.vlgmr.msra.gmra.mrb[8].mxu1 %v6758_v25 }
 0x2c8   : > { %1084 = vmatprep.mubr.f32.mxu1 %v6764_v31 }
 0x2cb   : > { %1085 = vmatmul.mubr.f32.gmra.mrb[10].mxu1 %v6766_v32 }
 0x31a   : > { %v926_v40 = vpop.f32.mrb[0].mxu1 }
 0x31b   : > { %v927_v41 = vadd.f32 %v926_v40, %v833_v38  ;;  %v928_v42 = vpop.f32.mrb[1].mxu1 }
 0x31c   : > { %v929_v43 = vadd.f32 %v928_v42, %v837_v39 }
 0x31d   : > { %v1091_v25 = vmul.f32 0.17677669, %v927_v41 }
 0x31e   : > { %v1092_v31 = vmul.f32 0.17677669, %v929_v43  ;;  %v932_v44 = vpop.f32.mrb[2].mxu1 }
 0x31f   : > { %v933_v32 = vadd.f32 %v932_v44, %v833_v38  ;;  %4609 = vmatprep.mubr.msk.f32.mxu0 %vm1191_vm0, %v1091_v25  ;;  %1097 = vrot.lane.b32.xlu1 %v1091_v25, %s6302_s3  ;;  %v934_v45 = vpop.f32.mrb[3].mxu1 }
 0x320   : > { %v935_v46 = vadd.f32 %v934_v45, %v837_v39  ;;  %4637 = vmatprep.mubr.msk.f32.mxu1 %vm1191_vm0, %v1092_v31 }
 0x321   : > { %v1093_v7 = vmul.f32 0.17677669, %v933_v32 }
 0x322   : > { %v1094_v8 = vmul.f32 0.17677669, %v935_v46 }
 0x35a   : > { %v1003_v49 = vpop.f32.mrb[4].mxu1 }
 0x35b   : > { %v1005_v51 = vpop.f32.mrb[5].mxu1  ;;  %v1004_v54 = vadd.f32 %v1003_v49, %v841_v50 }
 0x35c   : > { %v1006_v57 = vadd.f32 %v1005_v51, %v845_v52 }
 0x35e   : > { %v1009_v53 = vpop.f32.mrb[6].mxu1 }
 0x35f   : > { %v1010_v55 = vadd.f32 %v1009_v53, %v841_v50  ;;  %v1011_v56 = vpop.f32.mrb[7].mxu1 }
 0x360   : > { %v1012_v58 = vadd.f32 %v1011_v56, %v845_v52 }
 0x361   : > { %v5724_v59 = vpack.i.bf16 %v1010_v55, %v1004_v54  ;;  %v4909_v60 = vpack.c.bf16 %v1010_v55, %v1004_v54 }
 0x362   : > { %v4933_v5 = vpack.c.bf16 %v1012_v58, %v1006_v57  ;;  %v5734_v6 = vpack.i.bf16 %v1012_v58, %v1006_v57 }
 0x363   : > { %5725 = vrot.lane.b32.xlu1 %v5724_v59, %s6303_s30  ;;  %5720 = vrot.lane.b32.xlu0 %v5724_v59, %s6302_s3 }
 0x364   : > { %4911 = vmatprep.subr.msk.bf16.mxu0 %vm6800_vm1, %v4909_v60  ;;  %4935 = vmatprep.subr.msk.bf16.mxu1 %vm6800_vm1, %v4933_v5 }
 0x365   : > { %4914 = vmatpush3.bf16.xpose.msk.msra.mxu0 %vm6800_vm1, %v4909_v60  ;;  %4938 = vmatpush3.bf16.xpose.msk.msra.mxu1 %vm6800_vm1, %v4933_v5 }
 0x367   : > { %5730 = vrot.lane.b32.xlu1 %v5724_v59, %s6304_s12  ;;  %1099 = vrot.lane.b32.xlu0 %v1093_v7, %s6302_s3 }
 0x36b   : > { %5735 = vrot.lane.b32.xlu1 %v5734_v6, %s6302_s3  ;;  %1111 = vrot.lane.b32.xlu0 %v1092_v31, %s6302_s3 }
 0x36c   : > { %4610 = vmatmul.mubr.msk.f32.vlgmr.msra.gmra.mrb[0].mxu0 %vm1191_vm0, %v1093_v7  ;;  %4638 = vmatmul.mubr.msk.f32.vlgmr.msra.gmra.mrb[12].mxu1 %vm1191_vm0, %v1094_v8 }
 0x36f   : > { %1101 = vrot.lane.b32.xlu1 %v1091_v25, %s6303_s30  ;;  %5740 = vrot.lane.b32.xlu0 %v5734_v6, %s6303_s30 }
 0x373   : > { %1103 = vrot.lane.b32.xlu1 %v1093_v7, %s6303_s30  ;;  %1113 = vrot.lane.b32.xlu0 %v1094_v8, %s6302_s3 }
 0x377   : > { %1107 = vrot.lane.b32.xlu1 %v1093_v7, %s6304_s12  ;;  %1105 = vrot.lane.b32.xlu0 %v1091_v25, %s6304_s12 }
 0x37b   : > { %5745 = vrot.lane.b32.xlu1 %v5734_v6, %s6304_s12  ;;  %1115 = vrot.lane.b32.xlu0 %v1092_v31, %s6303_s30 }
 0x37f   : > { %1117 = vrot.lane.b32.xlu1 %v1094_v8, %s6303_s30  ;;  %1119 = vrot.lane.b32.xlu0 %v1092_v31, %s6304_s12 }
 0x383   : > { %1121 = vrot.lane.b32.xlu1 %v1094_v8, %s6304_s12 }
 0x391   : > { %v1098_v9 = vpop.permute.xlu1 %1097 }
 0x392   : > { %4616 = vmatprep.mubr.msk.f32.mxu0 %vm1191_vm0, %v1098_v9 }
 0x39a   : > { %v1080_v12 = vpop.f32.mrb[8].mxu1 }
 0x39b   : > { %v1082_v16 = vpop.f32.mrb[9].mxu1  ;;  %v1081_v19 = vadd.f32 %v1080_v12, %v849_v13 }
 0x39c   : > { %v1083_v1 = vadd.f32 %v1082_v16, %v853_v17 }
 0x39e   : > { %v1086_v18 = vpop.f32.mrb[10].mxu1 }
 0x39f   : > { %v1087_v22 = vadd.f32 %v1086_v18, %v849_v13  ;;  %v1088_v0 = vpop.f32.mrb[11].mxu1 }
 0x3a0   : > { %v1089_v23 = vadd.f32 %v1088_v0, %v853_v17 }
 0x3a1   : > { %v5754_v15 = vpack.i.bf16 %v1087_v22, %v1081_v19  ;;  %v6840_v26 = vpack.c.bf16 %v1087_v22, %v1081_v19 }
 0x3a2   : > { %v6842_v27 = vpack.i.bf16 %v1089_v23, %v1083_v1  ;;  %v6844_v14 = vpack.c.bf16 %v1089_v23, %v1083_v1 }
 0x3a3   : > { %5755 = vrot.lane.b32.xlu1 %v5754_v15, %s6303_s30  ;;  %5750 = vrot.lane.b32.xlu0 %v5754_v15, %s6302_s3 }
 0x3a7   : > { %5760 = vrot.lane.b32.xlu1 %v5754_v15, %s6304_s12 }
 0x3ab   : > { %5765 = vrot.lane.b32.xlu1 %v6842_v27, %s6302_s3 }
 0x3d5   : > { %v5721_v28 = vpop.permute.xlu0 %5720  ;;  %v5726_v2 = vpop.permute.xlu1 %5725 }
 0x3d6   : > { %v5723_v4 = vunpack.i.h.bf16 %v5721_v28  ;;  %v5722_v29 = vunpack.i.l.bf16 %v5721_v28  ;;  %v5728_v30 = vunpack.i.h.bf16 %v5726_v2  ;;  %v5727_v33 = vunpack.i.l.bf16 %v5726_v2 }
 0x3d8   : > { %v4915_v21 = vpack.c.bf16 %v5723_v4, %v5722_v29  ;;  %v4921_v34 = vpack.c.bf16 %v5728_v30, %v5727_v33 }
 0x3d9   : > { %v1100_v24 = vpop.permute.xlu0 %1099  ;;  %v5731_v20 = vpop.permute.xlu1 %5730 }
 0x3da   : > { %4917 = vmatprep.subr.msk.bf16.mxu0 %vm6800_vm1, %v4915_v21  ;;  %v5733_v37 = vunpack.i.h.bf16 %v5731_v20  ;;  %v5732_v38 = vunpack.i.l.bf16 %v5731_v20 }
 0x3db   : > { %4920 = vmatpush3.bf16.xpose.msk.msra.mxu0 %vm6800_vm1, %v4915_v21 }
 0x3dc   : > { %4923 = vmatprep.subr.msk.bf16.mxu0 %vm6800_vm1, %v4921_v34  ;;  %v4927_v25 = vpack.c.bf16 %v5733_v37, %v5732_v38 }
 0x3dd   : > { %v1112_v35 = vpop.permute.xlu0 %1111  ;;  %v5736_v36 = vpop.permute.xlu1 %5735 }
 0x3de   : > { %v5738_v39 = vunpack.i.h.bf16 %v5736_v36  ;;  %v5737_v40 = vunpack.i.l.bf16 %v5736_v36  ;;  %4644 = vmatprep.mubr.msk.f32.mxu1 %vm1191_vm0, %v1112_v35 }
 0x3e0   : > { %v4939_v41 = vpack.c.bf16 %v5738_v39, %v5737_v40 }
 0x3e1   : > { %v5741_v42 = vpop.permute.xlu0 %5740  ;;  %v1102_v43 = vpop.permute.xlu1 %1101 }
 0x3e2   : > { %v5743_v31 = vunpack.i.h.bf16 %v5741_v42  ;;  %v5742_v44 = vunpack.i.l.bf16 %v5741_v42  ;;  %4617 = vmatmul.mubr.msk.f32.vlgmr.msra.gmra.mrb[2].mxu0 %vm1191_vm0, %v1100_v24  ;;  %4941 = vmatprep.subr.msk.bf16.mxu1 %vm6800_vm1, %v4939_v41 }
 0x3e3   : > { %4926 = vmatpush3.bf16.xpose.msk.msra.mxu0 %vm6800_vm1, %v4921_v34  ;;  %4623 = vmatprep.mubr.msk.f32.mxu0 %vm1191_vm0, %v1102_v43 }
 0x3e4   : > { %v4945_v32 = vpack.c.bf16 %v5743_v31, %v5742_v44  ;;  %4944 = vmatpush3.bf16.xpose.msk.msra.mxu1 %vm6800_vm1, %v4939_v41  ;;  %4929 = vmatprep.subr.msk.bf16.mxu0 %vm6800_vm1, %v4927_v25 }
 0x3e5   : > { %v1114_v45 = vpop.permute.xlu0 %1113  ;;  %v1104_v46 = vpop.permute.xlu1 %1103 }
 0x3e6   : > { %4947 = vmatprep.subr.msk.bf16.mxu1 %vm6800_vm1, %v4945_v32 }
 0x3e9   : > { %v1106_v49 = vpop.permute.xlu0 %1105  ;;  %v1108_v50 = vpop.permute.xlu1 %1107 }
 0x3ea   : > { %4624 = vmatmul.mubr.msk.f32.vlgmr.msra.gmra.mrb[4].mxu0 %vm1191_vm0, %v1104_v46 }
 0x3eb   : > { %4645 = vmatmul.mubr.msk.f32.vlgmr.msra.gmra.mrb[14].mxu1 %vm1191_vm0, %v1114_v45  ;;  %4932 = vmatpush3.bf16.xpose.msk.msra.mxu0 %vm6800_vm1, %v4927_v25 }
 0x3ec   : > { %4630 = vmatprep.mubr.msk.f32.mxu0 %vm1191_vm0, %v1106_v49  ;;  %4950 = vmatpush3.bf16.xpose.msk.msra.mxu1 %vm6800_vm1, %v4945_v32 }
 0x3ed   : > { %v1116_v51 = vpop.permute.xlu0 %1115  ;;  %v5746_v52 = vpop.permute.xlu1 %5745 }
 0x3ee   : > { %v5748_v53 = vunpack.i.h.bf16 %v5746_v52  ;;  %v5747_v54 = vunpack.i.l.bf16 %v5746_v52  ;;  %4651 = vmatprep.mubr.msk.f32.mxu1 %vm1191_vm0, %v1116_v51 }
 0x3f0   : > { %v4951_v55 = vpack.c.bf16 %v5748_v53, %v5747_v54 }
 0x3f1   : > { %v1120_v56 = vpop.permute.xlu0 %1119  ;;  %v1118_v57 = vpop.permute.xlu1 %1117 }
 0x3f2   : > { %4631 = vmatmul.mubr.msk.f32.vlgmr.msra.gmra.mrb[6].mxu0 %vm1191_vm0, %v1108_v50  ;;  %4953 = vmatprep.subr.msk.bf16.mxu1 %vm6800_vm1, %v4951_v55 }
 0x3f3   : > { %4652 = vmatmul.mubr.msk.f32.vlgmr.msra.gmra.mrb[16].mxu1 %vm1191_vm0, %v1118_v57 }
 0x3f4   : > { %4956 = vmatpush3.bf16.xpose.msk.msra.mxu1 %vm6800_vm1, %v4951_v55  ;;  %4658 = vmatprep.mubr.msk.f32.mxu1 %vm1191_vm0, %v1120_v56 }
 0x3f5   : > { %4958 = vmatprep.subr.bf16.mxu1 %v6840_v26  ;;  %v1122_v58 = vpop.permute.xlu1 %1121 }
 0x3fb   : > { %4659 = vmatmul.mubr.msk.f32.vlgmr.msra.gmra.mrb[18].mxu1 %vm1191_vm0, %v1122_v58 }
 0x3fc   : > { %4960 = vmatpush3.bf16.msra.mxu1 %v6840_v26 }
 0x415   : > { %v5751_v59 = vpop.permute.xlu0 %5750  ;;  %v5756_v60 = vpop.permute.xlu1 %5755 }
 0x416   : > { %v5753_v5 = vunpack.i.h.bf16 %v5751_v59  ;;  %v5752_v6 = vunpack.i.l.bf16 %v5751_v59  ;;  %v5758_v7 = vunpack.i.h.bf16 %v5756_v60  ;;  %v5757_v8 = vunpack.i.l.bf16 %v5756_v60 }
 0x418   : > { %v4961_v9 = vpack.c.bf16 %v5753_v5, %v5752_v6  ;;  %v6888_v12 = vpack.c.bf16 %v5758_v7, %v5757_v8 }
 0x419   : > { %v5761_v62 = vpop.permute.xlu1 %5760 }
 0x41a   : > { %v5763_v13 = vunpack.i.h.bf16 %v5761_v62  ;;  %v5762_v16 = vunpack.i.l.bf16 %v5761_v62  ;;  %4962 = vmatprep.subr.bf16.mxu0 %v4961_v9  ;;  %4966 = vmatprep.subr.bf16.mxu1 %v6888_v12 }
 0x41b   : > { %4964 = vmatpush3.bf16.msra.mxu0 %v4961_v9 }
 0x41c   : > { %v6891_v17 = vpack.c.bf16 %v5763_v13, %v5762_v16 }
 0x41d   : > { %v6931_v43 = vpop.permute.xlu1 %5765 }
 0x41e   : > { %4970 = vmatprep.subr.bf16.mxu0 %v6891_v17 }
 0x43f   : > { %v4611_v18 = vpop.f32.mrb[0].mxu0  ;;  %v6894_v19 = vpop.f32.mrb[12].mxu1 }
 0x440   : > { %v1266_v22 = vpop.f32.mrb[1].mxu0  ;;  %v6896_v0 = vpop.f32.mrb[13].mxu1  ;;  %v1860_v1 = vsel %vm1856_vm2, %v4611_v18, -inf  ;;  %v1884_v15 = vsel %vm1856_vm2, %v6894_v19, -inf }
 0x441   : > { %1861 = vmax.xlane.f32.xlu1 %v1860_v1  ;;  %v1857_v23 = vsel %vm1856_vm2, %v1266_v22, -inf  ;;  %v1881_v26 = vsel %vm1856_vm2, %v6896_v0, -inf }
 0x442   : > { %1858 = vmax.xlane.f32.xlu0 %v1857_v23 }
 0x445   : > { %1885 = vmax.xlane.f32.xlu1 %v1884_v15 }
 0x446   : > { %1882 = vmax.xlane.f32.xlu0 %v1881_v26  ;;  %v5768_v26 = vunpack.i.h.bf16 %v6931_v43 }
 0x4b5   : > { %v4618_v28 = vpop.f32.mrb[2].mxu0 }
 0x4b6   : > { %v1349_v2 = vpop.f32.mrb[3].mxu0  ;;  %v1866_v4 = vsel %vm1856_vm2, %v4618_v28, -inf }
 0x4b7   : > { %1867 = vmax.xlane.f32.xlu0 %v1866_v4  ;;  %v1863_v29 = vsel %vm1856_vm2, %v1349_v2, -inf }
 0x4bb   : > { %1864 = vmax.xlane.f32.xlu0 %v1863_v29 }
 0x4bd   : > { %v6906_v30 = vpop.f32.mrb[4].mxu0 }
 0x4be   : > { %v6908_v33 = vpop.f32.mrb[14].mxu1  ;;  %v6910_v21 = vpop.f32.mrb[5].mxu0  ;;  %v1872_v35 = vsel %vm1856_vm2, %v6906_v30, -inf }
 0x4bf   : > { %v1681_v24 = vpop.f32.mrb[15].mxu1  ;;  %v1890_v20 = vsel %vm1856_vm2, %v6908_v33, -inf  ;;  %v1869_v36 = vsel %vm1856_vm2, %v6910_v21, -inf }
 0x4c0   : > { %1891 = vmax.xlane.f32.xlu1 %v1890_v20  ;;  %v1887_v34 = vsel %vm1856_vm2, %v1681_v24, -inf }
 0x4c1   : > { %1888 = vmax.xlane.f32.xlu0 %v1887_v34 }
 0x4c4   : > { %1873 = vmax.xlane.f32.xlu1 %v1872_v35 }
 0x4c5   : > { %1870 = vmax.xlane.f32.xlu0 %v1869_v36  ;;  %v6919_v37 = vpop.f32.mrb[6].mxu0 }
 0x4c6   : > { %v6921_v38 = vpop.f32.mrb[16].mxu1  ;;  %v6923_v39 = vpop.f32.mrb[7].mxu0  ;;  %v1878_v25 = vsel %vm1856_vm2, %v6919_v37, -inf }
 0x4c7   : > { %v6925_v40 = vpop.f32.mrb[17].mxu1  ;;  %v1896_v41 = vsel %vm1856_vm2, %v6921_v38, -inf  ;;  %v1875_v31 = vsel %vm1856_vm2, %v6923_v39, -inf }
 0x4c8   : > { %1897 = vmax.xlane.f32.xlu1 %v1896_v41  ;;  %v1893_v42 = vsel %vm1856_vm2, %v6925_v40, -inf }
 0x4c9   : > { %1894 = vmax.xlane.f32.xlu0 %v1893_v42 }
 0x4cc   : > { %1879 = vmax.xlane.f32.xlu1 %v1878_v25 }
 0x4cd   : > { %1876 = vmax.xlane.f32.xlu0 %v1875_v31 }
 0x4ce   : > { %v1862_v44 = vpop.xlane.xlu1 %1861  ;;  %v6937_v32 = vpop.f32.mrb[18].mxu1 }
 0x4cf   : > { %v1906_v45 = vsub.f32 %v4611_v18, %v1862_v44  ;;  %v1859_v46 = vpop.xlane.xlu0 %1858  ;;  %v6939_v49 = vpop.f32.mrb[19].mxu1  ;;  %v1902_v50 = vsel %vm1856_vm2, %v6937_v32, -inf }
 0x4d0   : > { %v1905_v51 = vsub.f32 %v1266_v22, %v1859_v46  ;;  %1903 = vmax.xlane.f32.xlu1 %v1902_v50  ;;  %v1899_v52 = vsel %vm1856_vm2, %v6939_v49, -inf }
 0x4d1   : > { %v1923_v53 = vmul.f32 1.442695, %v1906_v45  ;;  %1900 = vmax.xlane.f32.xlu0 %v1899_v52 }
 0x4d2   : > { %v1921_v54 = vmul.f32 1.442695, %v1905_v51  ;;  %v1886_v5 = vpop.xlane.xlu1 %1885 }
 0x4d3   : > { %v1883_v57 = vpop.xlane.xlu0 %1882  ;;  %v1914_v23 = vsub.f32 %v6894_v19, %v1886_v5 }
 0x4d4   : > { %5813 = vpow2.f32 %v1921_v54  ;;  %v1913_v13 = vsub.f32 %v6896_v0, %v1883_v57 }
 0x4d5   : > { %5815 = vpow2.f32 %v1923_v53  ;;  %v1939_v34 = vmul.f32 1.442695, %v1914_v23 }
 0x4de   : > { %v6945_v55 = vpop.eup %5813 }
 0x4df   : > { %v6947_v56 = vpop.eup %5815  ;;  %4665 = vmatprep.mubr.msk.f32.mxu1 %vm1856_vm2, %v6945_v55 }
 0x4e0   : > { %4666 = vmatmul.mubr.msk.f32.vlgmr.msra.gmra.mrb[20].mxu1 %vm1856_vm2, %v6947_v56 }
 0x4e1   : > { %4968 = vmatpush3.bf16.msra.mxu1 %v6888_v12  ;;  %5775 = vrot.lane.b32.xlu1 %v6842_v27, %s6304_s12 }
 0x4e2   : > { %4974 = vmatprep.subr.bf16.mxu1 %v6844_v14 }
 0x4e7   : > { %5770 = vrot.lane.b32.xlu0 %v6842_v27, %s6303_s30 }
 0x544   : > { %v1868_v58 = vpop.xlane.xlu0 %1867 }
 0x545   : > { %v1908_v59 = vsub.f32 %v4618_v28, %v1868_v58  ;;  %v5767_v28 = vunpack.i.l.bf16 %v6931_v43 }
 0x547   : > { %v1927_v7 = vmul.f32 1.442695, %v1908_v59 }
 0x548   : > { %v1865_v60 = vpop.xlane.xlu0 %1864 }
 0x549   : > { %v1907_v6 = vsub.f32 %v1349_v2, %v1865_v60  ;;  %v1937_v2 = vmul.f32 1.442695, %v1913_v13 }
 0x54b   : > { %v1925_v8 = vmul.f32 1.442695, %v1907_v6 }
 0x54d   : > { %5817 = vpow2.f32 %v1925_v8  ;;  %v1892_v9 = vpop.xlane.xlu1 %1891 }
 0x54e   : > { %5819 = vpow2.f32 %v1927_v7  ;;  %v1889_v12 = vpop.xlane.xlu0 %1888  ;;  %v1916_v25 = vsub.f32 %v6908_v33, %v1892_v9 }
 0x54f   : > { %v1915_v62 = vsub.f32 %v1681_v24, %v1889_v12 }
 0x551   : > { %v1941_v16 = vmul.f32 1.442695, %v1915_v62  ;;  %v1874_v18 = vpop.xlane.xlu1 %1873 }
 0x552   : > { %v1910_v22 = vsub.f32 %v6906_v30, %v1874_v18  ;;  %v1871_v27 = vpop.xlane.xlu0 %1870 }
 0x553   : > { %5821 = vpow2.f32 %v1941_v16  ;;  %v1909_v1 = vsub.f32 %v6910_v21, %v1871_v27  ;;  %v6970_v21 = vpack.c.bf16 %v5768_v26, %v5767_v28 }
 0x554   : > { %v1931_v15 = vmul.f32 1.442695, %v1910_v22 }
 0x555   : > { %v1929_v4 = vmul.f32 1.442695, %v1909_v1  ;;  %v1898_v29 = vpop.xlane.xlu1 %1897  ;;  %v1953_v1 = vsel %vm1856_vm2, %v6945_v55, 0.0 }
 0x556   : > { %v1895_v24 = vpop.xlane.xlu0 %1894  ;;  %v1918_v35 = vsub.f32 %v6921_v38, %v1898_v29 }
 0x557   : > { %v5818_v0 = vpop.eup %5817  ;;  %5823 = vpow2.f32 %v1929_v4  ;;  %v1917_v20 = vsub.f32 %v6925_v40, %v1895_v24 }
 0x558   : > { %v6966_v30 = vpop.eup %5819  ;;  %5825 = vpow2.f32 %v1931_v15  ;;  %4672 = vmatprep.mubr.msk.f32.mxu0 %vm1856_vm2, %v5818_v0  ;;  %v1959_v19 = vsel %vm1856_vm2, %v5818_v0, 0.0  ;;  %v1947_v44 = vmul.f32 1.442695, %v1918_v35  ;;  %v2746_v35 = vld [vmem:[#allocation13 + $0x18] sm:$0xff] }
 0x559   : > { %5827 = vpow2.f32 %v1937_v2  ;;  %v1945_v36 = vmul.f32 1.442695, %v1917_v20  ;;  %v1880_v41 = vpop.xlane.xlu1 %1879  ;;  %4673 = vmatmul.mubr.msk.f32.vlgmr.msra.gmra.mrb[8].mxu0 %vm1856_vm2, %v6966_v30  ;;  %1960 = vadd.xlane.f32.xlu1 %v1959_v19  ;;  %v1962_v26 = vsel %vm1856_vm2, %v6966_v30, 0.0 }
 0x55a   : > { %v1912_v40 = vsub.f32 %v6919_v37, %v1880_v41  ;;  %4972 = vmatpush3.bf16.msra.mxu0 %v6891_v17  ;;  %v1877_v42 = vpop.xlane.xlu0 %1876  ;;  %v1943_v37 = vmul.f32 1.442695, %v1916_v25  ;;  %v2750_v25 = vld [vmem:[#allocation13 + $0x38] sm:$0xff] }
 0x55b   : > { %5829 = vpow2.f32 %v1945_v36  ;;  %v1911_v43 = vsub.f32 %v6923_v39, %v1877_v42  ;;  %4978 = vmatprep.subr.bf16.mxu0 %v6970_v21  ;;  %v2743_v36 = vld [vmem:[#allocation13] sm:$0xff] }
 0x55c   : > { %5831 = vpow2.f32 %v1939_v34  ;;  %v1935_v38 = vmul.f32 1.442695, %v1912_v40  ;;  %v2745_v40 = vld [vmem:[#allocation13 + $0x10] sm:$0xff] }
 0x55d   : > { %v5822_v31 = vpop.eup %5821  ;;  %v1933_v45 = vmul.f32 1.442695, %v1911_v43  ;;  %v1904_v46 = vpop.xlane.xlu1 %1903  ;;  %v4991_v42 = vpack.c.bf16 %v2745_v40, %v2743_v36  ;;  %v2748_v43 = vld [vmem:[#allocation13 + $0x28] sm:$0xff]  ;;  %v2775_v40 = vld [vmem:[#allocation13 + $0x100] sm:$0xff] }
 0x55e   : > { %v1901_v50 = vpop.xlane.xlu0 %1900  ;;  %v1983_v51 = vsel %vm1856_vm2, %v5822_v31, 0.0  ;;  %v1920_v39 = vsub.f32 %v6937_v32, %v1904_v46  ;;  %v2754_v46 = vld [vmem:[#allocation13 + $0x58] sm:$0xff] }
 0x55f   : > { %5833 = vpow2.f32 %v1933_v45  ;;  %v1919_v17 = vsub.f32 %v6939_v49, %v1901_v50  ;;  %1984 = vadd.xlane.f32.xlu0 %v1983_v51  ;;  %v2752_v45 = vld [vmem:[#allocation13 + $0x48] sm:$0xff] }
 0x560   : > { %5835 = vpow2.f32 %v1935_v38  ;;  %v1951_v49 = vmul.f32 1.442695, %v1920_v39  ;;  %v2747_v38 = vld [vmem:[#allocation13 + $0x20] sm:$0xff]  ;;  %v2753_v39 = vld [vmem:[#allocation13 + $0x50] sm:$0xff] }
 0x561   : > { %v5824_v52 = vpop.eup %5823  ;;  %5837 = vpow2.f32 %v1947_v44  ;;  %v1949_v53 = vmul.f32 1.442695, %v1919_v17  ;;  %v5776_v5 = vpop.permute.xlu1 %5775  ;;  %v2749_v44 = vld [vmem:[#allocation13 + $0x30] sm:$0xff]  ;;  %v4997_v17 = vpack.c.bf16 %v2754_v46, %v2752_v45  ;;  %v2779_v45 = vld [vmem:[#allocation13 + $0x120] sm:$0xff] }
 0x562   : > { %v5826_v33 = vpop.eup %5825  ;;  %4679 = vmatprep.mubr.msk.f32.mxu1 %vm1856_vm2, %v5824_v52  ;;  %v5771_v54 = vpop.permute.xlu0 %5770  ;;  %v1965_v57 = vsel %vm1856_vm2, %v5824_v52, 0.0  ;;  %v5778_v9 = vunpack.i.h.bf16 %v5776_v5  ;;  %v5777_v12 = vunpack.i.l.bf16 %v5776_v5  ;;  %v4995_v51 = vpack.c.bf16 %v2749_v44, %v2747_v38  ;;  %v2756_v52 = vld [vmem:[#allocation13 + $0x68] sm:$0xff]  ;;  %v2781_v46 = vld [vmem:[#allocation13 + $0x130] sm:$0xff] }
 0x563   : > { %v5828_v58 = vpop.eup %5827  ;;  %5839 = vpow2.f32 %v1949_v53  ;;  %v5773_v59 = vunpack.i.h.bf16 %v5771_v54  ;;  %v5772_v60 = vunpack.i.l.bf16 %v5771_v54  ;;  %4680 = vmatmul.mubr.msk.f32.vlgmr.msra.gmra.mrb[22].mxu1 %vm1856_vm2, %v5826_v33  ;;  %1966 = vadd.xlane.f32.xlu0 %v1965_v57  ;;  %v1968_v55 = vsel %vm1856_vm2, %v5826_v33, 0.0  ;;  %v2758_v53 = vld [vmem:[#allocation13 + $0x78] sm:$0xff] }
 0x564   : > { %5841 = vpow2.f32 %v1943_v37  ;;  %4976 = vmatpush3.bf16.msra.mxu1 %v6844_v14  ;;  %4693 = vmatprep.mubr.msk.f32.mxu1 %vm1856_vm2, %v5828_v58  ;;  %v4985_v18 = vpack.c.bf16 %v5778_v9, %v5777_v12  ;;  %v1977_v28 = vsel %vm1856_vm2, %v5828_v58, 0.0  ;;  %v2751_v37 = vld [vmem:[#allocation13 + $0x40] sm:$0xff]  ;;  %v5001_v57 = vpack.c.bf16 %v2758_v53, %v2756_v52  ;;  %v2764_v9 = vld [vmem:[#allocation13 + $0xa8] sm:$0xff]  ;;  %v2766_v12 = vld [vmem:[#allocation13 + $0xb8] sm:$0xff] }
 0x565   : > { %v5830_v32 = vpop.eup %5829  ;;  %v4981_v6 = vpack.c.bf16 %v5773_v59, %v5772_v60  ;;  %5843 = vpow2.f32 %v1951_v49  ;;  %v4999_v54 = vpack.c.bf16 %v2753_v39, %v2751_v37  ;;  %v2755_v58 = vld [vmem:[#allocation13 + $0x60] sm:$0xff]  ;;  %v2757_v59 = vld [vmem:[#allocation13 + $0x70] sm:$0xff]  ;;  %v2760_v60 = vld [vmem:[#allocation13 + $0x88] sm:$0xff] }
 0x566   : > { %v6988_v7 = vpop.eup %5831  ;;  %v1989_v8 = vsel %vm1856_vm2, %v5830_v32, 0.0  ;;  %v2762_v49 = vld [vmem:[#allocation13 + $0x98] sm:$0xff]  ;;  %v5003_v5 = vpack.c.bf16 %v2757_v59, %v2755_v58  ;;  %v2783_v52 = vld [vmem:[#allocation13 + $0x140] sm:$0xff]  ;;  %v2785_v53 = vld [vmem:[#allocation13 + $0x150] sm:$0xff] }
 0x567   : > { %4694 = vmatmul.mubr.msk.f32.vlgmr.msra.gmra.mrb[24].mxu1 %vm1856_vm2, %v6988_v7  ;;  %1990 = vadd.xlane.f32.xlu0 %v1989_v8  ;;  %v2761_v8 = vld [vmem:[#allocation13 + $0x90] sm:$0xff]  ;;  %v5031_v58 = vpack.c.bf16 %v2785_v53, %v2783_v52 }
 0x568   : > { %4982 = vmatprep.subr.bf16.mxu1 %v4981_v6  ;;  %4707 = vmatprep.mubr.msk.f32.mxu1 %vm1856_vm2, %v5830_v32  ;;  %v5005_v32 = vpack.c.bf16 %v2762_v49, %v2760_v60  ;;  %v2787_v60 = vld [vmem:[#allocation13 + $0x160] sm:$0xff]  ;;  %v2789_v49 = vld [vmem:[#allocation13 + $0x170] sm:$0xff] }
 0x569   : > { %v5834_v62 = vpop.eup %5833  ;;  %4984 = vmatpush3.bf16.msra.mxu1 %v4981_v6  ;;  %v2759_v6 = vld [vmem:[#allocation13 + $0x80] sm:$0xff] }
 0x56a   : > { %v5836_v14 = vpop.eup %5835  ;;  %4686 = vmatprep.mubr.msk.f32.mxu0 %vm1856_vm2, %v5834_v62  ;;  %v1971_v13 = vsel %vm1856_vm2, %v5834_v62, 0.0 }
 0x56b   : > { %v5838_v16 = vpop.eup %5837  ;;  %4687 = vmatmul.mubr.msk.f32.vlgmr.msra.gmra.mrb[10].mxu0 %vm1856_vm2, %v5836_v14  ;;  %1972 = vadd.xlane.f32.xlu1 %v1971_v13  ;;  %v1974_v4 = vsel %vm1856_vm2, %v5836_v14, 0.0  ;;  %v5007_v14 = vpack.c.bf16 %v2761_v8, %v2759_v6  ;;  %v5009_v13 = vpack.c.bf16 %v2766_v12, %v2764_v9  ;;  %v2794_v6 = vld [vmem:[#allocation13 + $0x198] sm:$0xff] }
 0x56c   : > { %4980 = vmatpush3.bf16.msra.mxu0 %v6970_v21  ;;  %4708 = vmatmul.mubr.msk.f32.vlgmr.msra.gmra.mrb[26].mxu1 %vm1856_vm2, %v5838_v16  ;;  %v1992_v29 = vsel %vm1856_vm2, %v5838_v16, 0.0  ;;  %v2744_v21 = vld [vmem:[#allocation13 + $0x8] sm:$0xff]  ;;  %v2763_v16 = vld [vmem:[#allocation13 + $0xa0] sm:$0xff] }
 0x56d   : > { %v5840_v22 = vpop.eup %5839  ;;  %4700 = vmatprep.mubr.msk.f32.mxu0 %vm1856_vm2, %v5822_v31  ;;  %4986 = vmatprep.subr.bf16.mxu0 %v4985_v18  ;;  %v4989_v41 = vpack.c.bf16 %v2746_v35, %v2744_v21  ;;  %v4993_v31 = vpack.c.bf16 %v2750_v25, %v2748_v43  ;;  %v2778_v21 = vld [vmem:[#allocation13 + $0x118] sm:$0xff]  ;;  %v2780_v43 = vld [vmem:[#allocation13 + $0x128] sm:$0xff] }
 0x56e   : > { %v5842_v27 = vpop.eup %5841  ;;  %v1995_v23 = vsel %vm1856_vm2, %v5840_v22, 0.0  ;;  %v2782_v25 = vld [vmem:[#allocation13 + $0x138] sm:$0xff] }
 0x56f   : > { %4701 = vmatmul.mubr.msk.f32.vlgmr.msra.gmra.mrb[12].mxu0 %vm1856_vm2, %v5842_v27  ;;  %1954 = vadd.xlane.f32.xlu1 %v1953_v1  ;;  %v5844_v15 = vpop.eup %5843  ;;  %v1986_v2 = vsel %vm1856_vm2, %v5842_v27, 0.0  ;;  %v2770_v27 = vld [vmem:[#allocation13 + $0xd8] sm:$0xff]  ;;  %v5025_v44 = vpack.c.bf16 %v2782_v25, %v2780_v43 }
 0x570   : > { %4988 = vmatpush3.bf16.msra.mxu0 %v4985_v18  ;;  %1996 = vadd.xlane.f32.xlu0 %v1995_v23  ;;  %v1998_v24 = vsel %vm1856_vm2, %v5844_v15, 0.0  ;;  %v2765_v18 = vld [vmem:[#allocation13 + $0xb0] sm:$0xff] }
 0x571   : > { %4714 = vmatprep.mubr.msk.f32.mxu0 %vm1856_vm2, %v5840_v22  ;;  %4990 = vmatprep.subr.bf16.mxu1 %v4989_v41  ;;  %v2768_v22 = vld [vmem:[#allocation13 + $0xc8] sm:$0xff]  ;;  %v5011_v1 = vpack.c.bf16 %v2765_v18, %v2763_v16  ;;  %v2791_v16 = vld [vmem:[#allocation13 + $0x180] sm:$0xff]  ;;  %v2793_v18 = vld [vmem:[#allocation13 + $0x190] sm:$0xff] }
 0x572   : > { %4992 = vmatpush1.bf16.msra.mxu1 %v4991_v42  ;;  %v2777_v42 = vld [vmem:[#allocation13 + $0x110] sm:$0xff] }
 0x573   : > { %1963 = vadd.xlane.f32.xlu1 %v1962_v26  ;;  %4715 = vmatmul.mubr.msk.f32.vlgmr.msra.gmra.mrb[14].mxu0 %vm1856_vm2, %v5844_v15  ;;  %v5013_v15 = vpack.c.bf16 %v2770_v27, %v2768_v22  ;;  %v2767_v26 = vld [vmem:[#allocation13 + $0xc0] sm:$0xff]  ;;  %v5039_v27 = vpack.c.bf16 %v2793_v18, %v2791_v16 }
 0x574   : > { %1978 = vadd.xlane.f32.xlu0 %v1977_v28  ;;  %4994 = vmatprep.subr.bf16.mxu1 %v4993_v31  ;;  %v2769_v28 = vld [vmem:[#allocation13 + $0xd0] sm:$0xff]  ;;  %v5023_v31 = vpack.c.bf16 %v2777_v42, %v2775_v40 }
 0x576   : > { %4996 = vmatpush1.bf16.msra.mxu1 %v4995_v51  ;;  %v2786_v51 = vld [vmem:[#allocation13 + $0x158] sm:$0xff] }
 0x577   : > { %1969 = vadd.xlane.f32.xlu1 %v1968_v55  ;;  %4998 = vmatprep.subr.bf16.mxu1 %v4997_v17  ;;  %v2772_v55 = vld [vmem:[#allocation13 + $0xe8] sm:$0xff]  ;;  %v5027_v17 = vpack.c.bf16 %v2781_v46, %v2779_v45 }
 0x578   : > { %1987 = vadd.xlane.f32.xlu0 %v1986_v2  ;;  %v2774_v2 = vld [vmem:[#allocation13 + $0xf8] sm:$0xff] }
 0x57a   : > { %5000 = vmatpush1.bf16.msra.mxu1 %v4999_v54  ;;  %v2788_v54 = vld [vmem:[#allocation13 + $0x168] sm:$0xff] }
 0x57b   : > { %1975 = vadd.xlane.f32.xlu1 %v1974_v4  ;;  %5002 = vmatprep.subr.bf16.mxu1 %v5001_v57  ;;  %v5015_v4 = vpack.c.bf16 %v2769_v28, %v2767_v26  ;;  %v2790_v57 = vld [vmem:[#allocation13 + $0x178] sm:$0xff] }
 0x57c   : > { %1993 = vadd.xlane.f32.xlu0 %v1992_v29  ;;  %v5017_v29 = vpack.c.bf16 %v2774_v2, %v2772_v55  ;;  %v5033_v59 = vpack.c.bf16 %v2790_v57, %v2788_v54  ;;  %v2798_v26 = vld [vmem:[#allocation13 + $0x1b8] sm:$0xff]  ;;  %v2795_v2 = vld [vmem:[#allocation13 + $0x1a0] sm:$0xff] }
 0x57e   : > { %5004 = vmatpush1.bf16.msra.mxu1 %v5003_v5 }
 0x57f   : > { %5006 = vmatprep.subr.bf16.mxu1 %v5005_v32  ;;  %v2792_v32 = vld [vmem:[#allocation13 + $0x188] sm:$0xff] }
 0x580   : > { %1999 = vadd.xlane.f32.xlu0 %v1998_v24  ;;  %v2771_v24 = vld [vmem:[#allocation13 + $0xe0] sm:$0xff] }
 0x582   : > { %5008 = vmatpush1.bf16.msra.mxu1 %v5007_v14  ;;  %v5035_v14 = vpack.c.bf16 %v2789_v49, %v2787_v60 }
 0x583   : > { %5010 = vmatprep.subr.bf16.mxu1 %v5009_v13  ;;  %v5037_v13 = vpack.c.bf16 %v2794_v6, %v2792_v32 }
 0x586   : > { %5012 = vmatpush1.bf16.msra.mxu1 %v5011_v1 }
 0x587   : > { %5014 = vmatprep.subr.bf16.mxu1 %v5013_v15  ;;  %v2796_v15 = vld [vmem:[#allocation13 + $0x1a8] sm:$0xff] }
 0x588   : > { %v5041_v55 = vpack.c.bf16 %v2798_v26, %v2796_v15 }
 0x58a   : > { %5016 = vmatpush1.bf16.msra.mxu1 %v5015_v4  ;;  %v2797_v4 = vld [vmem:[#allocation13 + $0x1b0] sm:$0xff] }
 0x58b   : > { %5018 = vmatprep.subr.bf16.mxu1 %v5017_v29 }
 0x5b3   : > { %v7014_v0 = vpop.f32.mrb[20].mxu1 }
 0x5b4   : > { %v2073_v20 = vpop.f32.mrb[21].mxu1 }
 0x5e6   : > { %v7016_v30 = vpop.xlane.xlu1 %1960 }
 0x5ec   : > { %v7022_v62 = vpop.xlane.xlu0 %1984 }
 0x5f0   : > { %v7024_v23 = vpop.xlane.xlu0 %1966 }
 0x5f4   : > { %v1991_v35 = vpop.xlane.xlu0 %1990 }
 0x5f8   : > { %v7018_v34 = vpop.xlane.xlu1 %1972 }
 0x5fc   : > { %v1955_v19 = vpop.xlane.xlu1 %1954 }
 0x5fd   : > { %5845 = vrcp.f32 %v1955_v19  ;;  %v2776_v19 = vld [vmem:[#allocation13 + $0x108] sm:$0xff]  ;;  %v7026_v38 = vpop.xlane.xlu0 %1996 }
 0x5fe   : > { %v5021_v41 = vpack.c.bf16 %v2778_v21, %v2776_v19  ;;  %v2802_v19 = vld [vmem:[#allocation13 + $0x1d8] sm:$0xff] }
 0x600   : > { %v1964_v5 = vpop.xlane.xlu1 %1963 }
 0x601   : > { %v1979_v37 = vpop.xlane.xlu0 %1978 }
 0x602   : > { %5847 = vrcp.f32 %v1979_v37 }
 0x603   : > { %5849 = vrcp.f32 %v7016_v30 }
 0x604   : > { %v1970_v22 = vpop.xlane.xlu1 %1969  ;;  %5851 = vrcp.f32 %v7024_v23  ;;  %v2800_v23 = vld [vmem:[#allocation13 + $0x1c8] sm:$0xff] }
 0x605   : > { %v1988_v8 = vpop.xlane.xlu0 %1987  ;;  %5853 = vrcp.f32 %v1970_v22 }
 0x607   : > { %v5846_v50 = vpop.eup %5845 }
 0x608   : > { %v7020_v33 = vmul.f32 %v5846_v50, %v2073_v20  ;;  %v2773_v20 = vld [vmem:[#allocation13 + $0xf0] sm:$0xff]  ;;  %v2784_v50 = vld [vmem:[#allocation13 + $0x148] sm:$0xff] }
 0x609   : > { %v5019_v36 = vpack.c.bf16 %v2773_v20, %v2771_v24  ;;  %v5029_v39 = vpack.c.bf16 %v2786_v51, %v2784_v50  ;;  %v1994_v1 = vpop.xlane.xlu0 %1993  ;;  %v5043_v24 = vpack.c.bf16 %v2797_v4, %v2795_v2  ;;  %v1976_v20 = vpop.xlane.xlu1 %1975  ;;  %v2803_v51 = vld [vmem:[#allocation13 + $0x1e0] sm:$0xff] }
 0x60a   : > { %5855 = vrcp.f32 %v1994_v1 }
 0x60b   : > { %5020 = vmatpush1.bf16.msra.mxu1 %v5019_v36  ;;  %5857 = vrcp.f32 %v1991_v35  ;;  %v5045_v35 = vpack.c.bf16 %v2802_v19, %v2800_v23  ;;  %v2799_v36 = vld [vmem:[#allocation13 + $0x1c0] sm:$0xff] }
 0x60c   : > { %5022 = vmatprep.subr.bf16.mxu1 %v5021_v41  ;;  %5859 = vrcp.f32 %v1964_v5  ;;  %v2801_v41 = vld [vmem:[#allocation13 + $0x1d0] sm:$0xff]  ;;  %v5848_v40 = vpop.eup %5847 }
 0x60d   : > { %5861 = vrcp.f32 %v1988_v8  ;;  %v2000_v30 = vpop.xlane.xlu0 %1999  ;;  %v5047_v43 = vpack.c.bf16 %v2801_v41, %v2799_v36  ;;  %v5850_v25 = vpop.eup %5849 }
 0x60e   : > { %5863 = vrcp.f32 %v7022_v62  ;;  %v5852_v62 = vpop.eup %5851 }
 0x60f   : > { %5024 = vmatpush1.bf16.msra.mxu1 %v5023_v31  ;;  %5865 = vrcp.f32 %v7018_v34  ;;  %v2806_v34 = vld [vmem:[#allocation13 + $0x1f8] sm:$0xff]  ;;  %v5854_v45 = vpop.eup %5853 }
 0x610   : > { %5026 = vmatprep.subr.bf16.mxu1 %v5025_v44  ;;  %5867 = vrcp.f32 %v1976_v20  ;;  %v2804_v44 = vld [vmem:[#allocation13 + $0x1e8] sm:$0xff] }
 0x611   : > { %5869 = vrcp.f32 %v2000_v30  ;;  %v5049_v50 = vpack.c.bf16 %v2806_v34, %v2804_v44 }
 0x612   : > { %5871 = vrcp.f32 %v7026_v38 }
 0x613   : > { %5028 = vmatpush1.bf16.msra.mxu1 %v5027_v17  ;;  %v2805_v17 = vld [vmem:[#allocation13 + $0x1f0] sm:$0xff] }
 0x614   : > { %5030 = vmatprep.subr.bf16.mxu1 %v5029_v39  ;;  %v5856_v37 = vpop.eup %5855  ;;  %v5051_v53 = vpack.c.bf16 %v2805_v17, %v2803_v51 }
 0x615   : > { %v5858_v54 = vpop.eup %5857 }
 0x616   : > { %v5860_v60 = vpop.eup %5859 }
 0x617   : > { %5032 = vmatpush1.bf16.msra.mxu1 %v5031_v58  ;;  %v5862_v5 = vpop.eup %5861 }
 0x618   : > { %5034 = vmatprep.subr.bf16.mxu1 %v5033_v59  ;;  %v5864_v8 = vpop.eup %5863 }
 0x619   : > { %v5866_v22 = vpop.eup %5865 }
 0x61a   : > { %v5868_v15 = vpop.eup %5867 }
 0x61b   : > { %5036 = vmatpush1.bf16.msra.mxu1 %v5035_v14 }
 0x61c   : > { %5038 = vmatprep.subr.bf16.mxu1 %v5037_v13 }
 0x61f   : > { %5040 = vmatpush1.bf16.msra.mxu1 %v5039_v27 }
 0x620   : > { %5042 = vmatprep.subr.bf16.mxu1 %v5041_v55 }
 0x623   : > { %5044 = vmatpush1.bf16.msra.mxu1 %v5043_v24 }
 0x624   : > { %5046 = vmatprep.subr.bf16.mxu1 %v5045_v35  ;;  %v1980_v35 = vsel %vm1856_vm2, %v6988_v7, 0.0 }
 0x627   : > { %5048 = vmatpush1.bf16.msra.mxu1 %v5047_v43 }
 0x628   : > { %5050 = vmatprep.subr.bf16.mxu1 %v5049_v50 }
 0x62b   : > { %5052 = vmatpush1.bf16.msra.mxu1 %v5051_v53 }
 0x62c   : > { %v7028_v9 = vpop.f32.mrb[8].mxu0 }
 0x62d   : > { %v7030_v12 = vpop.f32.mrb[9].mxu0  ;;  %v2668_v14 = vmul.f32 %v5860_v60, %v7028_v9 }
 0x62e   : > { %v2667_v27 = vmul.f32 %v5850_v25, %v7030_v12  ;;  %v1956_v12 = vsel %vm1856_vm2, %v6947_v56, 0.0 }
 0x636   : > { %v4681_v28 = vpop.f32.mrb[22].mxu1 }
 0x637   : > { %v2235_v29 = vpop.f32.mrb[23].mxu1  ;;  %v2670_v57 = vmul.f32 %v5854_v45, %v4681_v28  ;;  %v5870_v28 = vpop.eup %5869 }
 0x638   : > { %v2669_v49 = vmul.f32 %v5852_v62, %v2235_v29  ;;  %v5872_v4 = vpop.eup %5871 }
 0x63a   : > { %v7036_v21 = vpop.f32.mrb[24].mxu1 }
 0x63b   : > { %v2397_v42 = vpop.f32.mrb[25].mxu1 }
 0x63c   : > { %v7038_v31 = vmul.f32 %v5848_v40, %v2397_v42 }
 0x63e   : > { %v4688_v46 = vpop.f32.mrb[10].mxu0 }
 0x63f   : > { %v4709_v39 = vpop.f32.mrb[26].mxu1  ;;  %v2316_v52 = vpop.f32.mrb[11].mxu0  ;;  %v2672_v29 = vmul.f32 %v5868_v15, %v4688_v46 }
 0x640   : > { %v2678_v58 = vmul.f32 %v5856_v37, %v4709_v39  ;;  %v2559_v59 = vpop.f32.mrb[27].mxu1  ;;  %v2671_v30 = vmul.f32 %v5866_v22, %v2316_v52 }
 0x641   : > { %v2677_v38 = vmul.f32 %v5858_v54, %v2559_v59 }
 0x642   : > { %v5799_v32 = vpack.i.bf16 %v2670_v57, %v2678_v58  ;;  %v4702_v6 = vpop.f32.mrb[12].mxu0 }
 0x643   : > { %v5784_v13 = vpack.i.bf16 %v2669_v49, %v2677_v38  ;;  %v2676_v16 = vmul.f32 %v5862_v5, %v4702_v6  ;;  %v2478_v18 = vpop.f32.mrb[13].mxu0 }
 0x644   : > { %v2675_v1 = vmul.f32 %v5864_v8, %v2478_v18 }
 0x645   : > { %v5794_v26 = vpack.i.bf16 %v2668_v14, %v2676_v16  ;;  %5785 = vrot.lane.b32.xlu1 %v5784_v13, %s6303_s30 }
 0x646   : > { %v5779_v55 = vpack.i.bf16 %v2667_v27, %v2675_v1  ;;  %v4716_v2 = vpop.f32.mrb[14].mxu0 }
 0x647   : > { %v2680_v24 = vmul.f32 %v5870_v28, %v4716_v2  ;;  %v2640_v20 = vpop.f32.mrb[15].mxu0 }
 0x648   : > { %v2679_v9 = vmul.f32 %v5872_v4, %v2640_v20  ;;  %5780 = vrot.lane.b32.xlu0 %v5779_v55, %s6304_s12  ;;  %v5946_v55 = vld [vmem:[%s6684_s19 + $0x8] sm:$0xff] }
 0x649   : > { %v5804_v23 = vpack.i.bf16 %v2672_v29, %v2680_v24 }
 0x64a   : > { %v5789_v19 = vpack.i.bf16 %v2671_v30, %v2679_v9  ;;  %v5947_v9 = vld [vmem:[%s6684_s19 + $0x10] sm:$0xff] }
 0x64c   : > { %5790 = vrot.lane.b32.xlu1 %v5789_v19, %s6302_s3  ;;  %v5948_v19 = vld [vmem:[%s6684_s19 + $0x18] sm:$0xff] }
 0x667   : > { %1957 = vadd.xlane.f32.xlu0 %v1956_v12 }
 0x670   : > { %1981 = vadd.xlane.f32.xlu1 %v1980_v35 }
 0x67d   : > { %5795 = vrot.lane.b32.xlu0 %v5794_v26, %s6304_s12  ;;  %v5945_v26 = vld [vmem:[%s6684_s19] sm:$0xff]  ;;  %s4540_s12 = sshll.u32 %s6399_s14, 9  ;;  %s4283_s14 = scalar_lea.sflag [#allocation4], %s6678_s20 }
 0x67e   : > { %s7286_s1 = scalar_lea.hbm %s7382_s13, %s4540_s12 }
 0x681   : > { %5800 = vrot.lane.b32.xlu1 %v5799_v32, %s6303_s30 }
 0x685   : > { %5805 = vrot.lane.b32.xlu1 %v5804_v23, %s6302_s3  ;;  %s566_s3 = scalar_lea.vmem [#allocation17], %s4460_s18 }
 0x686   : > { %s4296_s30 = sshll.u32 %s566_s3, 4  ;;  %s7280_s30 = int_to_ptr.vmem [resolvable:$true] %s4296_s30 }
 0x687   : > { %s6203_s29 = scalar_lea.vmem %s7280_s30, 512 }
 0x688   : > { %p6204_p5 = scmp.ne.s32.totalorder %s7280_s30, %s6203_s29 }
 0x68a   : > { %p6205_p4 = pnand %p6204_p5, %p7383_p7 }
 0x68c   : > { %p6206_p1 = pneg %p6205_p4 }
 0x6b7   : > { %v5786_v36 = vpop.permute.xlu1 %5785 }
 0x6b8   : > { %v5788_v25 = vunpack.i.h.bf16 %v5786_v36  ;;  %v5787_v7 = vunpack.i.l.bf16 %v5786_v36  ;;  %v2965_v36 = vld [vmem:[#allocation14 + $0x8] sm:$0xff] }
 0x6ba   : > { %v5781_v41 = vpop.permute.xlu0 %5780 }
 0x6bb   : > { %v5783_v40 = vunpack.i.h.bf16 %v5781_v41  ;;  %v5782_v42 = vunpack.i.l.bf16 %v5781_v41  ;;  %v2973_v41 = vld [vmem:[#allocation14 + $0x48] sm:$0xff] }
 0x6bd   : > { %v2729_v43 = vsel %vm1191_vm0, %v7020_v33, %v5783_v40  ;;  %v2737_v56 = vsel %vm1191_vm0, %v7038_v31, %v5782_v42  ;;  %v2967_v40 = vld [vmem:[#allocation14 + $0x18] sm:$0xff]  ;;  %v5053_v42 = vpack.c.bf16 %v2973_v41, %v2965_v36  ;;  %v3028_v36 = vld [vmem:[#allocation14 + $0x200] sm:$0xff] }
 0x6be   : > { %v5791_v62 = vpop.permute.xlu1 %5790  ;;  %v2739_v45 = vsel %vm2731_vm3, %v2737_v56, %v5787_v7  ;;  %v2732_v46 = vsel %vm2731_vm3, %v2729_v43, %v5788_v25  ;;  %v2975_v43 = vld [vmem:[#allocation14 + $0x58] sm:$0xff]  ;;  %v2964_v56 = vld [vmem:[#allocation14] sm:$0xff] }
 0x6bf   : > { %v5793_v44 = vunpack.i.h.bf16 %v5791_v62  ;;  %v5792_v34 = vunpack.i.l.bf16 %v5791_v62  ;;  %v2972_v25 = vld [vmem:[#allocation14 + $0x40] sm:$0xff]  ;;  %v5117_v7 = vpack.c.bf16 %v2975_v43, %v2967_v40  ;;  %5054 = vmatprep.subr.bf16.mxu0 %v5053_v42  ;;  %v3030_v40 = vld [vmem:[#allocation14 + $0x210] sm:$0xff] }
 0x6c0   : > { %v5055_v62 = vpack.c.bf16 %v2972_v25, %v2964_v56  ;;  %v3036_v41 = vld [vmem:[#allocation14 + $0x240] sm:$0xff]  ;;  %v3038_v43 = vld [vmem:[#allocation14 + $0x250] sm:$0xff]  ;;  %v3045_v56 = vld [vmem:[#allocation14 + $0x288] sm:$0xff] }
 0x6c1   : > { %v2741_v50 = vsel %vm2734_vm4, %v2739_v45, %v5792_v34  ;;  %v2735_v51 = vsel %vm2734_vm4, %v2732_v46, %v5793_v44  ;;  %v2966_v44 = vld [vmem:[#allocation14 + $0x10] sm:$0xff]  ;;  %v2981_v45 = vld [vmem:[#allocation14 + $0x88] sm:$0xff]  ;;  %5118 = vmatprep.subr.bf16.mxu1 %v5117_v7  ;;  %v3047_v7 = vld [vmem:[#allocation14 + $0x298] sm:$0xff] }
 0x6c2   : > { %2883 = vmatprep.mubr.f32.mxu1 %v2741_v50  ;;  %v2974_v34 = vld [vmem:[#allocation14 + $0x50] sm:$0xff]  ;;  %v2989_v50 = vld [vmem:[#allocation14 + $0xc8] sm:$0xff]  ;;  %5056 = vmatpush1.bf16.msra.mxu0 %v5055_v62  ;;  %v3055_v62 = vld [vmem:[#allocation14 + $0x2d8] sm:$0xff] }
 0x6c3   : > { %2884 = vmatmul.mubr.f32.vlgmr.msra.gmra.mrb[28].mxu1 %v2735_v51  ;;  %v5119_v46 = vpack.c.bf16 %v2974_v34, %v2966_v44  ;;  %v2983_v51 = vld [vmem:[#allocation14 + $0x98] sm:$0xff]  ;;  %v3053_v25 = vld [vmem:[#allocation14 + $0x2c8] sm:$0xff]  ;;  %v5071_v44 = vpack.c.bf16 %v3036_v41, %v3028_v36  ;;  %v5135_v34 = vpack.c.bf16 %v3038_v43, %v3030_v40 }
 0x6c4   : > { %v3109_v36 = vld [vmem:[#allocation14 + $0x488] sm:$0xff]  ;;  %v3111_v40 = vld [vmem:[#allocation14 + $0x498] sm:$0xff] }
 0x6c5   : > { %5120 = vmatpush1.bf16.msra.mxu1 %v5119_v46  ;;  %v3044_v46 = vld [vmem:[#allocation14 + $0x280] sm:$0xff]  ;;  %v3117_v41 = vld [vmem:[#allocation14 + $0x4c8] sm:$0xff] }
 0x6f4   : > { %v1958_v33 = vpop.xlane.xlu0 %1957 }
 0x6f5   : > { %5873 = vrcp.f32 %v1958_v33  ;;  %v2991_v33 = vld [vmem:[#allocation14 + $0xd8] sm:$0xff] }
 0x6f8   : > { %v5796_v39 = vpop.permute.xlu0 %5795 }
 0x6f9   : > { %v5798_v57 = vunpack.i.h.bf16 %v5796_v39  ;;  %v5797_v58 = vunpack.i.l.bf16 %v5796_v39  ;;  %v2988_v39 = vld [vmem:[#allocation14 + $0xc0] sm:$0xff] }
 0x6fd   : > { %v1982_v17 = vpop.xlane.xlu1 %1981 }
 0x6fe   : > { %5875 = vrcp.f32 %v1982_v17  ;;  %v5057_v17 = vpack.c.bf16 %v2989_v50, %v2981_v45  ;;  %v5073_v45 = vpack.c.bf16 %v3053_v25, %v3045_v56  ;;  %v3052_v50 = vld [vmem:[#allocation14 + $0x2c0] sm:$0xff]  ;;  %v5089_v25 = vpack.c.bf16 %v3117_v41, %v3109_v36  ;;  %v3158_v41 = vld [vmem:[#allocation14 + $0x610] sm:$0xff] }
 0x6ff   : > { %v5874_v37 = vpop.eup %5873 }
 0x700   : > { %v2666_v52 = vmul.f32 %v5874_v37, %v7014_v0  ;;  %v2980_v37 = vld [vmem:[#allocation14 + $0x80] sm:$0xff]  ;;  %5058 = vmatprep.subr.bf16.mxu0 %v5057_v17  ;;  %v3054_v17 = vld [vmem:[#allocation14 + $0x2d0] sm:$0xff] }
 0x701   : > { %v5801_v31 = vpop.permute.xlu1 %5800 }
 0x702   : > { %v5803_v59 = vunpack.i.h.bf16 %v5801_v31  ;;  %v5802_v49 = vunpack.i.l.bf16 %v5801_v31  ;;  %v2730_v5 = vsel %vm1191_vm0, %v2666_v52, %v5798_v57  ;;  %v5121_v31 = vpack.c.bf16 %v2991_v33, %v2983_v51  ;;  %v2982_v52 = vld [vmem:[#allocation14 + $0x90] sm:$0xff]  ;;  %v2997_v57 = vld [vmem:[#allocation14 + $0x108] sm:$0xff] }
 0x703   : > { %v3046_v51 = vld [vmem:[#allocation14 + $0x290] sm:$0xff]  ;;  %v5137_v33 = vpack.c.bf16 %v3055_v62, %v3047_v7  ;;  %v3108_v7 = vld [vmem:[#allocation14 + $0x480] sm:$0xff] }
 0x704   : > { %v2733_v14 = vsel %vm2731_vm3, %v2730_v5, %v5803_v59  ;;  %5122 = vmatprep.subr.bf16.mxu1 %v5121_v31  ;;  %v2996_v5 = vld [vmem:[#allocation14 + $0x100] sm:$0xff]  ;;  %v3061_v31 = vld [vmem:[#allocation14 + $0x308] sm:$0xff] }
 0x705   : > { %v5806_v53 = vpop.permute.xlu1 %5805  ;;  %v3116_v62 = vld [vmem:[#allocation14 + $0x4c0] sm:$0xff] }
 0x706   : > { %v5808_v38 = vunpack.i.h.bf16 %v5806_v53  ;;  %v5807_v32 = vunpack.i.l.bf16 %v5806_v53  ;;  %v5059_v53 = vpack.c.bf16 %v2988_v39, %v2980_v37  ;;  %v3069_v37 = vld [vmem:[#allocation14 + $0x348] sm:$0xff]  ;;  %v3063_v39 = vld [vmem:[#allocation14 + $0x318] sm:$0xff] }
 0x708   : > { %v5876_v54 = vpop.eup %5875  ;;  %v2736_v13 = vsel %vm2734_vm4, %v2733_v14, %v5808_v38  ;;  %v3007_v38 = vld [vmem:[#allocation14 + $0x158] sm:$0xff]  ;;  %5060 = vmatpush1.bf16.msra.mxu0 %v5059_v53  ;;  %v5075_v53 = vpack.c.bf16 %v3052_v50, %v3044_v46  ;;  %v3125_v46 = vld [vmem:[#allocation14 + $0x508] sm:$0xff] }
 0x709   : > { %v2674_v60 = vmul.f32 %v5876_v54, %v7036_v21  ;;  %v2807_v21 = vld [vmem:[%s7339_s8] sm:$0x3]  ;;  %v2990_v54 = vld [vmem:[#allocation14 + $0xd0] sm:$0xff]  ;;  %v3133_v50 = vld [vmem:[#allocation14 + $0x548] sm:$0xff] }
 0x70a   : > { %v2812_v16 = vrot.slane %v2807_v21, %v6748_v3  ;;  %v2816_v18 = vrot.slane %v2807_v21, %v6745_v63  ;;  %v5123_v59 = vpack.c.bf16 %v2990_v54, %v2982_v52  ;;  %v3021_v21 = vld [vmem:[#allocation14 + $0x1c8] sm:$0xff]  ;;  %v3071_v52 = vld [vmem:[#allocation14 + $0x358] sm:$0xff]  ;;  %v5139_v54 = vpack.c.bf16 %v3054_v17, %v3046_v51 }
 0x70b   : > { %v2738_v6 = vsel %vm1191_vm0, %v2674_v60, %v5797_v58  ;;  %v3005_v58 = vld [vmem:[#allocation14 + $0x148] sm:$0xff]  ;;  %v3127_v51 = vld [vmem:[#allocation14 + $0x518] sm:$0xff]  ;;  %v5091_v17 = vpack.c.bf16 %v3116_v62, %v3108_v7 }
 0x70c   : > { %v2740_v8 = vsel %vm2731_vm3, %v2738_v6, %v5802_v49  ;;  %v5061_v60 = vpack.c.bf16 %v3005_v58, %v2997_v57  ;;  %v2999_v49 = vld [vmem:[#allocation14 + $0x118] sm:$0xff]  ;;  %v3004_v6 = vld [vmem:[#allocation14 + $0x140] sm:$0xff]  ;;  %5124 = vmatpush1.bf16.msra.mxu1 %v5123_v59  ;;  %v5077_v57 = vpack.c.bf16 %v3069_v37, %v3061_v31  ;;  %v5093_v37 = vpack.c.bf16 %v3133_v50, %v3125_v46  ;;  %v3174_v46 = vld [vmem:[#allocation14 + $0x690] sm:$0xff] }
 0x70d   : > { %v2742_v0 = vsel %vm2734_vm4, %v2740_v8, %v5807_v32  ;;  %v5125_v32 = vpack.c.bf16 %v3007_v38, %v2999_v49  ;;  %v2998_v8 = vld [vmem:[#allocation14 + $0x110] sm:$0xff]  ;;  %v5063_v14 = vpack.c.bf16 %v3004_v6, %v2996_v5  ;;  %v3060_v58 = vld [vmem:[#allocation14 + $0x300] sm:$0xff]  ;;  %v5141_v49 = vpack.c.bf16 %v3071_v52, %v3063_v39  ;;  %v3077_v5 = vld [vmem:[#allocation14 + $0x388] sm:$0xff] }
 0x70e   : > { %2889 = vmatprep.mubr.f32.mxu1 %v2742_v0  ;;  %v3006_v0 = vld [vmem:[#allocation14 + $0x150] sm:$0xff]  ;;  %5062 = vmatprep.subr.bf16.mxu0 %v5061_v60  ;;  %v3068_v59 = vld [vmem:[#allocation14 + $0x340] sm:$0xff]  ;;  %v3079_v6 = vld [vmem:[#allocation14 + $0x398] sm:$0xff] }
 0x70f   : > { %2890 = vmatmul.mubr.f32.gmra.mrb[30].mxu1 %v2736_v13  ;;  %v3013_v13 = vld [vmem:[#allocation14 + $0x188] sm:$0xff]  ;;  %5126 = vmatprep.subr.bf16.mxu1 %v5125_v32  ;;  %v3062_v60 = vld [vmem:[#allocation14 + $0x310] sm:$0xff]  ;;  %v3124_v39 = vld [vmem:[#allocation14 + $0x500] sm:$0xff] }
 0x710   : > { %5064 = vmatpush1.bf16.msra.mxu0 %v5063_v14  ;;  %v3070_v38 = vld [vmem:[#allocation14 + $0x350] sm:$0xff]  ;;  %v3085_v32 = vld [vmem:[#allocation14 + $0x3c8] sm:$0xff]  ;;  %v3132_v52 = vld [vmem:[#allocation14 + $0x540] sm:$0xff] }
 0x711   : > { %v5143_v14 = vpack.c.bf16 %v3070_v38, %v3062_v60  ;;  %v3183_v7 = vld [vmem:[#allocation14 + $0x6d8] sm:$0xff] }
 0x796   : > { %v2885_v22 = vpop.f32.mrb[28].mxu1 }
 0x797   : > { %v2886_v27 = vadd.f32 %v2885_v22, %v2812_v16  ;;  %v2887_v1 = vpop.f32.mrb[29].mxu1  ;;  %v5065_v22 = vpack.c.bf16 %v3021_v21, %v3013_v13  ;;  %v5081_v13 = vpack.c.bf16 %v3085_v32, %v3077_v5  ;;  %v3076_v21 = vld [vmem:[#allocation14 + $0x380] sm:$0xff] }
 0x798   : > { %v2888_v15 = vadd.f32 %v2887_v1, %v2816_v18  ;;  %v3012_v1 = vld [vmem:[#allocation14 + $0x180] sm:$0xff] }
 0x799   : > { %v7075_v28 = vadd.f32 %v5945_v26, %v2886_v27  ;;  %v3023_v27 = vld [vmem:[#allocation14 + $0x1d8] sm:$0xff]  ;;  %5066 = vmatprep.subr.bf16.mxu0 %v5065_v22 }
 0x79a   : > { %v7078_v2 = vadd.f32 %v5946_v55, %v2888_v15  ;;  %v3020_v15 = vld [vmem:[#allocation14 + $0x1c0] sm:$0xff]  ;;  %v3014_v55 = vld [vmem:[#allocation14 + $0x190] sm:$0xff] }
 0x79c   : > { %v2902_v4 = vadd.f32 %v7078_v2, %v7075_v28 }
 0x79e   : > { %2903 = vadd.xlane.f32.xlu0 %v2902_v4  ;;  %v3022_v4 = vld [vmem:[#allocation14 + $0x1d0] sm:$0xff] }
 0x7e2   : > { %v2891_v29 = vpop.f32.mrb[30].mxu1 }
 0x7e3   : > { %v2892_v24 = vadd.f32 %v2891_v29, %v2812_v16  ;;  %v2893_v20 = vpop.f32.mrb[31].mxu1  ;;  %v3015_v16 = vld [vmem:[#allocation14 + $0x198] sm:$0xff]  ;;  %v3029_v29 = vld [vmem:[#allocation14 + $0x208] sm:$0xff] }
 0x7e4   : > { %v2894_v30 = vadd.f32 %v2893_v20, %v2816_v18  ;;  %v5127_v18 = vpack.c.bf16 %v3006_v0, %v2998_v8  ;;  %v5129_v26 = vpack.c.bf16 %v3023_v27, %v3015_v16  ;;  %v3031_v20 = vld [vmem:[#allocation14 + $0x218] sm:$0xff]  ;;  %v5079_v0 = vpack.c.bf16 %v3068_v59, %v3060_v58  ;;  %v3084_v16 = vld [vmem:[#allocation14 + $0x3c0] sm:$0xff]  ;;  %v3086_v27 = vld [vmem:[#allocation14 + $0x3d0] sm:$0xff] }
 0x7e5   : > { %v7083_v23 = vadd.f32 %v5947_v9, %v2892_v24  ;;  %v3037_v24 = vld [vmem:[#allocation14 + $0x248] sm:$0xff]  ;;  %v5067_v9 = vpack.c.bf16 %v3020_v15, %v3012_v1  ;;  %v3087_v8 = vld [vmem:[#allocation14 + $0x3d8] sm:$0xff]  ;;  %v5095_v58 = vpack.c.bf16 %v3132_v52, %v3124_v39 }
 0x7e6   : > { %v7086_v12 = vadd.f32 %v5948_v19, %v2894_v30  ;;  %v3039_v30 = vld [vmem:[#allocation14 + $0x258] sm:$0xff]  ;;  %5128 = vmatpush1.bf16.msra.mxu1 %v5127_v18  ;;  %v5131_v19 = vpack.c.bf16 %v3022_v4, %v3014_v55  ;;  %v3078_v18 = vld [vmem:[#allocation14 + $0x390] sm:$0xff]  ;;  %v5145_v22 = vpack.c.bf16 %v3087_v8, %v3079_v6  ;;  %v3093_v1 = vld [vmem:[#allocation14 + $0x408] sm:$0xff]  ;;  %v5083_v4 = vpack.c.bf16 %v3084_v16, %v3076_v21 }
 0x7e7   : > { %5130 = vmatprep.subr.bf16.mxu1 %v5129_v26  ;;  %v5133_v42 = vpack.c.bf16 %v3039_v30, %v3031_v20  ;;  %5068 = vmatpush1.bf16.msra.mxu0 %v5067_v9  ;;  %v3101_v15 = vld [vmem:[#allocation14 + $0x448] sm:$0xff]  ;;  %v3095_v26 = vld [vmem:[#allocation14 + $0x418] sm:$0xff]  ;;  %v3092_v20 = vld [vmem:[#allocation14 + $0x400] sm:$0xff] }
 0x7e8   : > { %v2905_v35 = vadd.f32 %v7086_v12, %v7083_v23  ;;  %v3103_v55 = vld [vmem:[#allocation14 + $0x458] sm:$0xff]  ;;  %v3100_v30 = vld [vmem:[#allocation14 + $0x440] sm:$0xff]  ;;  %v3094_v9 = vld [vmem:[#allocation14 + $0x410] sm:$0xff] }
 0x7e9   : > { %v5087_v43 = vpack.c.bf16 %v3100_v30, %v3092_v20  ;;  %v3151_v16 = vld [vmem:[#allocation14 + $0x5d8] sm:$0xff] }
 0x7ea   : > { %2906 = vadd.xlane.f32.xlu1 %v2905_v35  ;;  %v5069_v35 = vpack.c.bf16 %v3037_v24, %v3029_v29  ;;  %5132 = vmatpush1.bf16.msra.mxu1 %v5131_v19  ;;  %v5147_v29 = vpack.c.bf16 %v3086_v27, %v3078_v18  ;;  %v5085_v24 = vpack.c.bf16 %v3101_v15, %v3093_v1  ;;  %v3140_v18 = vld [vmem:[#allocation14 + $0x580] sm:$0xff]  ;;  %v3142_v15 = vld [vmem:[#allocation14 + $0x590] sm:$0xff]  ;;  %v3167_v30 = vld [vmem:[#allocation14 + $0x658] sm:$0xff] }
 0x7eb   : > { %5134 = vmatprep.subr.bf16.mxu1 %v5133_v42  ;;  %v5149_v19 = vpack.c.bf16 %v3103_v55, %v3095_v26  ;;  %v3119_v42 = vld [vmem:[#allocation14 + $0x4d8] sm:$0xff]  ;;  %v3150_v26 = vld [vmem:[#allocation14 + $0x5d0] sm:$0xff] }
 0x7ec   : > { %5070 = vmatprep.subr.bf16.mxu0 %v5069_v35  ;;  %v3102_v35 = vld [vmem:[#allocation14 + $0x450] sm:$0xff]  ;;  %v5163_v55 = vpack.c.bf16 %v3150_v26, %v3142_v15  ;;  %v3191_v39 = vld [vmem:[#allocation14 + $0x718] sm:$0xff]  ;;  %v2969_v15 = vld [vmem:[#allocation14 + $0x28] sm:$0xff] }
 0x7ed   : > { %5072 = vmatpush1.bf16.msra.mxu0 %v5071_v44  ;;  %v5151_v56 = vpack.c.bf16 %v3102_v35, %v3094_v9  ;;  %v3110_v44 = vld [vmem:[#allocation14 + $0x490] sm:$0xff]  ;;  %v3156_v9 = vld [vmem:[#allocation14 + $0x600] sm:$0xff]  ;;  %v3199_v52 = vld [vmem:[#allocation14 + $0x758] sm:$0xff] }
 0x7ee   : > { %5136 = vmatpush1.bf16.msra.mxu1 %v5135_v34  ;;  %5074 = vmatprep.subr.bf16.mxu0 %v5073_v45  ;;  %v5153_v34 = vpack.c.bf16 %v3119_v42, %v3111_v40  ;;  %v3118_v45 = vld [vmem:[#allocation14 + $0x4d0] sm:$0xff]  ;;  %v3173_v42 = vld [vmem:[#allocation14 + $0x688] sm:$0xff] }
 0x7ef   : > { %5138 = vmatprep.subr.bf16.mxu1 %v5137_v33  ;;  %v3135_v33 = vld [vmem:[#allocation14 + $0x558] sm:$0xff]  ;;  %v5155_v31 = vpack.c.bf16 %v3118_v45, %v3110_v44  ;;  %v3166_v40 = vld [vmem:[#allocation14 + $0x650] sm:$0xff]  ;;  %v3180_v45 = vld [vmem:[#allocation14 + $0x6c0] sm:$0xff] }
 0x7f0   : > { %v2977_v26 = vld [vmem:[#allocation14 + $0x68] sm:$0xff] }
 0x7f1   : > { %5076 = vmatpush1.bf16.msra.mxu0 %v5075_v53  ;;  %v5157_v53 = vpack.c.bf16 %v3135_v33, %v3127_v51  ;;  %v3182_v51 = vld [vmem:[#allocation14 + $0x6d0] sm:$0xff]  ;;  %v3189_v33 = vld [vmem:[#allocation14 + $0x708] sm:$0xff] }
 0x7f2   : > { %5140 = vmatpush1.bf16.msra.mxu1 %v5139_v54  ;;  %5078 = vmatprep.subr.bf16.mxu0 %v5077_v57  ;;  %v3126_v54 = vld [vmem:[#allocation14 + $0x510] sm:$0xff] }
 0x7f3   : > { %5142 = vmatprep.subr.bf16.mxu1 %v5141_v49  ;;  %v3134_v57 = vld [vmem:[#allocation14 + $0x550] sm:$0xff] }
 0x7f4   : > { %v5159_v59 = vpack.c.bf16 %v3134_v57, %v3126_v54  ;;  %v5173_v54 = vpack.c.bf16 %v3199_v52, %v3191_v39  ;;  %v3196_v57 = vld [vmem:[#allocation14 + $0x740] sm:$0xff] }
 0x7f5   : > { %5080 = vmatpush1.bf16.msra.mxu0 %v5079_v0  ;;  %v3141_v0 = vld [vmem:[#allocation14 + $0x588] sm:$0xff] }
 0x7f6   : > { %5144 = vmatpush1.bf16.msra.mxu1 %v5143_v14  ;;  %5082 = vmatprep.subr.bf16.mxu0 %v5081_v13  ;;  %v3149_v14 = vld [vmem:[#allocation14 + $0x5c8] sm:$0xff]  ;;  %v3143_v13 = vld [vmem:[#allocation14 + $0x598] sm:$0xff] }
 0x7f7   : > { %5146 = vmatprep.subr.bf16.mxu1 %v5145_v22  ;;  %v5097_v21 = vpack.c.bf16 %v3149_v14, %v3141_v0  ;;  %v3148_v22 = vld [vmem:[#allocation14 + $0x5c0] sm:$0xff]  ;;  %v5161_v27 = vpack.c.bf16 %v3151_v16, %v3143_v13  ;;  %v3215_v14 = vld [vmem:[#allocation14 + $0x7d8] sm:$0xff] }
 0x7f8   : > { %v5099_v1 = vpack.c.bf16 %v3148_v22, %v3140_v18  ;;  %v3204_v13 = vld [vmem:[#allocation14 + $0x780] sm:$0xff]  ;;  %v3206_v18 = vld [vmem:[#allocation14 + $0x790] sm:$0xff] }
 0x7f9   : > { %5084 = vmatpush1.bf16.msra.mxu0 %v5083_v4  ;;  %v3157_v4 = vld [vmem:[#allocation14 + $0x608] sm:$0xff]  ;;  %v3214_v22 = vld [vmem:[#allocation14 + $0x7d0] sm:$0xff] }
 0x7fa   : > { %5148 = vmatpush1.bf16.msra.mxu1 %v5147_v29  ;;  %5086 = vmatprep.subr.bf16.mxu0 %v5085_v24  ;;  %v3165_v29 = vld [vmem:[#allocation14 + $0x648] sm:$0xff]  ;;  %v3159_v24 = vld [vmem:[#allocation14 + $0x618] sm:$0xff] }
 0x7fb   : > { %5150 = vmatprep.subr.bf16.mxu1 %v5149_v19  ;;  %v5101_v20 = vpack.c.bf16 %v3165_v29, %v3157_v4  ;;  %v3164_v19 = vld [vmem:[#allocation14 + $0x640] sm:$0xff]  ;;  %v5165_v35 = vpack.c.bf16 %v3167_v30, %v3159_v24  ;;  %v5181_v4 = vpack.c.bf16 %v2977_v26, %v2969_v15  ;;  %v2979_v29 = vld [vmem:[#allocation14 + $0x78] sm:$0xff] }
 0x7fc   : > { %v5103_v36 = vpack.c.bf16 %v3164_v19, %v3156_v9 }
 0x7fd   : > { %5088 = vmatpush1.bf16.msra.mxu0 %v5087_v43  ;;  %v5167_v43 = vpack.c.bf16 %v3166_v40, %v3158_v41 }
 0x7fe   : > { %5152 = vmatpush1.bf16.msra.mxu1 %v5151_v56  ;;  %5090 = vmatprep.subr.bf16.mxu0 %v5089_v25  ;;  %v3181_v56 = vld [vmem:[#allocation14 + $0x6c8] sm:$0xff]  ;;  %v3175_v25 = vld [vmem:[#allocation14 + $0x698] sm:$0xff] }
 0x7ff   : > { %5154 = vmatprep.subr.bf16.mxu1 %v5153_v34  ;;  %v5105_v62 = vpack.c.bf16 %v3181_v56, %v3173_v42  ;;  %v5169_v44 = vpack.c.bf16 %v3183_v7, %v3175_v25  ;;  %v3172_v34 = vld [vmem:[#allocation14 + $0x680] sm:$0xff]  ;;  %v2900_v56 = vld [vmem:[#allocation8] sm:$0x3]  ;;  %v2901_v25 = vld [vmem:[#allocation10] sm:$0x3] }
 0x800   : > { %v5107_v50 = vpack.c.bf16 %v3180_v45, %v3172_v34  ;;  %v7111_v7 = vrot.slane %v2900_v56, %v6745_v63  ;;  %v7118_v45 = vrot.slane %v2901_v25, %v6745_v63 }
 0x801   : > { %5092 = vmatpush1.bf16.msra.mxu0 %v5091_v17  ;;  %v3197_v17 = vld [vmem:[#allocation14 + $0x748] sm:$0xff] }
 0x802   : > { %5156 = vmatpush1.bf16.msra.mxu1 %v5155_v31  ;;  %5094 = vmatprep.subr.bf16.mxu0 %v5093_v37  ;;  %v5171_v31 = vpack.c.bf16 %v3182_v51, %v3174_v46  ;;  %v5109_v37 = vpack.c.bf16 %v3197_v17, %v3189_v33  ;;  %v2968_v51 = vld [vmem:[#allocation14 + $0x20] sm:$0xff]  ;;  %v2970_v17 = vld [vmem:[#allocation14 + $0x30] sm:$0xff] }
 0x803   : > { %5158 = vmatprep.subr.bf16.mxu1 %v5157_v53  ;;  %v3188_v53 = vld [vmem:[#allocation14 + $0x700] sm:$0xff] }
 0x804   : > { %v2976_v33 = vld [vmem:[#allocation14 + $0x60] sm:$0xff] }
 0x805   : > { %5096 = vmatpush1.bf16.msra.mxu0 %v5095_v58  ;;  %v3190_v58 = vld [vmem:[#allocation14 + $0x710] sm:$0xff] }
 0x806   : > { %5160 = vmatpush1.bf16.msra.mxu1 %v5159_v59  ;;  %5098 = vmatprep.subr.bf16.mxu0 %v5097_v21  ;;  %v3198_v59 = vld [vmem:[#allocation14 + $0x750] sm:$0xff]  ;;  %v3212_v21 = vld [vmem:[#allocation14 + $0x7c0] sm:$0xff] }
 0x807   : > { %5162 = vmatprep.subr.bf16.mxu1 %v5161_v27  ;;  %v5115_v27 = vpack.c.bf16 %v3212_v21, %v3204_v13  ;;  %v3009_v13 = vld [vmem:[#allocation14 + $0x168] sm:$0xff]  ;;  %v3003_v21 = vld [vmem:[#allocation14 + $0x138] sm:$0xff] }
 0x809   : > { %5100 = vmatpush1.bf16.msra.mxu0 %v5099_v1  ;;  %v5179_v1 = vpack.c.bf16 %v3214_v22, %v3206_v18 }
 0x80a   : > { %5164 = vmatpush1.bf16.msra.mxu1 %v5163_v55  ;;  %5102 = vmatprep.subr.bf16.mxu0 %v5101_v20  ;;  %v2971_v55 = vld [vmem:[#allocation14 + $0x38] sm:$0xff] }
 0x80b   : > { %5166 = vmatprep.subr.bf16.mxu1 %v5165_v35  ;;  %v5245_v24 = vpack.c.bf16 %v2979_v29, %v2971_v55  ;;  %v3002_v55 = vld [vmem:[#allocation14 + $0x130] sm:$0xff]  ;;  %v3017_v29 = vld [vmem:[#allocation14 + $0x1a8] sm:$0xff] }
 0x80d   : > { %5104 = vmatpush1.bf16.msra.mxu0 %v5103_v36 }
 0x80e   : > { %5168 = vmatpush1.bf16.msra.mxu1 %v5167_v43  ;;  %5106 = vmatprep.subr.bf16.mxu0 %v5105_v62  ;;  %v7114_v62 = vrot.slane %v2900_v56, %v6748_v3  ;;  %v3018_v56 = vld [vmem:[#allocation14 + $0x1b0] sm:$0xff] }
 0x80f   : > { %5170 = vmatprep.subr.bf16.mxu1 %v5169_v44 }
 0x811   : > { %5108 = vmatpush1.bf16.msra.mxu0 %v5107_v50  ;;  %v7122_v50 = vrot.slane %v2901_v25, %v6748_v3  ;;  %v3026_v25 = vld [vmem:[#allocation14 + $0x1f0] sm:$0xff] }
 0x812   : > { %5172 = vmatpush1.bf16.msra.mxu1 %v5171_v31  ;;  %5110 = vmatprep.subr.bf16.mxu0 %v5109_v37  ;;  %v2978_v31 = vld [vmem:[#allocation14 + $0x70] sm:$0xff]  ;;  %v2985_v37 = vld [vmem:[#allocation14 + $0xa8] sm:$0xff] }
 0x813   : > { %5174 = vmatprep.subr.bf16.mxu1 %v5173_v54  ;;  %v2987_v54 = vld [vmem:[#allocation14 + $0xb8] sm:$0xff] }
 0x82b   : > { %v2904_v60 = vpop.xlane.xlu0 %2903 }
 0x82c   : > { %v2908_v49 = vmul.f32 0.00390625, %v2904_v60  ;;  %v5111_v60 = vpack.c.bf16 %v3196_v57, %v3188_v53  ;;  %v2993_v53 = vld [vmem:[#allocation14 + $0xe8] sm:$0xff] }
 0x82e   : > { %v7091_v38 = vsub.f32 %v7075_v28, %v2908_v49  ;;  %v7094_v5 = vsub.f32 %v7078_v2, %v2908_v49  ;;  %v3205_v49 = vld [vmem:[#allocation14 + $0x788] sm:$0xff]  ;;  %5112 = vmatpush1.bf16.msra.mxu0 %v5111_v60  ;;  %v2984_v60 = vld [vmem:[#allocation14 + $0xa0] sm:$0xff] }
 0x830   : > { %v2914_v32 = vmul.f32 %v7091_v38, %v7091_v38  ;;  %v2915_v6 = vmul.f32 %v7094_v5, %v7094_v5 }
 0x832   : > { %v2918_v8 = vadd.f32 %v2915_v6, %v2914_v32  ;;  %v3213_v32 = vld [vmem:[#allocation14 + $0x7c8] sm:$0xff]  ;;  %v3207_v6 = vld [vmem:[#allocation14 + $0x798] sm:$0xff] }
 0x833   : > { %v5113_v0 = vpack.c.bf16 %v3213_v32, %v3205_v49  ;;  %v5177_v16 = vpack.c.bf16 %v3215_v14, %v3207_v6  ;;  %v2992_v49 = vld [vmem:[#allocation14 + $0xe0] sm:$0xff]  ;;  %v5185_v32 = vpack.c.bf16 %v2993_v53, %v2985_v37  ;;  %v3001_v14 = vld [vmem:[#allocation14 + $0x128] sm:$0xff]  ;;  %v3034_v53 = vld [vmem:[#allocation14 + $0x230] sm:$0xff] }
 0x834   : > { %2919 = vadd.xlane.f32.xlu0 %v2918_v8  ;;  %v5175_v8 = vpack.c.bf16 %v3198_v59, %v3190_v58  ;;  %v5183_v58 = vpack.c.bf16 %v2976_v33, %v2968_v51  ;;  %v5247_v59 = vpack.c.bf16 %v2978_v31, %v2970_v17  ;;  %v5187_v18 = vpack.c.bf16 %v2992_v49, %v2984_v60  ;;  %v3043_v51 = vld [vmem:[#allocation14 + $0x278] sm:$0xff]  ;;  %v3032_v31 = vld [vmem:[#allocation14 + $0x220] sm:$0xff] }
 0x835   : > { %5114 = vmatprep.subr.bf16.mxu0 %v5113_v0  ;;  %v2994_v0 = vld [vmem:[#allocation14 + $0xf0] sm:$0xff]  ;;  %v5189_v15 = vpack.c.bf16 %v3009_v13, %v3001_v14  ;;  %v5259_v17 = vpack.c.bf16 %v3026_v25, %v3018_v56  ;;  %v3040_v37 = vld [vmem:[#allocation14 + $0x260] sm:$0xff]  ;;  %v3059_v60 = vld [vmem:[#allocation14 + $0x2f8] sm:$0xff] }
 0x836   : > { %5176 = vmatpush1.bf16.msra.mxu1 %v5175_v8  ;;  %5116 = vmatpush1.bf16.msra.mxu0 %v5115_v27  ;;  %v2986_v8 = vld [vmem:[#allocation14 + $0xb0] sm:$0xff]  ;;  %v3000_v27 = vld [vmem:[#allocation14 + $0x120] sm:$0xff]  ;;  %v5199_v49 = vpack.c.bf16 %v3040_v37, %v3032_v31  ;;  %v3107_v31 = vld [vmem:[#allocation14 + $0x478] sm:$0xff] }
 0x837   : > { %5178 = vmatprep.subr.bf16.mxu1 %v5177_v16  ;;  %5182 = vmatprep.subr.bf16.mxu0 %v5181_v4  ;;  %v3011_v16 = vld [vmem:[#allocation14 + $0x178] sm:$0xff]  ;;  %v5251_v22 = vpack.c.bf16 %v2994_v0, %v2986_v8  ;;  %v3010_v4 = vld [vmem:[#allocation14 + $0x170] sm:$0xff]  ;;  %v3056_v8 = vld [vmem:[#allocation14 + $0x2e0] sm:$0xff] }
 0x838   : > { %v5253_v26 = vpack.c.bf16 %v3011_v16, %v3003_v21  ;;  %v3050_v13 = vld [vmem:[#allocation14 + $0x2b0] sm:$0xff]  ;;  %v3065_v16 = vld [vmem:[#allocation14 + $0x328] sm:$0xff]  ;;  %v3088_v56 = vld [vmem:[#allocation14 + $0x3e0] sm:$0xff] }
 0x839   : > { %v3058_v21 = vld [vmem:[#allocation14 + $0x2f0] sm:$0xff] }
 0x83a   : > { %5180 = vmatpush1.bf16.msra.mxu1 %v5179_v1  ;;  %v3008_v1 = vld [vmem:[#allocation14 + $0x160] sm:$0xff] }
 0x83b   : > { %5246 = vmatprep.subr.bf16.mxu1 %v5245_v24  ;;  %v3025_v24 = vld [vmem:[#allocation14 + $0x1e8] sm:$0xff] }
 0x877   : > { %v2907_v20 = vpop.xlane.xlu1 %2906 }
 0x878   : > { %v2909_v30 = vmul.f32 0.00390625, %v2907_v20  ;;  %v3019_v20 = vld [vmem:[#allocation14 + $0x1b8] sm:$0xff] }
 0x87a   : > { %v7101_v9 = vsub.f32 %v7083_v23, %v2909_v30  ;;  %v7104_v19 = vsub.f32 %v7086_v12, %v2909_v30  ;;  %v3027_v30 = vld [vmem:[#allocation14 + $0x1f8] sm:$0xff] }
 0x87c   : > { %v2916_v35 = vmul.f32 %v7101_v9, %v7101_v9  ;;  %v2917_v36 = vmul.f32 %v7104_v19, %v7104_v19 }
 0x87e   : > { %v2921_v41 = vadd.f32 %v2917_v36, %v2916_v35  ;;  %v5191_v35 = vpack.c.bf16 %v3008_v1, %v3000_v27  ;;  %v5255_v36 = vpack.c.bf16 %v3010_v4, %v3002_v55  ;;  %v3075_v27 = vld [vmem:[#allocation14 + $0x378] sm:$0xff]  ;;  %v3072_v55 = vld [vmem:[#allocation14 + $0x360] sm:$0xff] }
 0x880   : > { %2922 = vadd.xlane.f32.xlu0 %v2921_v41  ;;  %v3016_v41 = vld [vmem:[#allocation14 + $0x1a0] sm:$0xff] }
 0x8c1   : > { %v2920_v40 = vpop.xlane.xlu0 %2919 }
 0x8c2   : > { %v2924_v42 = vmul.f32 0.00390625, %v2920_v40  ;;  %v3024_v40 = vld [vmem:[#allocation14 + $0x1e0] sm:$0xff] }
 0x8c3   : > { %v5195_v33 = vpack.c.bf16 %v3024_v40, %v3016_v41  ;;  %v3091_v41 = vld [vmem:[#allocation14 + $0x3f8] sm:$0xff] }
 0x8c4   : > { %v2926_v43 = vadd.f32 1e-05, %v2924_v42  ;;  %v5193_v42 = vpack.c.bf16 %v3025_v24, %v3017_v29  ;;  %v3066_v24 = vld [vmem:[#allocation14 + $0x330] sm:$0xff] }
 0x8c6   : > { %5877 = vrsqrt.f32 %v2926_v43  ;;  %v5257_v43 = vpack.c.bf16 %v3027_v30, %v3019_v20  ;;  %v3074_v20 = vld [vmem:[#allocation14 + $0x370] sm:$0xff]  ;;  %v3081_v30 = vld [vmem:[#allocation14 + $0x3a8] sm:$0xff] }
 0x8d0   : > { %v5878_v44 = vpop.eup %5877 }
 0x8d1   : > { %v2931_v34 = vmul.f32 %v5878_v44, %v7094_v5  ;;  %v2930_v46 = vmul.f32 %v5878_v44, %v7091_v38  ;;  %v2995_v5 = vld [vmem:[#allocation14 + $0xf8] sm:$0xff]  ;;  %v3033_v44 = vld [vmem:[#allocation14 + $0x228] sm:$0xff] }
 0x8d2   : > { %v5249_v6 = vpack.c.bf16 %v2995_v5, %v2987_v54  ;;  %v3042_v54 = vld [vmem:[#allocation14 + $0x270] sm:$0xff]  ;;  %v3049_v5 = vld [vmem:[#allocation14 + $0x2a8] sm:$0xff] }
 0x8d3   : > { %v2946_v39 = vmul.f32 %v7111_v7, %v2931_v34  ;;  %v2945_v52 = vmul.f32 %v7114_v62, %v2930_v46  ;;  %v3041_v34 = vld [vmem:[#allocation14 + $0x268] sm:$0xff]  ;;  %v3035_v46 = vld [vmem:[#allocation14 + $0x238] sm:$0xff] }
 0x8d5   : > { %v7127_v57 = vadd.f32 %v7118_v45, %v2946_v39  ;;  %v7130_v38 = vadd.f32 %v7122_v50, %v2945_v52  ;;  %v5197_v39 = vpack.c.bf16 %v3041_v34, %v3033_v44  ;;  %v5261_v52 = vpack.c.bf16 %v3043_v51, %v3035_v46  ;;  %v3082_v34 = vld [vmem:[#allocation14 + $0x3b0] sm:$0xff]  ;;  %v3097_v51 = vld [vmem:[#allocation14 + $0x428] sm:$0xff] }
 0x8d6   : > { %v3090_v46 = vld [vmem:[#allocation14 + $0x3f0] sm:$0xff] }
 0x8d7   : > { %3326 = vmatprep.mubr.f32.mxu0 %v7127_v57  ;;  %3403 = vmatprep.mubr.f32.mxu1 %v7127_v57 }
 0x8d8   : > { %3327 = vmatmul.mubr.f32.vlgmr.msra.gmra.mrb[16].mxu0 %v7130_v38  ;;  %3404 = vmatmul.mubr.f32.vlgmr.msra.gmra.mrb[32].mxu1 %v7130_v38 }
 0x8d9   : > { %5184 = vmatpush1.bf16.msra.mxu0 %v5183_v58  ;;  %5248 = vmatpush1.bf16.msra.mxu1 %v5247_v59  ;;  %v3057_v58 = vld [vmem:[#allocation14 + $0x2e8] sm:$0xff]  ;;  %v3051_v59 = vld [vmem:[#allocation14 + $0x2b8] sm:$0xff] }
 0x8da   : > { %5186 = vmatprep.subr.bf16.mxu0 %v5185_v32  ;;  %5250 = vmatprep.subr.bf16.mxu1 %v5249_v6  ;;  %v5263_v32 = vpack.c.bf16 %v3042_v54, %v3034_v53  ;;  %v3048_v6 = vld [vmem:[#allocation14 + $0x2a0] sm:$0xff]  ;;  %v5201_v0 = vpack.c.bf16 %v3057_v58, %v3049_v5  ;;  %v5265_v14 = vpack.c.bf16 %v3059_v60, %v3051_v59  ;;  %v3098_v58 = vld [vmem:[#allocation14 + $0x430] sm:$0xff]  ;;  %v3113_v60 = vld [vmem:[#allocation14 + $0x4a8] sm:$0xff] }
 0x8db   : > { %v5203_v1 = vpack.c.bf16 %v3056_v8, %v3048_v6  ;;  %v3104_v53 = vld [vmem:[#allocation14 + $0x460] sm:$0xff]  ;;  %v3106_v59 = vld [vmem:[#allocation14 + $0x470] sm:$0xff]  ;;  %v3123_v6 = vld [vmem:[#allocation14 + $0x4f8] sm:$0xff] }
 0x8dd   : > { %5188 = vmatpush1.bf16.msra.mxu0 %v5187_v18  ;;  %5252 = vmatpush1.bf16.msra.mxu1 %v5251_v22  ;;  %v3073_v18 = vld [vmem:[#allocation14 + $0x368] sm:$0xff]  ;;  %v3067_v22 = vld [vmem:[#allocation14 + $0x338] sm:$0xff] }
 0x8de   : > { %5190 = vmatprep.subr.bf16.mxu0 %v5189_v15  ;;  %5254 = vmatprep.subr.bf16.mxu1 %v5253_v26  ;;  %v5267_v15 = vpack.c.bf16 %v3058_v21, %v3050_v13  ;;  %v3064_v26 = vld [vmem:[#allocation14 + $0x320] sm:$0xff]  ;;  %v5205_v4 = vpack.c.bf16 %v3073_v18, %v3065_v16  ;;  %v5269_v29 = vpack.c.bf16 %v3075_v27, %v3067_v22  ;;  %v3114_v18 = vld [vmem:[#allocation14 + $0x4b0] sm:$0xff]  ;;  %v3129_v27 = vld [vmem:[#allocation14 + $0x528] sm:$0xff] }
 0x8df   : > { %v5207_v40 = vpack.c.bf16 %v3072_v55, %v3064_v26  ;;  %v3120_v13 = vld [vmem:[#allocation14 + $0x4e0] sm:$0xff]  ;;  %v3122_v22 = vld [vmem:[#allocation14 + $0x4f0] sm:$0xff]  ;;  %v3139_v26 = vld [vmem:[#allocation14 + $0x578] sm:$0xff] }
 0x8e1   : > { %5192 = vmatpush1.bf16.msra.mxu0 %v5191_v35  ;;  %5256 = vmatpush1.bf16.msra.mxu1 %v5255_v36  ;;  %v3089_v35 = vld [vmem:[#allocation14 + $0x3e8] sm:$0xff]  ;;  %v3083_v36 = vld [vmem:[#allocation14 + $0x3b8] sm:$0xff] }
 0x8e2   : > { %5194 = vmatprep.subr.bf16.mxu0 %v5193_v42  ;;  %5258 = vmatprep.subr.bf16.mxu1 %v5257_v43  ;;  %v5271_v42 = vpack.c.bf16 %v3074_v20, %v3066_v24  ;;  %v3080_v43 = vld [vmem:[#allocation14 + $0x3a0] sm:$0xff]  ;;  %v5209_v25 = vpack.c.bf16 %v3089_v35, %v3081_v30  ;;  %v5273_v44 = vpack.c.bf16 %v3091_v41, %v3083_v36  ;;  %v3130_v35 = vld [vmem:[#allocation14 + $0x530] sm:$0xff]  ;;  %v3145_v41 = vld [vmem:[#allocation14 + $0x5a8] sm:$0xff] }
 0x8e3   : > { %v5211_v37 = vpack.c.bf16 %v3088_v56, %v3080_v43  ;;  %v3136_v24 = vld [vmem:[#allocation14 + $0x560] sm:$0xff]  ;;  %v3138_v36 = vld [vmem:[#allocation14 + $0x570] sm:$0xff]  ;;  %v3155_v43 = vld [vmem:[#allocation14 + $0x5f8] sm:$0xff] }
 0x8e5   : > { %5196 = vmatpush1.bf16.msra.mxu0 %v5195_v33  ;;  %5260 = vmatpush1.bf16.msra.mxu1 %v5259_v17  ;;  %v3105_v33 = vld [vmem:[#allocation14 + $0x468] sm:$0xff]  ;;  %v3099_v17 = vld [vmem:[#allocation14 + $0x438] sm:$0xff] }
 0x8e6   : > { %5198 = vmatprep.subr.bf16.mxu0 %v5197_v39  ;;  %5262 = vmatprep.subr.bf16.mxu1 %v5261_v52  ;;  %v5275_v39 = vpack.c.bf16 %v3090_v46, %v3082_v34  ;;  %v3096_v52 = vld [vmem:[#allocation14 + $0x420] sm:$0xff]  ;;  %v5213_v54 = vpack.c.bf16 %v3105_v33, %v3097_v51  ;;  %v5277_v5 = vpack.c.bf16 %v3107_v31, %v3099_v17  ;;  %v3146_v33 = vld [vmem:[#allocation14 + $0x5b0] sm:$0xff]  ;;  %v3161_v31 = vld [vmem:[#allocation14 + $0x628] sm:$0xff] }
 0x8e7   : > { %v5215_v8 = vpack.c.bf16 %v3104_v53, %v3096_v52  ;;  %v3152_v34 = vld [vmem:[#allocation14 + $0x5e0] sm:$0xff]  ;;  %v3154_v17 = vld [vmem:[#allocation14 + $0x5f0] sm:$0xff]  ;;  %v3171_v52 = vld [vmem:[#allocation14 + $0x678] sm:$0xff] }
 0x8e9   : > { %5200 = vmatpush1.bf16.msra.mxu0 %v5199_v49  ;;  %5264 = vmatpush1.bf16.msra.mxu1 %v5263_v32  ;;  %v3121_v49 = vld [vmem:[#allocation14 + $0x4e8] sm:$0xff]  ;;  %v3115_v32 = vld [vmem:[#allocation14 + $0x4b8] sm:$0xff] }
 0x8ea   : > { %5202 = vmatprep.subr.bf16.mxu0 %v5201_v0  ;;  %5266 = vmatprep.subr.bf16.mxu1 %v5265_v14  ;;  %v5279_v0 = vpack.c.bf16 %v3106_v59, %v3098_v58  ;;  %v3112_v14 = vld [vmem:[#allocation14 + $0x4a0] sm:$0xff]  ;;  %v5217_v21 = vpack.c.bf16 %v3121_v49, %v3113_v60  ;;  %v5281_v16 = vpack.c.bf16 %v3123_v6, %v3115_v32  ;;  %v3162_v49 = vld [vmem:[#allocation14 + $0x630] sm:$0xff]  ;;  %v3177_v6 = vld [vmem:[#allocation14 + $0x6a8] sm:$0xff] }
 0x8eb   : > { %v5219_v55 = vpack.c.bf16 %v3120_v13, %v3112_v14  ;;  %v3168_v58 = vld [vmem:[#allocation14 + $0x660] sm:$0xff]  ;;  %v3170_v32 = vld [vmem:[#allocation14 + $0x670] sm:$0xff]  ;;  %v3187_v14 = vld [vmem:[#allocation14 + $0x6f8] sm:$0xff] }
 0x8ed   : > { %5204 = vmatpush1.bf16.msra.mxu0 %v5203_v1  ;;  %5268 = vmatpush1.bf16.msra.mxu1 %v5267_v15  ;;  %v3137_v1 = vld [vmem:[#allocation14 + $0x568] sm:$0xff]  ;;  %v3131_v15 = vld [vmem:[#allocation14 + $0x538] sm:$0xff] }
 0x8ee   : > { %5206 = vmatprep.subr.bf16.mxu0 %v5205_v4  ;;  %5270 = vmatprep.subr.bf16.mxu1 %v5269_v29  ;;  %v5283_v4 = vpack.c.bf16 %v3122_v22, %v3114_v18  ;;  %v3128_v29 = vld [vmem:[#allocation14 + $0x520] sm:$0xff]  ;;  %v5221_v20 = vpack.c.bf16 %v3137_v1, %v3129_v27  ;;  %v5285_v30 = vpack.c.bf16 %v3139_v26, %v3131_v15  ;;  %v3178_v1 = vld [vmem:[#allocation14 + $0x6b0] sm:$0xff]  ;;  %v3193_v26 = vld [vmem:[#allocation14 + $0x728] sm:$0xff] }
 0x8ef   : > { %v5223_v56 = vpack.c.bf16 %v3136_v24, %v3128_v29  ;;  %v3184_v18 = vld [vmem:[#allocation14 + $0x6e0] sm:$0xff]  ;;  %v3186_v15 = vld [vmem:[#allocation14 + $0x6f0] sm:$0xff]  ;;  %v3203_v29 = vld [vmem:[#allocation14 + $0x778] sm:$0xff] }
 0x8f1   : > { %5208 = vmatpush1.bf16.msra.mxu0 %v5207_v40  ;;  %5272 = vmatpush1.bf16.msra.mxu1 %v5271_v42  ;;  %v3153_v40 = vld [vmem:[#allocation14 + $0x5e8] sm:$0xff]  ;;  %v3147_v42 = vld [vmem:[#allocation14 + $0x5b8] sm:$0xff] }
 0x8f2   : > { %5210 = vmatprep.subr.bf16.mxu0 %v5209_v25  ;;  %5274 = vmatprep.subr.bf16.mxu1 %v5273_v44  ;;  %v5287_v25 = vpack.c.bf16 %v3138_v36, %v3130_v35  ;;  %v3144_v44 = vld [vmem:[#allocation14 + $0x5a0] sm:$0xff]  ;;  %v5225_v46 = vpack.c.bf16 %v3153_v40, %v3145_v41  ;;  %v5289_v51 = vpack.c.bf16 %v3155_v43, %v3147_v42  ;;  %v3194_v40 = vld [vmem:[#allocation14 + $0x730] sm:$0xff]  ;;  %v3209_v43 = vld [vmem:[#allocation14 + $0x7a8] sm:$0xff] }
 0x8f3   : > { %v5227_v53 = vpack.c.bf16 %v3152_v34, %v3144_v44  ;;  %v3200_v35 = vld [vmem:[#allocation14 + $0x760] sm:$0xff]  ;;  %v3202_v42 = vld [vmem:[#allocation14 + $0x770] sm:$0xff]  ;;  %v3219_v44 = vld [vmem:[#allocation14 + $0x7f8] sm:$0xff] }
 0x8f5   : > { %5212 = vmatpush1.bf16.msra.mxu0 %v5211_v37  ;;  %5276 = vmatpush1.bf16.msra.mxu1 %v5275_v39  ;;  %v3169_v37 = vld [vmem:[#allocation14 + $0x668] sm:$0xff]  ;;  %v3163_v39 = vld [vmem:[#allocation14 + $0x638] sm:$0xff] }
 0x8f6   : > { %5214 = vmatprep.subr.bf16.mxu0 %v5213_v54  ;;  %5278 = vmatprep.subr.bf16.mxu1 %v5277_v5  ;;  %v5291_v54 = vpack.c.bf16 %v3154_v17, %v3146_v33  ;;  %v3160_v5 = vld [vmem:[#allocation14 + $0x620] sm:$0xff]  ;;  %v5229_v59 = vpack.c.bf16 %v3169_v37, %v3161_v31  ;;  %v5293_v60 = vpack.c.bf16 %v3171_v52, %v3163_v39  ;;  %v3210_v52 = vld [vmem:[#allocation14 + $0x7b0] sm:$0xff] }
 0x8f7   : > { %v5231_v13 = vpack.c.bf16 %v3168_v58, %v3160_v5  ;;  %v3208_v33 = vld [vmem:[#allocation14 + $0x7a0] sm:$0xff]  ;;  %v3701_v5 = vld [vmem:[#allocation16 + $0x18] sm:$0xff] }
 0x8f8   : > { %v3216_v39 = vld [vmem:[#allocation14 + $0x7e0] sm:$0xff] }
 0x8f9   : > { %5216 = vmatpush1.bf16.msra.mxu0 %v5215_v8  ;;  %5280 = vmatpush1.bf16.msra.mxu1 %v5279_v0  ;;  %v3185_v8 = vld [vmem:[#allocation14 + $0x6e8] sm:$0xff]  ;;  %v3179_v0 = vld [vmem:[#allocation14 + $0x6b8] sm:$0xff] }
 0x8fa   : > { %5218 = vmatprep.subr.bf16.mxu0 %v5217_v21  ;;  %5282 = vmatprep.subr.bf16.mxu1 %v5281_v16  ;;  %v5295_v21 = vpack.c.bf16 %v3170_v32, %v3162_v49  ;;  %v3176_v16 = vld [vmem:[#allocation14 + $0x6a0] sm:$0xff]  ;;  %v5233_v22 = vpack.c.bf16 %v3185_v8, %v3177_v6  ;;  %v5297_v27 = vpack.c.bf16 %v3187_v14, %v3179_v0 }
 0x8fb   : > { %v5235_v24 = vpack.c.bf16 %v3184_v18, %v3176_v16  ;;  %v3698_v16 = vld [vmem:[#allocation16] sm:$0xff]  ;;  %v3700_v18 = vld [vmem:[#allocation16 + $0x10] sm:$0xff] }
 0x8fd   : > { %5220 = vmatpush1.bf16.msra.mxu0 %v5219_v55  ;;  %5284 = vmatpush1.bf16.msra.mxu1 %v5283_v4  ;;  %v3201_v55 = vld [vmem:[#allocation14 + $0x768] sm:$0xff]  ;;  %v3195_v4 = vld [vmem:[#allocation14 + $0x738] sm:$0xff] }
 0x8fe   : > { %5222 = vmatprep.subr.bf16.mxu0 %v5221_v20  ;;  %5286 = vmatprep.subr.bf16.mxu1 %v5285_v30  ;;  %v5299_v20 = vpack.c.bf16 %v3186_v15, %v3178_v1  ;;  %v3192_v30 = vld [vmem:[#allocation14 + $0x720] sm:$0xff]  ;;  %v5237_v36 = vpack.c.bf16 %v3201_v55, %v3193_v26  ;;  %v5301_v41 = vpack.c.bf16 %v3203_v29, %v3195_v4  ;;  %v3708_v55 = vld [vmem:[#allocation16 + $0x50] sm:$0xff]  ;;  %v3713_v4 = vld [vmem:[#allocation16 + $0x78] sm:$0xff] }
 0x8ff   : > { %v3706_v26 = vld [vmem:[#allocation16 + $0x40] sm:$0xff] }
 0x900   : > { %v5319_v29 = vpack.c.bf16 %v3708_v55, %v3706_v26  ;;  %v3742_v55 = vld [vmem:[#allocation16 + $0x160] sm:$0xff] }
 0x901   : > { %5224 = vmatpush1.bf16.msra.mxu0 %v5223_v56  ;;  %5288 = vmatpush1.bf16.msra.mxu1 %v5287_v25  ;;  %v3217_v56 = vld [vmem:[#allocation14 + $0x7e8] sm:$0xff]  ;;  %v3211_v25 = vld [vmem:[#allocation14 + $0x7b8] sm:$0xff] }
 0x902   : > { %5226 = vmatprep.subr.bf16.mxu0 %v5225_v46  ;;  %5290 = vmatprep.subr.bf16.mxu1 %v5289_v51  ;;  %v5239_v46 = vpack.c.bf16 %v3200_v35, %v3192_v30  ;;  %v5303_v51 = vpack.c.bf16 %v3202_v42, %v3194_v40  ;;  %v5241_v31 = vpack.c.bf16 %v3217_v56, %v3209_v43  ;;  %v3715_v30 = vld [vmem:[#allocation16 + $0x88] sm:$0xff]  ;;  %v3717_v35 = vld [vmem:[#allocation16 + $0x98] sm:$0xff]  ;;  %v3714_v40 = vld [vmem:[#allocation16 + $0x80] sm:$0xff] }
 0x903   : > { %v5305_v37 = vpack.c.bf16 %v3219_v44, %v3211_v25  ;;  %v3716_v42 = vld [vmem:[#allocation16 + $0x90] sm:$0xff]  ;;  %v3719_v43 = vld [vmem:[#allocation16 + $0xa8] sm:$0xff]  ;;  %v3721_v56 = vld [vmem:[#allocation16 + $0xb8] sm:$0xff] }
 0x904   : > { %v5327_v25 = vpack.c.bf16 %v3716_v42, %v3714_v40  ;;  %v5329_v44 = vpack.c.bf16 %v3721_v56, %v3719_v43  ;;  %v3750_v42 = vld [vmem:[#allocation16 + $0x1a0] sm:$0xff]  ;;  %v3752_v43 = vld [vmem:[#allocation16 + $0x1b0] sm:$0xff]  ;;  %v3755_v56 = vld [vmem:[#allocation16 + $0x1c8] sm:$0xff] }
 0x905   : > { %5228 = vmatpush1.bf16.msra.mxu0 %v5227_v53  ;;  %5292 = vmatpush1.bf16.msra.mxu1 %v5291_v54  ;;  %v3218_v53 = vld [vmem:[#allocation14 + $0x7f0] sm:$0xff]  ;;  %v3699_v54 = vld [vmem:[#allocation16 + $0x8] sm:$0xff] }
 0x906   : > { %5230 = vmatprep.subr.bf16.mxu0 %v5229_v59  ;;  %5294 = vmatprep.subr.bf16.mxu1 %v5293_v60  ;;  %v5243_v59 = vpack.c.bf16 %v3216_v39, %v3208_v33  ;;  %v5307_v60 = vpack.c.bf16 %v3218_v53, %v3210_v52  ;;  %v5309_v49 = vpack.c.bf16 %v3701_v5, %v3699_v54  ;;  %v3725_v33 = vld [vmem:[#allocation16 + $0xd8] sm:$0xff]  ;;  %v3724_v39 = vld [vmem:[#allocation16 + $0xd0] sm:$0xff]  ;;  %v3727_v52 = vld [vmem:[#allocation16 + $0xe8] sm:$0xff] }
 0x907   : > { %v3729_v53 = vld [vmem:[#allocation16 + $0xf8] sm:$0xff] }
 0x908   : > { %v5337_v5 = vpack.c.bf16 %v3729_v53, %v3727_v52  ;;  %v3760_v52 = vld [vmem:[#allocation16 + $0x1f0] sm:$0xff]  ;;  %v3763_v53 = vld [vmem:[#allocation16 + $0x208] sm:$0xff] }
 0x909   : > { %5232 = vmatpush1.bf16.msra.mxu0 %v5231_v13  ;;  %5296 = vmatpush1.bf16.msra.mxu1 %v5295_v21 }
 0x90a   : > { %5234 = vmatprep.subr.bf16.mxu0 %v5233_v22  ;;  %5298 = vmatprep.subr.bf16.mxu1 %v5297_v27  ;;  %v3703_v22 = vld [vmem:[#allocation16 + $0x28] sm:$0xff]  ;;  %v3705_v27 = vld [vmem:[#allocation16 + $0x38] sm:$0xff] }
 0x90d   : > { %v2923_v34 = vpop.xlane.xlu0 %2922  ;;  %5236 = vmatpush1.bf16.msra.mxu0 %v5235_v24  ;;  %5300 = vmatpush1.bf16.msra.mxu1 %v5299_v20  ;;  %v3710_v20 = vld [vmem:[#allocation16 + $0x60] sm:$0xff] }
 0x90e   : > { %v2925_v17 = vmul.f32 0.00390625, %v2923_v34  ;;  %5238 = vmatprep.subr.bf16.mxu0 %v5237_v36  ;;  %5302 = vmatprep.subr.bf16.mxu1 %v5301_v41  ;;  %v5325_v41 = vpack.c.bf16 %v3717_v35, %v3715_v30  ;;  %v3718_v34 = vld [vmem:[#allocation16 + $0xa0] sm:$0xff]  ;;  %v3748_v30 = vld [vmem:[#allocation16 + $0x190] sm:$0xff]  ;;  %v3751_v35 = vld [vmem:[#allocation16 + $0x1a8] sm:$0xff] }
 0x910   : > { %v2927_v58 = vadd.f32 1e-05, %v2925_v17 }
 0x911   : > { %5240 = vmatpush1.bf16.msra.mxu0 %v5239_v46  ;;  %5304 = vmatpush1.bf16.msra.mxu1 %v5303_v51  ;;  %v3720_v46 = vld [vmem:[#allocation16 + $0xb0] sm:$0xff]  ;;  %v3723_v51 = vld [vmem:[#allocation16 + $0xc8] sm:$0xff] }
 0x912   : > { %5879 = vrsqrt.f32 %v2927_v58  ;;  %5242 = vmatprep.subr.bf16.mxu0 %v5241_v31  ;;  %5306 = vmatprep.subr.bf16.mxu1 %v5305_v37  ;;  %v5331_v17 = vpack.c.bf16 %v3720_v46, %v3718_v34  ;;  %v5333_v31 = vpack.c.bf16 %v3725_v33, %v3723_v51  ;;  %v3722_v37 = vld [vmem:[#allocation16 + $0xc0] sm:$0xff]  ;;  %v3756_v51 = vld [vmem:[#allocation16 + $0x1d0] sm:$0xff]  ;;  %v3759_v33 = vld [vmem:[#allocation16 + $0x1e8] sm:$0xff] }
 0x913   : > { %v5335_v54 = vpack.c.bf16 %v3724_v39, %v3722_v37  ;;  %v3726_v58 = vld [vmem:[#allocation16 + $0xe0] sm:$0xff] }
 0x914   : > { %v3754_v46 = vld [vmem:[#allocation16 + $0x1c0] sm:$0xff] }
 0x915   : > { %5244 = vmatpush1.bf16.msra.mxu0 %v5243_v59  ;;  %5308 = vmatpush1.bf16.msra.mxu1 %v5307_v60  ;;  %v3728_v59 = vld [vmem:[#allocation16 + $0xf0] sm:$0xff]  ;;  %v3731_v60 = vld [vmem:[#allocation16 + $0x108] sm:$0xff]  ;;  %v3758_v39 = vld [vmem:[#allocation16 + $0x1e0] sm:$0xff] }
 0x916   : > { %5310 = vmatprep.subr.bf16.mxu0 %v5309_v49  ;;  %v3733_v49 = vld [vmem:[#allocation16 + $0x118] sm:$0xff] }
 0x91c   : > { %v5880_v32 = vpop.eup %5879 }
 0x91d   : > { %v2933_v6 = vmul.f32 %v5880_v32, %v7104_v19  ;;  %v2932_v8 = vmul.f32 %v5880_v32, %v7101_v9  ;;  %v5311_v9 = vpack.c.bf16 %v3700_v18, %v3698_v16  ;;  %v5313_v19 = vpack.c.bf16 %v3705_v27, %v3703_v22  ;;  %v3734_v18 = vld [vmem:[#allocation16 + $0x120] sm:$0xff]  ;;  %v3736_v22 = vld [vmem:[#allocation16 + $0x130] sm:$0xff]  ;;  %v3739_v27 = vld [vmem:[#allocation16 + $0x148] sm:$0xff] }
 0x91e   : > { %v5339_v32 = vpack.c.bf16 %v3728_v59, %v3726_v58  ;;  %v7149_v59 = vld [vmem:[%s7380_s23] sm:$0xff]  ;;  %s6305_s23 = smov [#allocation17]  }
 0x91f   : > { %v2948_v0 = vmul.f32 %v7111_v7, %v2933_v6  ;;  %v2947_v14 = vmul.f32 %v7114_v62, %v2932_v8  ;;  %v3702_v7 = vld [vmem:[#allocation16 + $0x20] sm:$0xff]  ;;  %v3704_v62 = vld [vmem:[#allocation16 + $0x30] sm:$0xff]  ;;  %v5341_v6 = vpack.c.bf16 %v3733_v49, %v3731_v60  ;;  %v7153_v60 = vrot.slane %v7149_v59, %v6748_v3  ;;  %s6207_s19 = sshll.u32 %s6305_s23, 4  ;;  %s6208_s19 = int_to_ptr.vmem [resolvable:$false] %s6207_s19 }
 0x920   : > { %v5315_v1 = vpack.c.bf16 %v3704_v62, %v3702_v7  ;;  %v3730_v8 = vld [vmem:[#allocation16 + $0x100] sm:$0xff]  ;;  %v7157_v49 = vrot.slane %v7149_v59, %v6745_v63  ;;  %s6209_s15 = scalar_lea.vmem %s6208_s19, 1024  ;;  %p6210_p3 = scmp.lt.s32.totalorder %s7280_s30, %s6208_s19 }
 0x921   : > { %v2963_v13 = vadd.f32 %v7118_v45, %v2948_v0  ;;  %v2962_v21 = vadd.f32 %v7122_v50, %v2947_v14  ;;  %v3707_v45 = vld [vmem:[#allocation16 + $0x48] sm:$0xff]  ;;  %v3709_v50 = vld [vmem:[#allocation16 + $0x58] sm:$0xff]  ;;  %v3732_v0 = vld [vmem:[#allocation16 + $0x110] sm:$0xff]  ;;  %p6211_p8 = scmp.lt.s32.totalorder %s6209_s15, %s6203_s29 }
 0x922   : > { %v5317_v15 = vpack.c.bf16 %v3709_v50, %v3707_v45  ;;  %v3735_v14 = vld [vmem:[#allocation16 + $0x128] sm:$0xff]  ;;  %v3738_v62 = vld [vmem:[#allocation16 + $0x140] sm:$0xff]  ;;  %v3740_v45 = vld [vmem:[#allocation16 + $0x150] sm:$0xff] }
 0x923   : > { %3332 = vmatprep.mubr.f32.mxu0 %v2963_v13  ;;  %3409 = vmatprep.mubr.f32.mxu1 %v2963_v13  ;;  %v3743_v50 = vld [vmem:[#allocation16 + $0x168] sm:$0xff]  ;;  %p6212_p13 = por %p6211_p8, %p6210_p3 }
 0x924   : > { %3333 = vmatmul.mubr.f32.gmra.mrb[18].mxu0 %v2962_v21  ;;  %3410 = vmatmul.mubr.f32.gmra.mrb[34].mxu1 %v2962_v21 }
 0x925   : > { %3480 = vmatprep.mubr.f32.mxu0 %v7127_v57  ;;  %3557 = vmatprep.mubr.f32.mxu1 %v7127_v57  ;;  %v3711_v57 = vld [vmem:[#allocation16 + $0x68] sm:$0xff]  ;;  %p6213_p0 = pnand %p6212_p13, %p6206_p1 }
 0x926   : > { %v5321_v24 = vpack.c.bf16 %v3713_v4, %v3711_v57  ;;  %v3744_v57 = vld [vmem:[#allocation16 + $0x170] sm:$0xff]  ;;  %v3747_v4 = vld [vmem:[#allocation16 + $0x188] sm:$0xff] }
 0x928   : > { %3481 = vmatmul.mubr.f32.vlgmr.msra.gmra.mrb[20].mxu0 %v7130_v38  ;;  %3558 = vmatmul.mubr.f32.vlgmr.msra.gmra.mrb[36].mxu1 %v7130_v38  ;;  %v3712_v38 = vld [vmem:[#allocation16 + $0x70] sm:$0xff] }
 0x929   : > { %3486 = vmatprep.mubr.f32.mxu0 %v2963_v13  ;;  %3563 = vmatprep.mubr.f32.mxu1 %v2963_v13  ;;  %v5323_v36 = vpack.c.bf16 %v3712_v38, %v3710_v20  ;;  %v3737_v13 = vld [vmem:[#allocation16 + $0x138] sm:$0xff]  ;;  %v3746_v38 = vld [vmem:[#allocation16 + $0x180] sm:$0xff] }
 0x92a   : > { %5312 = vmatpush1.bf16.msra.mxu0 %v5311_v9  ;;  %v5345_v16 = vpack.c.bf16 %v3737_v13, %v3735_v14  ;;  %v3741_v9 = vld [vmem:[#allocation16 + $0x158] sm:$0xff] }
 0x92b   : > { %5314 = vmatprep.subr.bf16.mxu0 %v5313_v19  ;;  %v5347_v19 = vpack.c.bf16 %v3736_v22, %v3734_v18  ;;  %v5349_v7 = vpack.c.bf16 %v3741_v9, %v3739_v27 }
 0x92c   : > { %3487 = vmatmul.mubr.f32.gmra.mrb[22].mxu0 %v2962_v21  ;;  %3564 = vmatmul.mubr.f32.gmra.mrb[38].mxu1 %v2962_v21  ;;  %v5343_v21 = vpack.c.bf16 %v3732_v0, %v3730_v8 }
 0x92e   : > { %5316 = vmatpush1.bf16.msra.mxu0 %v5315_v1  ;;  %v3745_v1 = vld [vmem:[#allocation16 + $0x178] sm:$0xff] }
 0x92f   : > { %5318 = vmatprep.subr.bf16.mxu0 %v5317_v15  ;;  %v5351_v15 = vpack.c.bf16 %v3740_v45, %v3738_v62  ;;  %v5353_v26 = vpack.c.bf16 %v3745_v1, %v3743_v50  ;;  %v3762_v62 = vld [vmem:[#allocation16 + $0x200] sm:$0xff]  ;;  %v3764_v45 = vld [vmem:[#allocation16 + $0x210] sm:$0xff]  ;;  %v3767_v1 = vld [vmem:[#allocation16 + $0x228] sm:$0xff] }
 0x932   : > { %5320 = vmatpush1.bf16.msra.mxu0 %v5319_v29  ;;  %v3749_v29 = vld [vmem:[#allocation16 + $0x198] sm:$0xff] }
 0x933   : > { %5322 = vmatprep.subr.bf16.mxu0 %v5321_v24  ;;  %v5355_v24 = vpack.c.bf16 %v3744_v57, %v3742_v55  ;;  %v5357_v20 = vpack.c.bf16 %v3749_v29, %v3747_v4  ;;  %v5375_v57 = vpack.c.bf16 %v3764_v45, %v3762_v62  ;;  %v3795_v62 = vld [vmem:[#allocation16 + $0x308] sm:$0xff]  ;;  %v3797_v45 = vld [vmem:[#allocation16 + $0x318] sm:$0xff] }
 0x936   : > { %5324 = vmatpush1.bf16.msra.mxu0 %v5323_v36  ;;  %v3753_v36 = vld [vmem:[#allocation16 + $0x1b8] sm:$0xff] }
 0x937   : > { %5326 = vmatprep.subr.bf16.mxu0 %v5325_v41  ;;  %v5359_v41 = vpack.c.bf16 %v3748_v30, %v3746_v38  ;;  %v5361_v40 = vpack.c.bf16 %v3753_v36, %v3751_v35  ;;  %v3771_v38 = vld [vmem:[#allocation16 + $0x248] sm:$0xff]  ;;  %v3773_v30 = vld [vmem:[#allocation16 + $0x258] sm:$0xff] }
 0x938   : > { %v5381_v36 = vpack.c.bf16 %v3773_v30, %v3771_v38  ;;  %v3800_v38 = vld [vmem:[#allocation16 + $0x330] sm:$0xff]  ;;  %v3233_v30 = vrot.slane %v7149_v59, %v840_v47 }
 0x93a   : > { %5328 = vmatpush1.bf16.msra.mxu0 %v5327_v25  ;;  %v3757_v25 = vld [vmem:[#allocation16 + $0x1d8] sm:$0xff] }
 0x93b   : > { %5330 = vmatprep.subr.bf16.mxu0 %v5329_v44  ;;  %v5363_v44 = vpack.c.bf16 %v3752_v43, %v3750_v42  ;;  %v5365_v34 = vpack.c.bf16 %v3757_v25, %v3755_v56  ;;  %v3775_v42 = vld [vmem:[#allocation16 + $0x268] sm:$0xff]  ;;  %v3777_v43 = vld [vmem:[#allocation16 + $0x278] sm:$0xff] }
 0x93c   : > { %v5385_v25 = vpack.c.bf16 %v3777_v43, %v3775_v42  ;;  %v3802_v42 = vld [vmem:[#allocation16 + $0x340] sm:$0xff]  ;;  %v3804_v43 = vld [vmem:[#allocation16 + $0x350] sm:$0xff] }
 0x93d   : > { %v5415_v47 = vpack.c.bf16 %v3804_v43, %v3802_v42 }
 0x93e   : > { %5332 = vmatpush1.bf16.msra.mxu0 %v5331_v17  ;;  %v3761_v17 = vld [vmem:[#allocation16 + $0x1f8] sm:$0xff] }
 0x93f   : > { %5334 = vmatprep.subr.bf16.mxu0 %v5333_v31  ;;  %v5367_v31 = vpack.c.bf16 %v3756_v51, %v3754_v46  ;;  %v5369_v37 = vpack.c.bf16 %v3761_v17, %v3759_v33  ;;  %v3779_v46 = vld [vmem:[#allocation16 + $0x288] sm:$0xff]  ;;  %v3781_v51 = vld [vmem:[#allocation16 + $0x298] sm:$0xff] }
 0x940   : > { %v5389_v17 = vpack.c.bf16 %v3781_v51, %v3779_v46  ;;  %v3806_v46 = vld [vmem:[#allocation16 + $0x360] sm:$0xff]  ;;  %v3808_v51 = vld [vmem:[#allocation16 + $0x370] sm:$0xff] }
 0x942   : > { %5336 = vmatpush1.bf16.msra.mxu0 %v5335_v54  ;;  %v3765_v54 = vld [vmem:[#allocation16 + $0x218] sm:$0xff] }
 0x943   : > { %5338 = vmatprep.subr.bf16.mxu0 %v5337_v5  ;;  %v5371_v5 = vpack.c.bf16 %v3760_v52, %v3758_v39  ;;  %v5373_v58 = vpack.c.bf16 %v3765_v54, %v3763_v53  ;;  %v3783_v39 = vld [vmem:[#allocation16 + $0x2a8] sm:$0xff]  ;;  %v3785_v52 = vld [vmem:[#allocation16 + $0x2b8] sm:$0xff] }
 0x944   : > { %v5393_v54 = vpack.c.bf16 %v3785_v52, %v3783_v39 }
 0x946   : > { %5340 = vmatpush1.bf16.msra.mxu0 %v5339_v32 }
 0x947   : > { %5342 = vmatprep.subr.bf16.mxu0 %v5341_v6 }
 0x94a   : > { %5344 = vmatpush1.bf16.msra.mxu0 %v5343_v21 }
 0x94b   : > { %5346 = vmatprep.subr.bf16.mxu0 %v5345_v16 }
 0x94e   : > { %5348 = vmatpush1.bf16.msra.mxu0 %v5347_v19 }
 0x94f   : > { %5350 = vmatprep.subr.bf16.mxu0 %v5349_v7 }
 0x952   : > { %5352 = vmatpush1.bf16.msra.mxu0 %v5351_v15  ;;  %v3769_v15 = vld [vmem:[#allocation16 + $0x238] sm:$0xff] }
 0x953   : > { %5354 = vmatprep.subr.bf16.mxu0 %v5353_v26  ;;  %v5377_v29 = vpack.c.bf16 %v3769_v15, %v3767_v1  ;;  %v5405_v1 = vpack.c.bf16 %v3797_v45, %v3795_v62  ;;  %v3794_v15 = vld [vmem:[#allocation16 + $0x300] sm:$0xff] }
 0x956   : > { %5356 = vmatpush1.bf16.msra.mxu0 %v5355_v24  ;;  %v3766_v24 = vld [vmem:[#allocation16 + $0x220] sm:$0xff] }
 0x957   : > { %5358 = vmatprep.subr.bf16.mxu0 %v5357_v20  ;;  %v3768_v20 = vld [vmem:[#allocation16 + $0x230] sm:$0xff] }
 0x958   : > { %v5379_v35 = vpack.c.bf16 %v3768_v20, %v3766_v24  ;;  %v3798_v20 = vld [vmem:[#allocation16 + $0x320] sm:$0xff] }
 0x95a   : > { %5360 = vmatpush1.bf16.msra.mxu0 %v5359_v41  ;;  %v3770_v41 = vld [vmem:[#allocation16 + $0x240] sm:$0xff] }
 0x95b   : > { %5362 = vmatprep.subr.bf16.mxu0 %v5361_v40  ;;  %v3772_v40 = vld [vmem:[#allocation16 + $0x250] sm:$0xff] }
 0x95c   : > { %v5383_v56 = vpack.c.bf16 %v3772_v40, %v3770_v41  ;;  %v3805_v41 = vld [vmem:[#allocation16 + $0x358] sm:$0xff]  ;;  %v5411_v40 = vpack.c.bf16 %v3800_v38, %v3798_v20 }
 0x95d   : > { %v3821_v20 = vld [vmem:[#allocation16 + $0x3d8] sm:$0xff] }
 0x95e   : > { %5364 = vmatpush1.bf16.msra.mxu0 %v5363_v44  ;;  %v3774_v44 = vld [vmem:[#allocation16 + $0x260] sm:$0xff] }
 0x95f   : > { %5366 = vmatprep.subr.bf16.mxu0 %v5365_v34  ;;  %v3776_v34 = vld [vmem:[#allocation16 + $0x270] sm:$0xff] }
 0x960   : > { %v5387_v33 = vpack.c.bf16 %v3776_v34, %v3774_v44  ;;  %v3807_v44 = vld [vmem:[#allocation16 + $0x368] sm:$0xff]  ;;  %v3809_v34 = vld [vmem:[#allocation16 + $0x378] sm:$0xff] }
 0x962   : > { %5368 = vmatpush1.bf16.msra.mxu0 %v5367_v31  ;;  %v3778_v31 = vld [vmem:[#allocation16 + $0x280] sm:$0xff] }
 0x963   : > { %5370 = vmatprep.subr.bf16.mxu0 %v5369_v37  ;;  %v3780_v37 = vld [vmem:[#allocation16 + $0x290] sm:$0xff] }
 0x964   : > { %v5391_v53 = vpack.c.bf16 %v3780_v37, %v3778_v31  ;;  %v3811_v31 = vld [vmem:[#allocation16 + $0x388] sm:$0xff]  ;;  %v3813_v37 = vld [vmem:[#allocation16 + $0x398] sm:$0xff] }
 0x966   : > { %5372 = vmatpush1.bf16.msra.mxu0 %v5371_v5  ;;  %v3782_v5 = vld [vmem:[#allocation16 + $0x2a0] sm:$0xff] }
 0x967   : > { %5374 = vmatprep.subr.bf16.mxu0 %v5373_v58  ;;  %v3784_v58 = vld [vmem:[#allocation16 + $0x2b0] sm:$0xff] }
 0x9ab   : > { %v3328_v32 = vpop.f32.mrb[16].mxu0  ;;  %v7159_v6 = vpop.f32.mrb[32].mxu1 }
 0x9ac   : > { %v3329_v8 = vadd.f32 %v3328_v32, %v7153_v60  ;;  %v3330_v0 = vpop.f32.mrb[17].mxu0  ;;  %v7162_v14 = vpop.f32.mrb[33].mxu1  ;;  %v3787_v32 = vld [vmem:[#allocation16 + $0x2c8] sm:$0xff] }
 0x9ad   : > { %v3331_v13 = vadd.f32 %v3330_v0, %v7157_v49  ;;  %v5395_v0 = vpack.c.bf16 %v3784_v58, %v3782_v5  ;;  %v5419_v58 = vpack.c.bf16 %v3808_v51, %v3806_v46 }
 0x9ae   : > { %v4518_v21 = vmul.f32 -1.702, %v3329_v8 }
 0x9af   : > { %v4519_v16 = vmul.f32 -1.702, %v3331_v13 }
 0x9b0   : > { %v3602_v18 = vmul.f32 1.442695, %v4518_v21  ;;  %v3786_v21 = vld [vmem:[#allocation16 + $0x2c0] sm:$0xff] }
 0x9b1   : > { %v3604_v22 = vmul.f32 1.442695, %v4519_v16  ;;  %v3788_v16 = vld [vmem:[#allocation16 + $0x2d0] sm:$0xff] }
 0x9b2   : > { %5881 = vpow2.f32 %v3602_v18  ;;  %v3791_v18 = vld [vmem:[#allocation16 + $0x2e8] sm:$0xff] }
 0x9b3   : > { %5883 = vpow2.f32 %v3604_v22  ;;  %v3793_v22 = vld [vmem:[#allocation16 + $0x2f8] sm:$0xff] }
 0x9bc   : > { %v5882_v27 = vpop.eup %5881 }
 0x9bd   : > { %v3634_v9 = vadd.f32 1.0, %v5882_v27  ;;  %v5884_v19 = vpop.eup %5883  ;;  %v5399_v27 = vpack.c.bf16 %v3788_v16, %v3786_v21  ;;  %v3812_v21 = vld [vmem:[#allocation16 + $0x390] sm:$0xff]  ;;  %v3815_v16 = vld [vmem:[#allocation16 + $0x3a8] sm:$0xff] }
 0x9be   : > { %v3635_v7 = vadd.f32 1.0, %v5884_v19  ;;  %v3790_v19 = vld [vmem:[#allocation16 + $0x2e0] sm:$0xff] }
 0x9bf   : > { %5885 = vrcp.f32 %v3634_v9  ;;  %v5401_v9 = vpack.c.bf16 %v3793_v22, %v3791_v18  ;;  %v3817_v18 = vld [vmem:[#allocation16 + $0x3b8] sm:$0xff] }
 0x9c0   : > { %5887 = vrcp.f32 %v3635_v7  ;;  %v3792_v7 = vld [vmem:[#allocation16 + $0x2f0] sm:$0xff] }
 0x9c9   : > { %v5886_v50 = vpop.eup %5885 }
 0x9ca   : > { %v5888_v26 = vpop.eup %5887  ;;  %v3682_v4 = vmul.f32 %v5886_v50, %v3329_v8  ;;  %v3789_v8 = vld [vmem:[#allocation16 + $0x2d8] sm:$0xff]  ;;  %v5403_v50 = vpack.c.bf16 %v3792_v7, %v3790_v19 }
 0x9cb   : > { %v3683_v55 = vmul.f32 %v5888_v26, %v3331_v13  ;;  %v5397_v13 = vpack.c.bf16 %v3789_v8, %v3787_v32  ;;  %v3796_v26 = vld [vmem:[#allocation16 + $0x310] sm:$0xff]  ;;  %v3810_v32 = vld [vmem:[#allocation16 + $0x380] sm:$0xff] }
 0x9cd   : > { %4030 = vmatprep.mubr.f32.mxu0 %v3683_v55  ;;  %v3237_v55 = vrot.slane %v7149_v59, %v844_v48 }
 0x9ce   : > { %4031 = vmatmul.mubr.f32.vlgmr.msra.gmra.mrb[24].mxu0 %v3682_v4  ;;  %v3801_v4 = vld [vmem:[#allocation16 + $0x338] sm:$0xff] }
 0x9cf   : > { %5376 = vmatpush1.bf16.msra.mxu0 %v5375_v57  ;;  %v3799_v57 = vld [vmem:[#allocation16 + $0x328] sm:$0xff] }
 0x9d0   : > { %5378 = vmatprep.subr.bf16.mxu0 %v5377_v29  ;;  %v5407_v29 = vpack.c.bf16 %v3796_v26, %v3794_v15  ;;  %v5409_v24 = vpack.c.bf16 %v3801_v4, %v3799_v57  ;;  %v5425_v57 = vpack.c.bf16 %v3817_v18, %v3815_v16  ;;  %v3814_v4 = vld [vmem:[#allocation16 + $0x3a0] sm:$0xff] }
 0x9d3   : > { %5380 = vmatpush1.bf16.msra.mxu0 %v5379_v35  ;;  %v7172_v35 = vadd.f32 %v7162_v14, %v3237_v55  ;;  %v5417_v14 = vpack.c.bf16 %v3809_v34, %v3807_v44  ;;  %v3818_v44 = vld [vmem:[#allocation16 + $0x3c0] sm:$0xff]  ;;  %v3820_v34 = vld [vmem:[#allocation16 + $0x3d0] sm:$0xff] }
 0x9d4   : > { %5382 = vmatprep.subr.bf16.mxu0 %v5381_v36  ;;  %v3803_v36 = vld [vmem:[#allocation16 + $0x348] sm:$0xff]  ;;  %v5431_v51 = vpack.c.bf16 %v3820_v34, %v3818_v44  ;;  %v3830_v34 = vld [vmem:[#allocation16 + $0x420] sm:$0xff] }
 0x9d5   : > { %v5413_v48 = vpack.c.bf16 %v3805_v41, %v3803_v36 }
 0x9d7   : > { %5384 = vmatpush1.bf16.msra.mxu0 %v5383_v56  ;;  %v7175_v56 = vadd.f32 %v7159_v6, %v3233_v30 }
 0x9d8   : > { %5386 = vmatprep.subr.bf16.mxu0 %v5385_v25  ;;  %v4521_v25 = vmul.f32 -1.702, %v7172_v35 }
 0x9db   : > { %5388 = vmatpush1.bf16.msra.mxu0 %v5387_v33  ;;  %v4520_v33 = vmul.f32 -1.702, %v7175_v56 }
 0x9dc   : > { %5390 = vmatprep.subr.bf16.mxu0 %v5389_v17  ;;  %v3608_v17 = vmul.f32 1.442695, %v4521_v25 }
 0x9dd   : > { %v3606_v22 = vmul.f32 1.442695, %v4520_v33 }
 0x9de   : > { %5889 = vpow2.f32 %v3608_v17  ;;  %v3822_v17 = vld [vmem:[#allocation16 + $0x3e0] sm:$0xff] }
 0x9df   : > { %5392 = vmatpush1.bf16.msra.mxu0 %v5391_v53 }
 0x9e0   : > { %5394 = vmatprep.subr.bf16.mxu0 %v5393_v54 }
 0x9e3   : > { %5396 = vmatpush1.bf16.msra.mxu0 %v5395_v0 }
 0x9e4   : > { %5398 = vmatprep.subr.bf16.mxu0 %v5397_v13  ;;  %v7192_v13 = vrot.slane %v7149_v59, %v852_v11 }
 0x9e7   : > { %5400 = vmatpush1.bf16.msra.mxu0 %v5399_v27 }
 0x9e8   : > { %5402 = vmatprep.subr.bf16.mxu0 %v5401_v9  ;;  %v5890_v46 = vpop.eup %5889 }
 0x9eb   : > { %5404 = vmatpush1.bf16.msra.mxu0 %v5403_v50 }
 0x9ec   : > { %5406 = vmatprep.subr.bf16.mxu0 %v5405_v1  ;;  %v5423_v1 = vpack.c.bf16 %v3812_v21, %v3810_v32 }
 0x9ef   : > { %5408 = vmatpush1.bf16.msra.mxu0 %v5407_v29  ;;  %v3816_v29 = vld [vmem:[#allocation16 + $0x3b0] sm:$0xff] }
 0x9f0   : > { %5410 = vmatprep.subr.bf16.mxu0 %v5409_v24  ;;  %v3819_v24 = vld [vmem:[#allocation16 + $0x3c8] sm:$0xff]  ;;  %v5427_v42 = vpack.c.bf16 %v3816_v29, %v3814_v4  ;;  %v3826_v4 = vld [vmem:[#allocation16 + $0x400] sm:$0xff]  ;;  %v3828_v29 = vld [vmem:[#allocation16 + $0x410] sm:$0xff] }
 0x9f1   : > { %v5429_v25 = vpack.c.bf16 %v3821_v20, %v3819_v24 }
 0x9f3   : > { %5412 = vmatpush1.bf16.msra.mxu0 %v5411_v40 }
 0x9f4   : > { %5414 = vmatprep.subr.bf16.mxu0 %v5413_v48 }
 0x9f7   : > { %v3334_v39 = vpop.f32.mrb[18].mxu0  ;;  %v3411_v52 = vpop.f32.mrb[34].mxu1  ;;  %5416 = vmatpush1.bf16.msra.mxu0 %v5415_v47  ;;  %v3823_v47 = vld [vmem:[#allocation16 + $0x3e8] sm:$0xff] }
 0x9f8   : > { %v7180_v6 = vadd.f32 %v3334_v39, %v7153_v60  ;;  %v7182_v53 = vadd.f32 %v3411_v52, %v3233_v30  ;;  %v3336_v54 = vpop.f32.mrb[19].mxu0  ;;  %v3413_v5 = vpop.f32.mrb[35].mxu1  ;;  %5418 = vmatprep.subr.bf16.mxu0 %v5417_v14  ;;  %v5421_v60 = vpack.c.bf16 %v3813_v37, %v3811_v31  ;;  %v3825_v14 = vld [vmem:[#allocation16 + $0x3f8] sm:$0xff]  ;;  %v3824_v31 = vld [vmem:[#allocation16 + $0x3f0] sm:$0xff]  ;;  %v3827_v37 = vld [vmem:[#allocation16 + $0x408] sm:$0xff]  ;;  %v3637_v52 = vadd.f32 1.0, %v5890_v46 }
 0x9f9   : > { %v7185_v8 = vadd.f32 %v3336_v54, %v7157_v49  ;;  %v7187_v0 = vadd.f32 %v3413_v5, %v3237_v55  ;;  %v5433_v33 = vpack.c.bf16 %v3825_v14, %v3823_v47  ;;  %v3829_v39 = vld [vmem:[#allocation16 + $0x418] sm:$0xff]  ;;  %v5435_v5 = vpack.c.bf16 %v3824_v31, %v3822_v17  ;;  %v3832_v47 = vld [vmem:[#allocation16 + $0x430] sm:$0xff]  ;;  %v3835_v14 = vld [vmem:[#allocation16 + $0x448] sm:$0xff] }
 0x9fa   : > { %v4526_v27 = vmul.f32 -1.702, %v7180_v6  ;;  %v4528_v9 = vmul.f32 -1.702, %v7182_v53  ;;  %v3837_v46 = vld [vmem:[#allocation16 + $0x458] sm:$0xff]  ;;  %v3834_v31 = vld [vmem:[#allocation16 + $0x440] sm:$0xff] }
 0x9fb   : > { %v4527_v49 = vmul.f32 -1.702, %v7185_v8  ;;  %v4529_v19 = vmul.f32 -1.702, %v7187_v0  ;;  %v7198_v7 = vpop.f32.mrb[20].mxu0  ;;  %v7200_v62 = vpop.f32.mrb[36].mxu1  ;;  %5420 = vmatpush1.bf16.msra.mxu0 %v5419_v58  ;;  %v5445_v17 = vpack.c.bf16 %v3837_v46, %v3835_v14 }
 0x9fc   : > { %v3618_v11 = vmul.f32 1.442695, %v4526_v27  ;;  %v3484_v45 = vpop.f32.mrb[21].mxu0  ;;  %v7202_v50 = vpop.f32.mrb[37].mxu1  ;;  %5422 = vmatprep.subr.bf16.mxu0 %v5421_v60  ;;  %v3622_v38 = vmul.f32 1.442695, %v4528_v9  ;;  %v5437_v60 = vpack.c.bf16 %v3829_v39, %v3827_v37 }
 0x9fd   : > { %v3620_v15 = vmul.f32 1.442695, %v4527_v49  ;;  %v3624_v26 = vmul.f32 1.442695, %v4529_v19  ;;  %v7205_v55 = vadd.f32 %v3484_v45, %v7192_v13  ;;  %v3836_v37 = vld [vmem:[#allocation16 + $0x450] sm:$0xff]  ;;  %v3839_v39 = vld [vmem:[#allocation16 + $0x468] sm:$0xff] }
 0x9fe   : > { %5891 = vpow2.f32 %v3618_v11  ;;  %v3858_v46 = vld [vmem:[#allocation16 + $0x500] sm:$0xff] }
 0x9ff   : > { %5893 = vpow2.f32 %v3606_v22  ;;  %v4523_v30 = vmul.f32 -1.702, %v7205_v55  ;;  %v7208_v36 = vpop.f32.mrb[22].mxu0  ;;  %v7210_v41 = vpop.f32.mrb[38].mxu1  ;;  %5424 = vmatpush1.bf16.msra.mxu0 %v5423_v1 }
 0xa00   : > { %5895 = vpow2.f32 %v3620_v15  ;;  %v7212_v40 = vpop.f32.mrb[23].mxu0  ;;  %v7214_v48 = vpop.f32.mrb[39].mxu1  ;;  %5426 = vmatprep.subr.bf16.mxu0 %v5425_v57 }
 0xa01   : > { %5897 = vpow2.f32 %v3624_v26  ;;  %v3612_v43 = vmul.f32 1.442695, %v4523_v30  ;;  %v3833_v30 = vld [vmem:[#allocation16 + $0x438] sm:$0xff] }
 0xa02   : > { %5899 = vpow2.f32 %v3622_v38  ;;  %v3831_v38 = vld [vmem:[#allocation16 + $0x428] sm:$0xff] }
 0xa03   : > { %5901 = vpow2.f32 %v3612_v43  ;;  %5428 = vmatpush1.bf16.msra.mxu0 %v5427_v42  ;;  %v5439_v43 = vpack.c.bf16 %v3828_v29, %v3826_v4  ;;  %v5441_v44 = vpack.c.bf16 %v3833_v30, %v3831_v38  ;;  %v3850_v4 = vld [vmem:[#allocation16 + $0x4c0] sm:$0xff]  ;;  %v3852_v29 = vld [vmem:[#allocation16 + $0x4d0] sm:$0xff] }
 0xa04   : > { %5430 = vmatprep.subr.bf16.mxu0 %v5429_v25  ;;  %5903 = vrcp.f32 %v3637_v52  ;;  %v3841_v52 = vld [vmem:[#allocation16 + $0x478] sm:$0xff] }
 0xa07   : > { %5432 = vmatpush1.bf16.msra.mxu0 %v5431_v51 }
 0xa08   : > { %v5892_v54 = vpop.eup %5891  ;;  %5434 = vmatprep.subr.bf16.mxu0 %v5433_v33 }
 0xa09   : > { %v5894_v58 = vpop.eup %5893  ;;  %v3642_v32 = vadd.f32 1.0, %v5892_v54  ;;  %v5449_v54 = vpack.c.bf16 %v3841_v52, %v3839_v39  ;;  %v3862_v39 = vld [vmem:[#allocation16 + $0x520] sm:$0xff]  ;;  %v3864_v52 = vld [vmem:[#allocation16 + $0x530] sm:$0xff] }
 0xa0a   : > { %v5896_v21 = vpop.eup %5895  ;;  %v3636_v22 = vadd.f32 1.0, %v5894_v58  ;;  %v3840_v58 = vld [vmem:[#allocation16 + $0x470] sm:$0xff] }
 0xa0b   : > { %v5898_v16 = vpop.eup %5897  ;;  %v3643_v18 = vadd.f32 1.0, %v5896_v21  ;;  %5905 = vrcp.f32 %v3642_v32  ;;  %5436 = vmatpush1.bf16.msra.mxu0 %v5435_v5  ;;  %v3838_v5 = vld [vmem:[#allocation16 + $0x460] sm:$0xff]  ;;  %v3843_v32 = vld [vmem:[#allocation16 + $0x488] sm:$0xff] }
 0xa0c   : > { %v5900_v27 = vpop.eup %5899  ;;  %v3645_v9 = vadd.f32 1.0, %v5898_v16  ;;  %5438 = vmatprep.subr.bf16.mxu0 %v5437_v60  ;;  %v3845_v60 = vld [vmem:[#allocation16 + $0x498] sm:$0xff]  ;;  %v3842_v16 = vld [vmem:[#allocation16 + $0x480] sm:$0xff] }
 0xa0d   : > { %5907 = vrcp.f32 %v3643_v18  ;;  %v5902_v49 = vpop.eup %5901  ;;  %v3644_v19 = vadd.f32 1.0, %v5900_v27  ;;  %v5453_v21 = vpack.c.bf16 %v3845_v60, %v3843_v32  ;;  %v3844_v18 = vld [vmem:[#allocation16 + $0x490] sm:$0xff]  ;;  %v5475_v32 = vpack.c.bf16 %v3864_v52, %v3862_v39  ;;  %v3891_v39 = vld [vmem:[#allocation16 + $0x608] sm:$0xff]  ;;  %v3893_v52 = vld [vmem:[#allocation16 + $0x618] sm:$0xff] }
 0xa0e   : > { %5909 = vrcp.f32 %v3636_v22  ;;  %v3639_v11 = vadd.f32 1.0, %v5902_v49  ;;  %v5904_v45 = vpop.eup %5903  ;;  %v3847_v22 = vld [vmem:[#allocation16 + $0x4a8] sm:$0xff]  ;;  %v5455_v27 = vpack.c.bf16 %v3844_v18, %v3842_v16  ;;  %v3846_v49 = vld [vmem:[#allocation16 + $0x4a0] sm:$0xff]  ;;  %v3873_v18 = vld [vmem:[#allocation16 + $0x578] sm:$0xff] }
 0xa0f   : > { %5911 = vrcp.f32 %v3645_v9  ;;  %v3685_v20 = vmul.f32 %v5904_v45, %v7172_v35  ;;  %v5443_v35 = vpack.c.bf16 %v3832_v47, %v3830_v34  ;;  %v3853_v45 = vld [vmem:[#allocation16 + $0x4d8] sm:$0xff]  ;;  %v3859_v34 = vld [vmem:[#allocation16 + $0x508] sm:$0xff] }
 0xa10   : > { %5913 = vrcp.f32 %v3644_v19  ;;  %v3848_v19 = vld [vmem:[#allocation16 + $0x4b0] sm:$0xff]  ;;  %v3861_v47 = vld [vmem:[#allocation16 + $0x518] sm:$0xff]  ;;  %v3871_v16 = vld [vmem:[#allocation16 + $0x568] sm:$0xff] }
 0xa11   : > { %5915 = vrcp.f32 %v3639_v11  ;;  %v3851_v11 = vld [vmem:[#allocation16 + $0x4c8] sm:$0xff]  ;;  %v5469_v14 = vpack.c.bf16 %v3861_v47, %v3859_v34  ;;  %v3880_v34 = vld [vmem:[#allocation16 + $0x5b0] sm:$0xff] }
 0xa15   : > { %v5906_v1 = vpop.eup %5905 }
 0xa16   : > { %v3690_v57 = vmul.f32 %v5906_v1, %v7180_v6  ;;  %v3241_v1 = vrot.slane %v7149_v59, %v848_v10  ;;  %v5463_v10 = vpack.c.bf16 %v3852_v29, %v3850_v4  ;;  %v3879_v4 = vld [vmem:[#allocation16 + $0x5a8] sm:$0xff]  ;;  %v3881_v29 = vld [vmem:[#allocation16 + $0x5b8] sm:$0xff] }
 0xa17   : > { %v5908_v15 = vpop.eup %5907 }
 0xa18   : > { %v3691_v26 = vmul.f32 %v5908_v15, %v7185_v8  ;;  %v5910_v24 = vpop.eup %5909  ;;  %v3252_v15 = vsub.s32 7, %v6742_v61  ;;  %v7228_v38 = vadd.f32 %v7198_v7, %v3241_v1  ;;  %v7239_v7 = vadd.f32 %v7208_v36, %v3241_v1 }
 0xa19   : > { %v5912_v42 = vpop.eup %5911  ;;  %v3684_v25 = vmul.f32 %v5910_v24, %v7175_v56  ;;  %v3855_v24 = vld [vmem:[#allocation16 + $0x4e8] sm:$0xff] }
 0xa1a   : > { %4036 = vmatprep.mubr.f32.mxu0 %v3691_v26  ;;  %v5914_v8 = vpop.eup %5913  ;;  %v3693_v6 = vmul.f32 %v5912_v42, %v7187_v0  ;;  %v5447_v0 = vpack.c.bf16 %v3836_v37, %v3834_v31  ;;  %v5459_v26 = vpack.c.bf16 %v3848_v19, %v3846_v49  ;;  %v7231_v30 = vrot.slane %v7149_v59, %v3252_v15  ;;  %v3875_v49 = vld [vmem:[#allocation16 + $0x588] sm:$0xff]  ;;  %v3877_v19 = vld [vmem:[#allocation16 + $0x598] sm:$0xff]  ;;  %v3874_v15 = vld [vmem:[#allocation16 + $0x580] sm:$0xff] }
 0xa1b   : > { %4037 = vmatmul.mubr.f32.gmra.mrb[26].mxu0 %v3690_v57  ;;  %v5916_v51 = vpop.eup %5915  ;;  %v3692_v33 = vmul.f32 %v5914_v8, %v7182_v53  ;;  %v5451_v53 = vpack.c.bf16 %v3840_v58, %v3838_v5  ;;  %v5461_v57 = vpack.c.bf16 %v3853_v45, %v3851_v11  ;;  %v7235_v42 = vadd.f32 %v7212_v40, %v7192_v13 }
 0xa1c   : > { %4107 = vmatprep.mubr.f32.mxu0 %v3685_v20  ;;  %v3687_v56 = vmul.f32 %v5916_v51, %v7205_v55  ;;  %v3849_v55 = vld [vmem:[#allocation16 + $0x4b8] sm:$0xff]  ;;  %v4522_v8 = vmul.f32 -1.702, %v7228_v38  ;;  %v3860_v51 = vld [vmem:[#allocation16 + $0x510] sm:$0xff]  ;;  %v4530_v31 = vmul.f32 -1.702, %v7239_v7  ;;  %v5485_v1 = vpack.c.bf16 %v3877_v19, %v3875_v49 }
 0xa1d   : > { %v5457_v9 = vpack.c.bf16 %v3849_v55, %v3847_v22  ;;  %v3857_v20 = vld [vmem:[#allocation16 + $0x4f8] sm:$0xff]  ;;  %v4531_v13 = vmul.f32 -1.702, %v7235_v42  ;;  %v5481_v55 = vpack.c.bf16 %v3873_v18, %v3871_v16  ;;  %v3899_v19 = vld [vmem:[#allocation16 + $0x648] sm:$0xff] }
 0xa1e   : > { %v3626_v5 = vmul.f32 1.442695, %v4530_v31  ;;  %v3889_v31 = vld [vmem:[#allocation16 + $0x5f8] sm:$0xff] }
 0xa1f   : > { %4108 = vmatmul.mubr.f32.vlgmr.msra.gmra.mrb[24].mxu0 %v3684_v25  ;;  %v3854_v25 = vld [vmem:[#allocation16 + $0x4e0] sm:$0xff]  ;;  %v3628_v37 = vmul.f32 1.442695, %v4531_v13  ;;  %v3885_v13 = vld [vmem:[#allocation16 + $0x5d8] sm:$0xff] }
 0xa20   : > { %5440 = vmatpush1.bf16.msra.mxu0 %v5439_v43  ;;  %4113 = vmatprep.mubr.f32.mxu0 %v3693_v6  ;;  %v5465_v43 = vpack.c.bf16 %v3857_v20, %v3855_v24  ;;  %v7243_v6 = vadd.f32 %v7202_v50, %v7231_v30 }
 0xa21   : > { %5442 = vmatprep.subr.bf16.mxu0 %v5441_v44  ;;  %v3856_v44 = vld [vmem:[#allocation16 + $0x4f0] sm:$0xff] }
 0xa22   : > { %v5467_v40 = vpack.c.bf16 %v3856_v44, %v3854_v25  ;;  %v4525_v36 = vmul.f32 -1.702, %v7243_v6  ;;  %v5489_v25 = vpack.c.bf16 %v3881_v29, %v3879_v4  ;;  %v3878_v44 = vld [vmem:[#allocation16 + $0x5a0] sm:$0xff]  ;;  %v3903_v29 = vld [vmem:[#allocation16 + $0x668] sm:$0xff] }
 0xa23   : > { %4114 = vmatmul.mubr.f32.gmra.mrb[26].mxu0 %v3692_v33  ;;  %v3865_v33 = vld [vmem:[#allocation16 + $0x538] sm:$0xff] }
 0xa24   : > { %5444 = vmatpush1.bf16.msra.mxu0 %v5443_v35  ;;  %4184 = vmatprep.mubr.f32.mxu0 %v3687_v56  ;;  %v3863_v35 = vld [vmem:[#allocation16 + $0x528] sm:$0xff]  ;;  %v5471_v56 = vpack.c.bf16 %v3860_v51, %v3858_v46  ;;  %v3616_v58 = vmul.f32 1.442695, %v4525_v36 }
 0xa25   : > { %5446 = vmatprep.subr.bf16.mxu0 %v5445_v17  ;;  %v3610_v17 = vmul.f32 1.442695, %v4522_v8  ;;  %v5473_v50 = vpack.c.bf16 %v3865_v33, %v3863_v35  ;;  %v3883_v8 = vld [vmem:[#allocation16 + $0x5c8] sm:$0xff]  ;;  %v3882_v35 = vld [vmem:[#allocation16 + $0x5c0] sm:$0xff]  ;;  %v3884_v33 = vld [vmem:[#allocation16 + $0x5d0] sm:$0xff] }
 0xa26   : > { %v5493_v51 = vpack.c.bf16 %v3885_v13, %v3883_v8  ;;  %v5495_v36 = vpack.c.bf16 %v3884_v33, %v3882_v35  ;;  %v3908_v8 = vld [vmem:[#allocation16 + $0x690] sm:$0xff]  ;;  %v3911_v13 = vld [vmem:[#allocation16 + $0x6a8] sm:$0xff] }
 0xa27   : > { %5917 = vpow2.f32 %v3610_v17  ;;  %v3887_v17 = vld [vmem:[#allocation16 + $0x5e8] sm:$0xff]  ;;  %v3912_v35 = vld [vmem:[#allocation16 + $0x6b0] sm:$0xff] }
 0xa28   : > { %5448 = vmatpush1.bf16.msra.mxu0 %v5447_v0  ;;  %v3867_v0 = vld [vmem:[#allocation16 + $0x548] sm:$0xff]  ;;  %5919 = vpow2.f32 %v3628_v37  ;;  %v5497_v37 = vpack.c.bf16 %v3889_v31, %v3887_v17  ;;  %v3917_v17 = vld [vmem:[#allocation16 + $0x6d8] sm:$0xff] }
 0xa29   : > { %5450 = vmatprep.subr.bf16.mxu0 %v5449_v54  ;;  %v3869_v54 = vld [vmem:[#allocation16 + $0x558] sm:$0xff]  ;;  %5921 = vpow2.f32 %v3626_v5  ;;  %v3890_v5 = vld [vmem:[#allocation16 + $0x600] sm:$0xff]  ;;  %v3915_v33 = vld [vmem:[#allocation16 + $0x6c8] sm:$0xff] }
 0xa2a   : > { %v5477_v60 = vpack.c.bf16 %v3869_v54, %v3867_v0  ;;  %5923 = vpow2.f32 %v3616_v58  ;;  %v5501_v54 = vpack.c.bf16 %v3893_v52, %v3891_v39  ;;  %v3892_v58 = vld [vmem:[#allocation16 + $0x610] sm:$0xff]  ;;  %v3919_v39 = vld [vmem:[#allocation16 + $0x6e8] sm:$0xff]  ;;  %v3921_v52 = vld [vmem:[#allocation16 + $0x6f8] sm:$0xff] }
 0xa2b   : > { %v5503_v16 = vpack.c.bf16 %v3892_v58, %v3890_v5  ;;  %v5529_v5 = vpack.c.bf16 %v3921_v52, %v3919_v39  ;;  %v3920_v58 = vld [vmem:[#allocation16 + $0x6f0] sm:$0xff] }
 0xa2c   : > { %5452 = vmatpush1.bf16.msra.mxu0 %v5451_v53  ;;  %v3866_v53 = vld [vmem:[#allocation16 + $0x540] sm:$0xff] }
 0xa2d   : > { %5454 = vmatprep.subr.bf16.mxu0 %v5453_v21  ;;  %v3868_v21 = vld [vmem:[#allocation16 + $0x550] sm:$0xff] }
 0xa2e   : > { %v5479_v22 = vpack.c.bf16 %v3868_v21, %v3866_v53  ;;  %v3897_v53 = vld [vmem:[#allocation16 + $0x638] sm:$0xff] }
 0xa30   : > { %5456 = vmatpush1.bf16.msra.mxu0 %v5455_v27  ;;  %v3870_v27 = vld [vmem:[#allocation16 + $0x560] sm:$0xff] }
 0xa31   : > { %5458 = vmatprep.subr.bf16.mxu0 %v5457_v9  ;;  %v3872_v9 = vld [vmem:[#allocation16 + $0x570] sm:$0xff]  ;;  %v5918_v45 = vpop.eup %5917 }
 0xa32   : > { %v5483_v11 = vpack.c.bf16 %v3872_v9, %v3870_v27  ;;  %v3638_v24 = vadd.f32 1.0, %v5918_v45  ;;  %v3896_v27 = vld [vmem:[#allocation16 + $0x630] sm:$0xff] }
 0xa34   : > { %5460 = vmatpush1.bf16.msra.mxu0 %v5459_v26  ;;  %v3876_v26 = vld [vmem:[#allocation16 + $0x590] sm:$0xff]  ;;  %5925 = vrcp.f32 %v3638_v24  ;;  %v3905_v24 = vld [vmem:[#allocation16 + $0x678] sm:$0xff] }
 0xa35   : > { %5462 = vmatprep.subr.bf16.mxu0 %v5461_v57  ;;  %v5920_v57 = vpop.eup %5919  ;;  %v5487_v20 = vpack.c.bf16 %v3876_v26, %v3874_v15 }
 0xa38   : > { %5464 = vmatpush1.bf16.msra.mxu0 %v5463_v10  ;;  %v5922_v10 = vpop.eup %5921 }
 0xa39   : > { %5466 = vmatprep.subr.bf16.mxu0 %v5465_v43  ;;  %v3647_v43 = vadd.f32 1.0, %v5920_v57  ;;  %v5924_v47 = vpop.eup %5923  ;;  %v3898_v57 = vld [vmem:[#allocation16 + $0x640] sm:$0xff] }
 0xa3a   : > { %v3641_v46 = vadd.f32 1.0, %v5924_v47  ;;  %v3906_v47 = vld [vmem:[#allocation16 + $0x680] sm:$0xff] }
 0xa3b   : > { %5927 = vrcp.f32 %v3647_v43  ;;  %v3904_v43 = vld [vmem:[#allocation16 + $0x670] sm:$0xff] }
 0xa3c   : > { %5468 = vmatpush1.bf16.msra.mxu0 %v5467_v40  ;;  %v3646_v40 = vadd.f32 1.0, %v5922_v10  ;;  %v3902_v10 = vld [vmem:[#allocation16 + $0x660] sm:$0xff] }
 0xa3d   : > { %5470 = vmatprep.subr.bf16.mxu0 %v5469_v14  ;;  %v5491_v14 = vpack.c.bf16 %v3880_v34, %v3878_v44  ;;  %v3909_v44 = vld [vmem:[#allocation16 + $0x698] sm:$0xff] }
 0xa3e   : > { %5929 = vrcp.f32 %v3646_v40  ;;  %v3248_v40 = vsub.s32 6, %v6742_v61 }
 0xa3f   : > { %5931 = vrcp.f32 %v3641_v46 }
 0xa40   : > { %5472 = vmatpush1.bf16.msra.mxu0 %v5471_v56  ;;  %v3886_v56 = vld [vmem:[#allocation16 + $0x5e0] sm:$0xff]  ;;  %v3249_v31 = vrot.slane %v7149_v59, %v3248_v40 }
 0xa41   : > { %5474 = vmatprep.subr.bf16.mxu0 %v5473_v50  ;;  %v3888_v50 = vld [vmem:[#allocation16 + $0x5f0] sm:$0xff]  ;;  %v3918_v59 = vld [vmem:[#allocation16 + $0x6e0] sm:$0xff] }
 0xa42   : > { %v5499_v0 = vpack.c.bf16 %v3888_v50, %v3886_v56  ;;  %v3914_v56 = vld [vmem:[#allocation16 + $0x6c0] sm:$0xff]  ;;  %v3916_v50 = vld [vmem:[#allocation16 + $0x6d0] sm:$0xff]  ;;  %v7255_v61 = vadd.f32 %v7200_v62, %v3249_v31 }
 0xa44   : > { %5476 = vmatpush1.bf16.msra.mxu0 %v5475_v32  ;;  %v5926_v32 = vpop.eup %5925 }
 0xa45   : > { %5478 = vmatprep.subr.bf16.mxu0 %v5477_v60  ;;  %v3895_v60 = vld [vmem:[#allocation16 + $0x628] sm:$0xff]  ;;  %v5928_v21 = vpop.eup %5927  ;;  %v3686_v18 = vmul.f32 %v5926_v32, %v7228_v38  ;;  %v3900_v38 = vld [vmem:[#allocation16 + $0x650] sm:$0xff] }
 0xa46   : > { %v3695_v49 = vmul.f32 %v5928_v21, %v7235_v42  ;;  %v5511_v42 = vpack.c.bf16 %v3900_v38, %v3898_v57  ;;  %v3923_v32 = vld [vmem:[#allocation16 + $0x708] sm:$0xff]  ;;  %v7263_v21 = vadd.f32 %v7210_v41, %v3249_v31  ;;  %v3926_v41 = vld [vmem:[#allocation16 + $0x720] sm:$0xff] }
 0xa48   : > { %5480 = vmatpush1.bf16.msra.mxu0 %v5479_v22  ;;  %v5505_v22 = vpack.c.bf16 %v3897_v53, %v3895_v60  ;;  %v5930_v9 = vpop.eup %5929  ;;  %v3925_v60 = vld [vmem:[#allocation16 + $0x718] sm:$0xff]  ;;  %v4524_v53 = vmul.f32 -1.702, %v7255_v61 }
 0xa49   : > { %5482 = vmatprep.subr.bf16.mxu0 %v5481_v55  ;;  %v3894_v55 = vld [vmem:[#allocation16 + $0x620] sm:$0xff]  ;;  %v5932_v45 = vpop.eup %5931  ;;  %v3694_v15 = vmul.f32 %v5930_v9, %v7239_v7  ;;  %v5515_v7 = vpack.c.bf16 %v3904_v43, %v3902_v10  ;;  %v4532_v9 = vmul.f32 -1.702, %v7263_v21 }
 0xa4a   : > { %v3689_v4 = vmul.f32 %v5932_v45, %v7243_v6  ;;  %v3913_v6 = vld [vmem:[#allocation16 + $0x6b8] sm:$0xff]  ;;  %v3928_v45 = vld [vmem:[#allocation16 + $0x730] sm:$0xff]  ;;  %v3934_v43 = vld [vmem:[#allocation16 + $0x760] sm:$0xff] }
 0xa4b   : > { %v5521_v46 = vpack.c.bf16 %v3913_v6, %v3911_v13  ;;  %v5539_v57 = vpack.c.bf16 %v3928_v45, %v3926_v41  ;;  %v3938_v13 = vld [vmem:[#allocation16 + $0x780] sm:$0xff]  ;;  %v3940_v6 = vld [vmem:[#allocation16 + $0x790] sm:$0xff] }
 0xa4c   : > { %5484 = vmatpush1.bf16.msra.mxu0 %v5483_v11  ;;  %v3901_v11 = vld [vmem:[#allocation16 + $0x658] sm:$0xff] }
 0xa4d   : > { %5486 = vmatprep.subr.bf16.mxu0 %v5485_v1  ;;  %v5507_v1 = vpack.c.bf16 %v3896_v27, %v3894_v55  ;;  %v5509_v26 = vpack.c.bf16 %v3901_v11, %v3899_v19  ;;  %v3929_v55 = vld [vmem:[#allocation16 + $0x738] sm:$0xff]  ;;  %v3614_v27 = vmul.f32 1.442695, %v4524_v53 }
 0xa4f   : > { %5933 = vpow2.f32 %v3614_v27 }
 0xa50   : > { %5488 = vmatpush1.bf16.msra.mxu0 %v5487_v20  ;;  %v5513_v20 = vpack.c.bf16 %v3905_v24, %v3903_v29  ;;  %v3932_v29 = vld [vmem:[#allocation16 + $0x750] sm:$0xff]  ;;  %v3935_v24 = vld [vmem:[#allocation16 + $0x768] sm:$0xff] }
 0xa51   : > { %5490 = vmatprep.subr.bf16.mxu0 %v5489_v25  ;;  %v3907_v25 = vld [vmem:[#allocation16 + $0x688] sm:$0xff] }
 0xa52   : > { %v5517_v34 = vpack.c.bf16 %v3909_v44, %v3907_v25  ;;  %v3936_v25 = vld [vmem:[#allocation16 + $0x770] sm:$0xff]  ;;  %v3939_v44 = vld [vmem:[#allocation16 + $0x788] sm:$0xff] }
 0xa54   : > { %5492 = vmatpush1.bf16.msra.mxu0 %v5491_v14  ;;  %v5519_v14 = vpack.c.bf16 %v3908_v8, %v3906_v47 }
 0xa55   : > { %5494 = vmatprep.subr.bf16.mxu0 %v5493_v51  ;;  %v3910_v51 = vld [vmem:[#allocation16 + $0x6a0] sm:$0xff] }
 0xa58   : > { %5496 = vmatpush1.bf16.msra.mxu0 %v5495_v36  ;;  %v5523_v36 = vpack.c.bf16 %v3912_v35, %v3910_v51  ;;  %v5551_v35 = vpack.c.bf16 %v3940_v6, %v3938_v13 }
 0xa59   : > { %5498 = vmatprep.subr.bf16.mxu0 %v5497_v37  ;;  %v5525_v37 = vpack.c.bf16 %v3917_v17, %v3915_v33  ;;  %v5934_v47 = vpop.eup %5933 }
 0xa5a   : > { %v3640_v51 = vadd.f32 1.0, %v5934_v47 }
 0xa5c   : > { %5500 = vmatpush1.bf16.msra.mxu0 %v5499_v0  ;;  %v7259_v0 = vadd.f32 %v7214_v48, %v7231_v30  ;;  %v5533_v48 = vpack.c.bf16 %v3925_v60, %v3923_v32  ;;  %v3922_v30 = vld [vmem:[#allocation16 + $0x700] sm:$0xff]  ;;  %v3953_v32 = vld [vmem:[#allocation16 + $0x7f8] sm:$0xff] }
 0xa5d   : > { %5502 = vmatprep.subr.bf16.mxu0 %v5501_v54  ;;  %v5527_v54 = vpack.c.bf16 %v3916_v50, %v3914_v56  ;;  %v3947_v56 = vld [vmem:[#allocation16 + $0x7c8] sm:$0xff]  ;;  %v3949_v50 = vld [vmem:[#allocation16 + $0x7d8] sm:$0xff] }
 0xa5e   : > { %v4533_v62 = vmul.f32 -1.702, %v7259_v0 }
 0xa5f   : > { %4185 = vmatmul.mubr.f32.vlgmr.msra.gmra.mrb[24].mxu0 %v3686_v18  ;;  %v3924_v18 = vld [vmem:[#allocation16 + $0x710] sm:$0xff] }
 0xa60   : > { %4190 = vmatprep.mubr.f32.mxu0 %v3695_v49  ;;  %5504 = vmatpush1.bf16.msra.mxu0 %v5503_v16  ;;  %v5531_v16 = vpack.c.bf16 %v3920_v58, %v3918_v59  ;;  %v3632_v49 = vmul.f32 1.442695, %v4533_v62  ;;  %v5535_v19 = vpack.c.bf16 %v3924_v18, %v3922_v30  ;;  %v3948_v59 = vld [vmem:[#allocation16 + $0x7d0] sm:$0xff]  ;;  %v3951_v58 = vld [vmem:[#allocation16 + $0x7e8] sm:$0xff]  ;;  %v3950_v62 = vld [vmem:[#allocation16 + $0x7e0] sm:$0xff] }
 0xa61   : > { %5506 = vmatprep.subr.bf16.mxu0 %v5505_v22  ;;  %v3927_v22 = vld [vmem:[#allocation16 + $0x728] sm:$0xff]  ;;  %v5561_v53 = vpack.c.bf16 %v3953_v32, %v3951_v58 }
 0xa62   : > { %v5537_v11 = vpack.c.bf16 %v3929_v55, %v3927_v22  ;;  %5935 = vpow2.f32 %v3632_v49  ;;  %v3954_v49 = vld [vmem:[%s7381_s22] sm:$0x3] }
 0xa63   : > { %4191 = vmatmul.mubr.f32.gmra.mrb[26].mxu0 %v3694_v15  ;;  %v3933_v15 = vld [vmem:[#allocation16 + $0x758] sm:$0xff] }
 0xa64   : > { %5508 = vmatpush1.bf16.msra.mxu0 %v5507_v1  ;;  %4261 = vmatprep.mubr.f32.mxu0 %v3689_v4  ;;  %v3931_v1 = vld [vmem:[#allocation16 + $0x748] sm:$0xff]  ;;  %v3930_v4 = vld [vmem:[#allocation16 + $0x740] sm:$0xff] }
 0xa65   : > { %5510 = vmatprep.subr.bf16.mxu0 %v5509_v26  ;;  %v3630_v26 = vmul.f32 1.442695, %v4532_v9  ;;  %v5541_v38 = vpack.c.bf16 %v3933_v15, %v3931_v1 }
 0xa67   : > { %5937 = vpow2.f32 %v3630_v26 }
 0xa68   : > { %5512 = vmatpush1.bf16.msra.mxu0 %v5511_v42  ;;  %v3937_v42 = vld [vmem:[#allocation16 + $0x778] sm:$0xff]  ;;  %5939 = vrcp.f32 %v3640_v51 }
 0xa69   : > { %5514 = vmatprep.subr.bf16.mxu0 %v5513_v20  ;;  %v5543_v20 = vpack.c.bf16 %v3932_v29, %v3930_v4  ;;  %v5545_v10 = vpack.c.bf16 %v3937_v42, %v3935_v24 }
 0xa6c   : > { %5516 = vmatpush1.bf16.msra.mxu0 %v5515_v7  ;;  %v3941_v7 = vld [vmem:[#allocation16 + $0x798] sm:$0xff]  ;;  %v5936_v40 = vpop.eup %5935 }
 0xa6d   : > { %5518 = vmatprep.subr.bf16.mxu0 %v5517_v34  ;;  %v5547_v34 = vpack.c.bf16 %v3936_v25, %v3934_v43  ;;  %v5549_v8 = vpack.c.bf16 %v3941_v7, %v3939_v44  ;;  %v3649_v17 = vadd.f32 1.0, %v5936_v40 }
 0xa6f   : > { %5941 = vrcp.f32 %v3649_v17 }
 0xa70   : > { %5520 = vmatpush1.bf16.msra.mxu0 %v5519_v14  ;;  %v3943_v14 = vld [vmem:[#allocation16 + $0x7a8] sm:$0xff] }
 0xa71   : > { %5522 = vmatprep.subr.bf16.mxu0 %v5521_v46  ;;  %v3945_v46 = vld [vmem:[#allocation16 + $0x7b8] sm:$0xff]  ;;  %v5938_v33 = vpop.eup %5937 }
 0xa72   : > { %v5553_v31 = vpack.c.bf16 %v3945_v46, %v3943_v14  ;;  %v3648_v39 = vadd.f32 1.0, %v5938_v33  ;;  %v5940_v30 = vpop.eup %5939 }
 0xa73   : > { %v3688_v22 = vmul.f32 %v5940_v30, %v7255_v61 }
 0xa74   : > { %5524 = vmatpush1.bf16.msra.mxu0 %v5523_v36  ;;  %v3942_v36 = vld [vmem:[#allocation16 + $0x7a0] sm:$0xff]  ;;  %5943 = vrcp.f32 %v3648_v39 }
 0xa75   : > { %5526 = vmatprep.subr.bf16.mxu0 %v5525_v37  ;;  %v3944_v37 = vld [vmem:[#allocation16 + $0x7b0] sm:$0xff] }
 0xa76   : > { %v5555_v52 = vpack.c.bf16 %v3944_v37, %v3942_v36 }
 0xa78   : > { %5528 = vmatpush1.bf16.msra.mxu0 %v5527_v54  ;;  %v5557_v54 = vpack.c.bf16 %v3949_v50, %v3947_v56 }
 0xa79   : > { %5530 = vmatprep.subr.bf16.mxu0 %v5529_v5  ;;  %v3946_v5 = vld [vmem:[#allocation16 + $0x7c0] sm:$0xff]  ;;  %v5942_v18 = vpop.eup %5941 }
 0xa7a   : > { %v5559_v60 = vpack.c.bf16 %v3948_v59, %v3946_v5  ;;  %v3697_v27 = vmul.f32 %v5942_v18, %v7259_v0 }
 0xa7c   : > { %5532 = vmatpush1.bf16.msra.mxu0 %v5531_v16  ;;  %v3952_v16 = vld [vmem:[#allocation16 + $0x7f0] sm:$0xff] }
 0xa7d   : > { %5534 = vmatprep.subr.bf16.mxu0 %v5533_v48  ;;  %v5563_v48 = vpack.c.bf16 %v3952_v16, %v3950_v62 }
 0xa7e   : > { %v5944_v55 = vpop.eup %5943 }
 0xa7f   : > { %v3696_v9 = vmul.f32 %v5944_v55, %v7263_v21 }
 0xa80   : > { %5536 = vmatpush1.bf16.msra.mxu0 %v5535_v19  ;;  %v3959_v19 = vrot.slane %v3954_v49, %v6748_v3 }
 0xa81   : > { %5538 = vmatprep.subr.bf16.mxu0 %v5537_v11  ;;  %v3963_v11 = vrot.slane %v3954_v49, %v6745_v63 }
 0xa84   : > { %5540 = vmatpush1.bf16.msra.mxu0 %v5539_v57 }
 0xa85   : > { %5542 = vmatprep.subr.bf16.mxu0 %v5541_v38 }
 0xa88   : > { %5544 = vmatpush1.bf16.msra.mxu0 %v5543_v20 }
 0xa89   : > { %5546 = vmatprep.subr.bf16.mxu0 %v5545_v10 }
 0xa8c   : > { %5548 = vmatpush1.bf16.msra.mxu0 %v5547_v34 }
 0xa8d   : > { %5550 = vmatprep.subr.bf16.mxu0 %v5549_v8 }
 0xa90   : > { %5552 = vmatpush1.bf16.msra.mxu0 %v5551_v35 }
 0xa91   : > { %5554 = vmatprep.subr.bf16.mxu0 %v5553_v31 }
 0xa94   : > { %5556 = vmatpush1.bf16.msra.mxu0 %v5555_v52 }
 0xa95   : > { %5558 = vmatprep.subr.bf16.mxu0 %v5557_v54 }
 0xa98   : > { %5560 = vmatpush1.bf16.msra.mxu0 %v5559_v60 }
 0xa99   : > { %5562 = vmatprep.subr.bf16.mxu0 %v5561_v53 }
 0xa9c   : > { %5564 = vmatpush1.bf16.msra.mxu0 %v5563_v48 }
 0xa9f   : > { %4262 = vmatmul.mubr.f32.vlgmr.msra.gmra.mrb[24].mxu0 %v3688_v22 }
 0xaa0   : > { %4267 = vmatprep.mubr.f32.mxu0 %v3697_v27 }
 0xaa3   : > { %4268 = vmatmul.mubr.f32.gmra.mrb[26].mxu0 %v3696_v9 }
 0xb72   : > { %v4263_v41 = vpop.f32.mrb[24].mxu0 }
 0xb73   : > { %v5565_v45 = vadd.f32 %v4263_v41, %v3959_v19  ;;  %v4265_v61 = vpop.f32.mrb[25].mxu0 }
 0xb74   : > { %v5566_v1 = vadd.f32 %v4265_v61, %v3963_v11 }
 0xb75   : > { %v4274_v0 = vadd.f32 %v5565_v45, %v7075_v28 }
 0xb76   : > { %v4275_v21 = vadd.f32 %v5566_v1, %v7078_v2  ;;  %v4269_v15 = vpop.f32.mrb[26].mxu0 }
 0xb77   : > { %4278 = vst [vmem:[%s566_s3] sm:$0xff] %v4274_v0  ;;  %v5567_v26 = vadd.f32 %v4269_v15, %v3959_v19  ;;  %v4271_v3 = vpop.f32.mrb[27].mxu0 }
 0xb78   : > { %4279 = vst [vmem:[%s566_s3 + $0x8] sm:$0xff] %v4275_v21  ;;  %v5568_v63 = vadd.f32 %v4271_v3, %v3963_v11 }
 0xb79   : > { %v4276_v28 = vadd.f32 %v5567_v26, %v7083_v23 }
 0xb7a   : > { %v4277_v2 = vadd.f32 %v5568_v63, %v7086_v12 }
 0xb7b   : > { %4280 = vst [vmem:[%s566_s3 + $0x10] sm:$0xff] %v4276_v28 }
 0xb7c   : > { %4281 = vst [vmem:[%s566_s3 + $0x18] sm:$0xff] %v4277_v2 }
 0xb7d   : > { %6216 = shalt.err (!%p6213_p0)
}
 0xb7e   : > { %s6217_s22 = scalar_lea.hbm %s7286_s1, 512  ;;  %s6221_s18 = scalar_lea.hbm %s7382_s13, 1024 }
 0xb7f   : > { %p6218_p2 = scmp.ne.s32.totalorder %s7286_s1, %s6217_s22  ;;  %p6222_p11 = scmp.lt.u32.totalorder %s7286_s1, %s7382_s13 }
 0xb80   : > { %p6223_p6 = scmp.lt.u32.totalorder %s6221_s18, %s6217_s22  ;;  %p6225_p5 = scmp.lt.u32.totalorder %s6217_s22, %s7286_s1 }
 0xb81   : > { %p6219_p9 = pnand %p6218_p2, %p7383_p7 }
 0xb82   : > { %p6224_p12 = por %p6223_p6, %p6222_p11 }
 0xb83   : > { %p6220_p10 = pneg %p6219_p9 }
 0xb84   : > { %p6226_p4 = por %p6225_p5, %p6224_p12 }
 0xb86   : > { %p6227_p1 = pnand %p6226_p4, %p6220_p10 }
 0xb88   : > { %6230 = shalt.err (!%p6227_p1)
}
 0xb89   : > { %s6306_s29 = smov 256   ;;  %s6307_s19 = smov 16  }
 0xb8a   : > { %5615 = dma.vmem_to_hbm [thread:$0]  (%p7383_p7), %s7280_s30, 512, %s7286_s1, %s4283_s14, %s6306_s29, %s6306_s29, %s6307_s19  }
 0xb8b PF: > { %s4311_s15 = sand.u32 1, %s6273_s25   ;;  %p7384_p3 = scmp.ne.s32.totalorder %s7365_s17, 0 }
 0xb8c   : > { %p7385_p8 = scmp.ge.s32.totalorder %s6285_s28, 2  ;;  %s4312_s22 = scalar_lea.sflag [#allocation4], %s4311_s15 }
 0xb8e   : > { %p5647_p13 = pnand %p7385_p8, %p7384_p3 }
 0xb90   : > { %6268 = dma.done.wait (!%p5647_p13), %s4312_s22, 512  }
 0xb91   : > { %6270 = vsyncadd (!%p5647_p13), %s4312_s22, 4294966784  ;;  %p30_p0 = scmp.ge.s32.totalorder %s6596_s16, 4   ;;  %s7386_s25 = smov %s6277_s26 }
 0xb92   : > { %s7387_s26 = smov %s6281_s27  ;;  %s7388_s27 = smov %s6607_s24 }
 0xb93   : > { %s7389_s28 = smov %s6596_s16  ;;  %32 = sbr.rel (!%p30_p0) target bundleno = 15 (0xf), region = 149 }
 0xb9a   :  { %4317 = vsyncpa [#allocation3], 1 }
 0xb9b   :  { %4319 = vsyncpa [#allocation3 + $0x1], 1 }
 0xb9c   :  { %4320 = vsyncpa [#allocation6], 1 }
 0xb9d   :  { %4321 = vsyncpa [#allocation9], 1 }
 0xb9e   :  { %4322 = vsyncpa [#allocation12], 1 }
 0xb9f   :  { %4323 = vsyncpa [#allocation15], 1 }
 0xba0   :  { %4324 = vsyncpa [#allocation4], 1 }
 0xba1   :  { %4326 = vsyncpa [#allocation4 + $0x1], 1 }

</bundles_post_ra>
